<compile_context>
chip_gen: v5e
topology: v5e:2x2
jax: 0.10.0
libtpu: 0.0.40
codegen_flags: <defaults>
</compile_context>

<pallas_src>
import functools

import jax
import jax.numpy as jnp
from jax.experimental import pallas as pl
from jax.experimental.pallas import tpu as pltpu

HEADS = 8
DIM_HEAD = 64
INNER = HEADS * DIM_HEAD  # 512
_SQRT_2_OVER_PI = 0.7978845608028654


def _ln(x, g, b, eps):
    # PyTorch LayerNorm semantics (biased variance over the last dim), f32 math.
    mu = jnp.mean(x, axis=-1, keepdims=True)
    xc = x - mu
    var = jnp.mean(xc * xc, axis=-1, keepdims=True)
    return xc * jax.lax.rsqrt(var + eps) * g + b


# --------------------------------------------------------------------------------------
# Fused CrossTransformer kernel.  One grid step == Bt batch elements; projections,
# attention, both residual LayerNorms and the FFN all stay VMEM-resident.
# --------------------------------------------------------------------------------------
def _cross_transformer_kernel(tgt_ref, src_ref,
                              wq_ref, wk_ref, wv_ref, wo_ref, w1_ref, w2_ref,
                              vecd_ref, b1_ref,
                              o_ref, cat_ref,
                              *, heads, dim_head, eps, bt, nq, nk):
    d = tgt_ref.shape[-1]
    rows = bt * nq

    # (Bt, Nq, D) -> (Bt*Nq, D): leading-dim merge (layout no-op for Nq multiple of 8).
    q_in = tgt_ref[...].reshape(rows, d).astype(jnp.float32)        # (rows, D)
    kv_in = src_ref[...].reshape(bt * nk, d).astype(jnp.float32)    # (Bt*Nk, D)

    # bf16 operands into the MXU, f32 accumulation.
    q_bf = q_in.astype(jnp.bfloat16)
    kv_bf = kv_in.astype(jnp.bfloat16)

    # --- QKV projections (bias-free, as in MultiHAtten); scale folded into Q once. ----
    scale = dim_head ** -0.5
    qp = jnp.dot(q_bf, wq_ref[...], preferred_element_type=jnp.float32) * scale
    kp = jnp.dot(kv_bf, wk_ref[...], preferred_element_type=jnp.float32)
    vp = jnp.dot(kv_bf, wv_ref[...], preferred_element_type=jnp.float32)
    qp = qp.astype(jnp.bfloat16)
    kp = kp.astype(jnp.bfloat16)
    vp = vp.astype(jnp.bfloat16)

    # --- multi-head attention: per (batch, head) softmax, statically unrolled.
    # Each head's output is written into the concat scratch at lane offset h*64 so the
    # output projection is a single K=512 dot afterwards.
    # TODO(synk): a head-batched dot_general needs a (rows, 512)->(rows, 8, 64)
    # lane-splitting reshape that Mosaic does not reliably lower; keep the unrolled loop.
    for b in range(bt):
        qr = slice(b * nq, (b + 1) * nq)
        kr = slice(b * nk, (b + 1) * nk)
        for h in range(heads):
            cols = slice(h * dim_head, (h + 1) * dim_head)
            qh = qp[qr, cols]                                       # (Nq, dh) bf16
            kh = kp[kr, cols]                                       # (Nk, dh) bf16
            vh = vp[kr, cols]                                       # (Nk, dh) bf16
            s = jax.lax.dot_general(qh, kh, (((1,), (1,)), ((), ())),
                                    preferred_element_type=jnp.float32)   # (Nq, Nk) f32
            s = s - jnp.max(s, axis=-1, keepdims=True)
            p = jnp.exp(s)
            p = p * pl.reciprocal(jnp.sum(p, axis=-1, keepdims=True), approx=True)
            oh = jnp.dot(p.astype(jnp.bfloat16), vh,
                         preferred_element_type=jnp.float32)              # (Nq, dh) f32
            cat_ref[qr, cols] = oh.astype(jnp.bfloat16)

    # --- single K=512 output projection over the head-concat scratch ------------------
    vec = vecd_ref[...].astype(jnp.float32)                               # (8, D)
    attn_out = jnp.dot(cat_ref[...], wo_ref[...],
                       preferred_element_type=jnp.float32) + vec[0]       # + bo

    # --- residual + LayerNorm1 --------------------------------------------------------
    x1 = _ln(attn_out + q_in, vec[1], vec[2], eps)

    # --- FeedForward: LN -> Linear -> GELU(tanh approx) -> Linear ---------------------
    xn = _ln(x1, vec[3], vec[4], eps)
    hdn = jnp.dot(xn.astype(jnp.bfloat16), w1_ref[...],
                  preferred_element_type=jnp.float32) + b1_ref[0]
    # tanh-approx GELU (EUP op) instead of nn.GELU's exact erf: tiny numerical deviation.
    hdn = 0.5 * hdn * (1.0 + jnp.tanh(_SQRT_2_OVER_PI * (hdn + 0.044715 * hdn * hdn * hdn)))
    ff = jnp.dot(hdn.astype(jnp.bfloat16), w2_ref[...],
                 preferred_element_type=jnp.float32) + vec[5]             # + b2

    # --- residual + LayerNorm2 --------------------------------------------------------
    x2 = _ln(ff + x1, vec[6], vec[7], eps)
    o_ref[...] = x2.reshape(bt, nq, d).astype(o_ref.dtype)


def _pick_block_batch(B, Nq, row_cap=256, row_target=128):
    """Largest divisor of B whose merged row count Bt*Nq stays within ~row_cap;
    prefer >=2 grid steps (v7x megacore) when the MXU row fill can be kept."""
    divs = [d for d in range(1, B + 1) if B % d == 0 and d * Nq <= max(row_cap, Nq)]
    best = max(divs)
    two_step = [d for d in divs if B // d >= 2 and d * Nq >= row_target]
    if two_step:
        best = max(two_step)
    return best


def cross_transformer_fwd(p, source_x, target_x, *, block_batch=None):
    """CrossTransformer.forward(source_x, target_x) — one fused pallas_call."""
    B, Nq, D = target_x.shape
    Nk = source_x.shape[1]
    a, f = p["attn"], p["ffn"]
    mlp = f["w1"].shape[1]

    bt = _pick_block_batch(B, Nq) if block_batch is None else block_batch
    assert B % bt == 0, "block_batch must divide the batch size"
    grid = (B // bt,)

    # bf16 weights into VMEM (half DMA bytes / residency); matmuls accumulate in f32.
    wq = a["wq"].astype(jnp.bfloat16)
    wk = a["wk"].astype(jnp.bfloat16)
    wv = a["wv"].astype(jnp.bfloat16)
    wo = a["wo"].astype(jnp.bfloat16)
    w1 = f["w1"].astype(jnp.bfloat16)
    w2 = f["w2"].astype(jnp.bfloat16)

    # Pack the small per-feature vectors: 8 D-sized rows + one mlp-sized bias.
    vecd = jnp.concatenate(
        [a["bo"], p["ln1_g"], p["ln1_b"], f["norm_g"], f["norm_b"],
         f["b2"], p["ln2_g"], p["ln2_b"]], axis=0).astype(jnp.float32)     # (8, D)
    b1 = f["b1"].astype(jnp.float32)                                       # (1, mlp)

    kernel = functools.partial(_cross_transformer_kernel,
                               heads=HEADS, dim_head=DIM_HEAD, eps=1e-5,
                               bt=bt, nq=Nq, nk=Nk)

    wspec = lambda shape: pl.BlockSpec(shape, lambda i: (0, 0))  # resident weights

    return pl.pallas_call(
        kernel,
        out_shape=jax.ShapeDtypeStruct((B, Nq, D), jnp.float32),
        grid=grid,
        in_specs=[
            pl.BlockSpec((bt, Nq, D), lambda i: (i, 0, 0)),   # target_x  (query)
            pl.BlockSpec((bt, Nk, D), lambda i: (i, 0, 0)),   # source_x  (key/value)
            wspec((D, INNER)),                                # wq
            wspec((D, INNER)),                                # wk
            wspec((D, INNER)),                                # wv
            wspec((INNER, D)),                                # wo
            wspec((D, mlp)),                                  # ffn w1
            wspec((mlp, D)),                                  # ffn w2
            wspec((8, D)),                                    # packed D-sized vectors
            wspec((1, mlp)),                                  # ffn b1
        ],
        out_specs=pl.BlockSpec((bt, Nq, D), lambda i: (i, 0, 0)),
        scratch_shapes=[pltpu.VMEM((bt * Nq, INNER), jnp.bfloat16)],  # head-concat buffer
        compiler_params=pltpu.CompilerParams(
            dimension_semantics=("parallel",),                # batch steps are independent
            vmem_limit_bytes=32 * 1024 * 1024,                # portable across v5e..v7x
        ),
    )(target_x, source_x, wq, wk, wv, wo, w1, w2, vecd, b1)


# --------------------------------------------------------------------------------------
# Pure-JAX reference (mirrors the PyTorch module exactly: f32, exact softmax, erf GELU).
# --------------------------------------------------------------------------------------
def cross_transformer_ref(p, source_x, target_x):
    a, f = p["attn"], p["ffn"]

    def ln(x, g, b, eps=1e-5):
        mu = jnp.mean(x, -1, keepdims=True)
        var = jnp.mean((x - mu) ** 2, -1, keepdims=True)
        return (x - mu) * jax.lax.rsqrt(var + eps) * g + b

    B, Nq, D = target_x.shape

    def split(x):
        Bx, N, _ = x.shape
        return x.reshape(Bx, N, HEADS, DIM_HEAD).transpose(0, 2, 1, 3)

    qh = split(target_x @ a["wq"])
    kh = split(source_x @ a["wk"])
    vh = split(source_x @ a["wv"])
    s = jnp.einsum("bhqd,bhkd->bhqk", qh, kh) * (DIM_HEAD ** -0.5)
    attn = jax.nn.softmax(s, axis=-1)
    o = jnp.einsum("bhqk,bhkd->bhqd", attn, vh)
    o = o.transpose(0, 2, 1, 3).reshape(B, Nq, INNER)
    attn_out = o @ a["wo"] + a["bo"]

    x1 = ln(attn_out + target_x, p["ln1_g"], p["ln1_b"])
    xn = ln(x1, f["norm_g"], f["norm_b"])
    h = jax.nn.gelu(xn @ f["w1"] + f["b1"], approximate=False)
    ff = h @ f["w2"] + f["b2"]
    return ln(ff + x1, p["ln2_g"], p["ln2_b"])


# --------------------------------------------------------------------------------------
# Deterministic synthetic parameters (shapes follow CrossTransformer.__init__)
# --------------------------------------------------------------------------------------
def init_params(key, dim, mlp_dim):
    keys = iter(jax.random.split(key, 32))

    def lin(d_in, d_out, bias=True):
        w = jax.random.normal(next(keys), (d_in, d_out), jnp.float32) * 0.05
        b = (jax.random.normal(next(keys), (1, d_out), jnp.float32) * 0.02) if bias else None
        return w, b

    def ln_p():
        g = 1.0 + 0.1 * jax.random.normal(next(keys), (1, dim), jnp.float32)
        b = 0.05 * jax.random.normal(next(keys), (1, dim), jnp.float32)
        return g, b

    wq, _ = lin(dim, INNER, bias=False)
    wk, _ = lin(dim, INNER, bias=False)
    wv, _ = lin(dim, INNER, bias=False)
    wo, bo = lin(INNER, dim)
    ng, nb = ln_p()
    w1, b1 = lin(dim, mlp_dim)
    w2, b2 = lin(mlp_dim, dim)
    g1, be1 = ln_p()
    g2, be2 = ln_p()
    return dict(attn=dict(wq=wq, wk=wk, wv=wv, wo=wo, bo=bo),
                ln1_g=g1, ln1_b=be1, ln2_g=g2, ln2_b=be2,
                ffn=dict(norm_g=ng, norm_b=nb, w1=w1, b1=b1, w2=w2, b2=b2))


if __name__ == "__main__":
    key = jax.random.PRNGKey(0)
    D, MLP = 256, 512          # hidden dim, FFN hidden dim
    B, Nq, Nk = 2, 8, 16       # batch, target (query) seq, source (key/value) seq

    pkey, k1, k2 = jax.random.split(key, 3)
    params = init_params(pkey, D, MLP)
    source_x = jax.random.normal(k1, (B, Nk, D), jnp.float32)
    target_x = jax.random.normal(k2, (B, Nq, D), jnp.float32)

    out = cross_transformer_fwd(params, source_x, target_x)
    out = jax.block_until_ready(out)
    ref = jax.block_until_ready(cross_transformer_ref(params, source_x, target_x))

    assert out.shape == (B, Nq, D)
    assert bool(jnp.all(jnp.isfinite(out)))
    # bf16 matmul operands + tanh-approx GELU are intentional (perf review); allow a
    # slightly looser absolute tolerance vs the exact f32/erf reference.
    max_err = float(jnp.max(jnp.abs(out - ref)))
    assert max_err < 1e-1, f"max abs err vs reference: {max_err}"
    print("KERNEL_OK")
</pallas_src>

<mosaic_0001>
module attributes {stable_mosaic.version = 11 : i64} {
  func.func @_cross_transformer_kernel(%arg0: i32, %arg1: memref<2x8x256xf32, #tpu.memory_space<vmem>>, %arg2: memref<2x16x256xf32, #tpu.memory_space<vmem>>, %arg3: memref<256x512xbf16, #tpu.memory_space<vmem>>, %arg4: memref<256x512xbf16, #tpu.memory_space<vmem>>, %arg5: memref<256x512xbf16, #tpu.memory_space<vmem>>, %arg6: memref<512x256xbf16, #tpu.memory_space<vmem>>, %arg7: memref<256x512xbf16, #tpu.memory_space<vmem>>, %arg8: memref<512x256xbf16, #tpu.memory_space<vmem>>, %arg9: memref<8x256xf32, #tpu.memory_space<vmem>>, %arg10: memref<1x512xf32, #tpu.memory_space<vmem>>, %arg11: memref<2x8x256xf32, #tpu.memory_space<vmem>>, %arg12: memref<16x512xbf16, #tpu.memory_space<vmem>>) attributes {dimension_semantics = [#tpu.dimension_semantics<parallel>], iteration_bounds = array<i64: 1>, scalar_prefetch = 0 : i64, scratch_operands = 1 : i64, tpu.core_type = #tpu.core_type<tc>, window_params = [{transform_indices = @transform_0, window_bounds = array<i64: 2, 8, 256>}, {transform_indices = @transform_1, window_bounds = array<i64: 2, 16, 256>}, {pipeline_mode = #tpu.pipeline_mode<synchronous>, transform_indices = @transform_2, window_bounds = array<i64: 256, 512>}, {pipeline_mode = #tpu.pipeline_mode<synchronous>, transform_indices = @transform_3, window_bounds = array<i64: 256, 512>}, {pipeline_mode = #tpu.pipeline_mode<synchronous>, transform_indices = @transform_4, window_bounds = array<i64: 256, 512>}, {pipeline_mode = #tpu.pipeline_mode<synchronous>, transform_indices = @transform_5, window_bounds = array<i64: 512, 256>}, {pipeline_mode = #tpu.pipeline_mode<synchronous>, transform_indices = @transform_6, window_bounds = array<i64: 256, 512>}, {pipeline_mode = #tpu.pipeline_mode<synchronous>, transform_indices = @transform_7, window_bounds = array<i64: 512, 256>}, {pipeline_mode = #tpu.pipeline_mode<synchronous>, transform_indices = @transform_8, window_bounds = array<i64: 8, 256>}, {pipeline_mode = #tpu.pipeline_mode<synchronous>, transform_indices = @transform_9, window_bounds = array<i64: 1, 512>}, {transform_indices = @transform_10, window_bounds = array<i64: 2, 8, 256>}]} {
    %c0 = arith.constant 0 : index
    %c0_0 = arith.constant 0 : index
    %c0_1 = arith.constant 0 : index
    %0 = vector.load %arg1[%c0, %c0_0, %c0_1] : memref<2x8x256xf32, #tpu.memory_space<vmem>>, vector<2x8x256xf32>
    %1 = vector.shape_cast %0 : vector<2x8x256xf32> to vector<16x256xf32>
    %c0_2 = arith.constant 0 : index
    %c0_3 = arith.constant 0 : index
    %c0_4 = arith.constant 0 : index
    %2 = vector.load %arg2[%c0_2, %c0_3, %c0_4] : memref<2x16x256xf32, #tpu.memory_space<vmem>>, vector<2x16x256xf32>
    %3 = vector.shape_cast %2 : vector<2x16x256xf32> to vector<32x256xf32>
    %4 = arith.truncf %1 : vector<16x256xf32> to vector<16x256xbf16>
    %5 = arith.truncf %3 : vector<32x256xf32> to vector<32x256xbf16>
    %c0_5 = arith.constant 0 : index
    %c0_6 = arith.constant 0 : index
    %6 = vector.load %arg3[%c0_5, %c0_6] : memref<256x512xbf16, #tpu.memory_space<vmem>>, vector<256x512xbf16>
    %cst = arith.constant dense<0.000000e+00> : vector<16x512xf32>
    %7 = tpu.matmul %4, %6, %cst {dimension_numbers = #tpu.dot_dimension_numbers<[1], [0], [0], [1], [0, 0, 1, 1], [], []>} : vector<16x256xbf16>, vector<256x512xbf16>, vector<16x512xf32> -> vector<16x512xf32>
    %cst_7 = arith.constant 1.250000e-01 : f32
    %8 = vector.broadcast %cst_7 : f32 to vector<16x512xf32>
    %9 = arith.mulf %7, %8 : vector<16x512xf32>
    %c0_8 = arith.constant 0 : index
    %c0_9 = arith.constant 0 : index
    %10 = vector.load %arg4[%c0_8, %c0_9] : memref<256x512xbf16, #tpu.memory_space<vmem>>, vector<256x512xbf16>
    %cst_10 = arith.constant dense<0.000000e+00> : vector<32x512xf32>
    %11 = tpu.matmul %5, %10, %cst_10 {dimension_numbers = #tpu.dot_dimension_numbers<[1], [0], [0], [1], [0, 0, 1, 1], [], []>} : vector<32x256xbf16>, vector<256x512xbf16>, vector<32x512xf32> -> vector<32x512xf32>
    %c0_11 = arith.constant 0 : index
    %c0_12 = arith.constant 0 : index
    %12 = vector.load %arg5[%c0_11, %c0_12] : memref<256x512xbf16, #tpu.memory_space<vmem>>, vector<256x512xbf16>
    %cst_13 = arith.constant dense<0.000000e+00> : vector<32x512xf32>
    %13 = tpu.matmul %5, %12, %cst_13 {dimension_numbers = #tpu.dot_dimension_numbers<[1], [0], [0], [1], [0, 0, 1, 1], [], []>} : vector<32x256xbf16>, vector<256x512xbf16>, vector<32x512xf32> -> vector<32x512xf32>
    %14 = arith.truncf %9 : vector<16x512xf32> to vector<16x512xbf16>
    %15 = arith.truncf %11 : vector<32x512xf32> to vector<32x512xbf16>
    %16 = arith.truncf %13 : vector<32x512xf32> to vector<32x512xbf16>
    %17 = vector.extract_strided_slice %14 {offsets = [0, 0], sizes = [8, 64], strides = [1, 1]} : vector<16x512xbf16> to vector<8x64xbf16>
    %18 = vector.extract_strided_slice %15 {offsets = [0, 0], sizes = [16, 64], strides = [1, 1]} : vector<32x512xbf16> to vector<16x64xbf16>
    %19 = vector.extract_strided_slice %16 {offsets = [0, 0], sizes = [16, 64], strides = [1, 1]} : vector<32x512xbf16> to vector<16x64xbf16>
    %cst_14 = arith.constant dense<0.000000e+00> : vector<8x16xf32>
    %20 = tpu.matmul %17, %18, %cst_14 {dimension_numbers = #tpu.dot_dimension_numbers<[1], [1], [0], [0], [0, 0, 1, 0], [], []>} : vector<8x64xbf16>, vector<16x64xbf16>, vector<8x16xf32> -> vector<8x16xf32>
    %cst_15 = arith.constant dense<0xFF800000> : vector<8xf32>
    %21 = vector.multi_reduction <maximumf>, %20, %cst_15 [1] : vector<8x16xf32> to vector<8xf32>
    %22 = vector.shape_cast %21 : vector<8xf32> to vector<8x1xf32>
    %23 = vector.broadcast %22 : vector<8x1xf32> to vector<8x16xf32>
    %24 = arith.subf %20, %23 : vector<8x16xf32>
    %25 = math.exp %24 : vector<8x16xf32>
    %cst_16 = arith.constant dense<0.000000e+00> : vector<8xf32>
    %26 = vector.multi_reduction <add>, %25, %cst_16 [1] : vector<8x16xf32> to vector<8xf32>
    %27 = vector.shape_cast %26 : vector<8xf32> to vector<8x1xf32>
    %28 = tpu.reciprocal %27 {approx = true} : vector<8x1xf32> -> vector<8x1xf32>
    %29 = vector.broadcast %28 : vector<8x1xf32> to vector<8x16xf32>
    %30 = arith.mulf %25, %29 : vector<8x16xf32>
    %31 = arith.truncf %30 : vector<8x16xf32> to vector<8x16xbf16>
    %cst_17 = arith.constant dense<0.000000e+00> : vector<8x64xf32>
    %32 = tpu.matmul %31, %19, %cst_17 {dimension_numbers = #tpu.dot_dimension_numbers<[1], [0], [0], [1], [0, 0, 1, 1], [], []>} : vector<8x16xbf16>, vector<16x64xbf16>, vector<8x64xf32> -> vector<8x64xf32>
    %33 = arith.truncf %32 : vector<8x64xf32> to vector<8x64xbf16>
    %c0_18 = arith.constant 0 : index
    %c0_19 = arith.constant 0 : index
    %34 = vector.load %arg12[%c0_18, %c0_19] : memref<16x512xbf16, #tpu.memory_space<vmem>>, vector<8x64xbf16>
    tpu.vector_store %arg12[%c0_18, %c0_19], %33 {strides = array<i32>} : memref<16x512xbf16, #tpu.memory_space<vmem>>, vector<8x64xbf16>,
    %35 = vector.extract_strided_slice %14 {offsets = [0, 64], sizes = [8, 64], strides = [1, 1]} : vector<16x512xbf16> to vector<8x64xbf16>
    %36 = vector.extract_strided_slice %15 {offsets = [0, 64], sizes = [16, 64], strides = [1, 1]} : vector<32x512xbf16> to vector<16x64xbf16>
    %37 = vector.extract_strided_slice %16 {offsets = [0, 64], sizes = [16, 64], strides = [1, 1]} : vector<32x512xbf16> to vector<16x64xbf16>
    %cst_20 = arith.constant dense<0.000000e+00> : vector<8x16xf32>
    %38 = tpu.matmul %35, %36, %cst_20 {dimension_numbers = #tpu.dot_dimension_numbers<[1], [1], [0], [0], [0, 0, 1, 0], [], []>} : vector<8x64xbf16>, vector<16x64xbf16>, vector<8x16xf32> -> vector<8x16xf32>
    %cst_21 = arith.constant dense<0xFF800000> : vector<8xf32>
    %39 = vector.multi_reduction <maximumf>, %38, %cst_21 [1] : vector<8x16xf32> to vector<8xf32>
    %40 = vector.shape_cast %39 : vector<8xf32> to vector<8x1xf32>
    %41 = vector.broadcast %40 : vector<8x1xf32> to vector<8x16xf32>
    %42 = arith.subf %38, %41 : vector<8x16xf32>
    %43 = math.exp %42 : vector<8x16xf32>
    %cst_22 = arith.constant dense<0.000000e+00> : vector<8xf32>
    %44 = vector.multi_reduction <add>, %43, %cst_22 [1] : vector<8x16xf32> to vector<8xf32>
    %45 = vector.shape_cast %44 : vector<8xf32> to vector<8x1xf32>
    %46 = tpu.reciprocal %45 {approx = true} : vector<8x1xf32> -> vector<8x1xf32>
    %47 = vector.broadcast %46 : vector<8x1xf32> to vector<8x16xf32>
    %48 = arith.mulf %43, %47 : vector<8x16xf32>
    %49 = arith.truncf %48 : vector<8x16xf32> to vector<8x16xbf16>
    %cst_23 = arith.constant dense<0.000000e+00> : vector<8x64xf32>
    %50 = tpu.matmul %49, %37, %cst_23 {dimension_numbers = #tpu.dot_dimension_numbers<[1], [0], [0], [1], [0, 0, 1, 1], [], []>} : vector<8x16xbf16>, vector<16x64xbf16>, vector<8x64xf32> -> vector<8x64xf32>
    %51 = arith.truncf %50 : vector<8x64xf32> to vector<8x64xbf16>
    %c0_24 = arith.constant 0 : index
    %c64 = arith.constant 64 : index
    %52 = vector.load %arg12[%c0_24, %c64] : memref<16x512xbf16, #tpu.memory_space<vmem>>, vector<8x64xbf16>
    tpu.vector_store %arg12[%c0_24, %c64], %51 {strides = array<i32>} : memref<16x512xbf16, #tpu.memory_space<vmem>>, vector<8x64xbf16>,
    %53 = vector.extract_strided_slice %14 {offsets = [0, 128], sizes = [8, 64], strides = [1, 1]} : vector<16x512xbf16> to vector<8x64xbf16>
    %54 = vector.extract_strided_slice %15 {offsets = [0, 128], sizes = [16, 64], strides = [1, 1]} : vector<32x512xbf16> to vector<16x64xbf16>
    %55 = vector.extract_strided_slice %16 {offsets = [0, 128], sizes = [16, 64], strides = [1, 1]} : vector<32x512xbf16> to vector<16x64xbf16>
    %cst_25 = arith.constant dense<0.000000e+00> : vector<8x16xf32>
    %56 = tpu.matmul %53, %54, %cst_25 {dimension_numbers = #tpu.dot_dimension_numbers<[1], [1], [0], [0], [0, 0, 1, 0], [], []>} : vector<8x64xbf16>, vector<16x64xbf16>, vector<8x16xf32> -> vector<8x16xf32>
    %cst_26 = arith.constant dense<0xFF800000> : vector<8xf32>
    %57 = vector.multi_reduction <maximumf>, %56, %cst_26 [1] : vector<8x16xf32> to vector<8xf32>
    %58 = vector.shape_cast %57 : vector<8xf32> to vector<8x1xf32>
    %59 = vector.broadcast %58 : vector<8x1xf32> to vector<8x16xf32>
    %60 = arith.subf %56, %59 : vector<8x16xf32>
    %61 = math.exp %60 : vector<8x16xf32>
    %cst_27 = arith.constant dense<0.000000e+00> : vector<8xf32>
    %62 = vector.multi_reduction <add>, %61, %cst_27 [1] : vector<8x16xf32> to vector<8xf32>
    %63 = vector.shape_cast %62 : vector<8xf32> to vector<8x1xf32>
    %64 = tpu.reciprocal %63 {approx = true} : vector<8x1xf32> -> vector<8x1xf32>
    %65 = vector.broadcast %64 : vector<8x1xf32> to vector<8x16xf32>
    %66 = arith.mulf %61, %65 : vector<8x16xf32>
    %67 = arith.truncf %66 : vector<8x16xf32> to vector<8x16xbf16>
    %cst_28 = arith.constant dense<0.000000e+00> : vector<8x64xf32>
    %68 = tpu.matmul %67, %55, %cst_28 {dimension_numbers = #tpu.dot_dimension_numbers<[1], [0], [0], [1], [0, 0, 1, 1], [], []>} : vector<8x16xbf16>, vector<16x64xbf16>, vector<8x64xf32> -> vector<8x64xf32>
    %69 = arith.truncf %68 : vector<8x64xf32> to vector<8x64xbf16>
    %c0_29 = arith.constant 0 : index
    %c128 = arith.constant 128 : index
    %70 = vector.load %arg12[%c0_29, %c128] : memref<16x512xbf16, #tpu.memory_space<vmem>>, vector<8x64xbf16>
    tpu.vector_store %arg12[%c0_29, %c128], %69 {strides = array<i32>} : memref<16x512xbf16, #tpu.memory_space<vmem>>, vector<8x64xbf16>,
    %71 = vector.extract_strided_slice %14 {offsets = [0, 192], sizes = [8, 64], strides = [1, 1]} : vector<16x512xbf16> to vector<8x64xbf16>
    %72 = vector.extract_strided_slice %15 {offsets = [0, 192], sizes = [16, 64], strides = [1, 1]} : vector<32x512xbf16> to vector<16x64xbf16>
    %73 = vector.extract_strided_slice %16 {offsets = [0, 192], sizes = [16, 64], strides = [1, 1]} : vector<32x512xbf16> to vector<16x64xbf16>
    %cst_30 = arith.constant dense<0.000000e+00> : vector<8x16xf32>
    %74 = tpu.matmul %71, %72, %cst_30 {dimension_numbers = #tpu.dot_dimension_numbers<[1], [1], [0], [0], [0, 0, 1, 0], [], []>} : vector<8x64xbf16>, vector<16x64xbf16>, vector<8x16xf32> -> vector<8x16xf32>
    %cst_31 = arith.constant dense<0xFF800000> : vector<8xf32>
    %75 = vector.multi_reduction <maximumf>, %74, %cst_31 [1] : vector<8x16xf32> to vector<8xf32>
    %76 = vector.shape_cast %75 : vector<8xf32> to vector<8x1xf32>
    %77 = vector.broadcast %76 : vector<8x1xf32> to vector<8x16xf32>
    %78 = arith.subf %74, %77 : vector<8x16xf32>
    %79 = math.exp %78 : vector<8x16xf32>
    %cst_32 = arith.constant dense<0.000000e+00> : vector<8xf32>
    %80 = vector.multi_reduction <add>, %79, %cst_32 [1] : vector<8x16xf32> to vector<8xf32>
    %81 = vector.shape_cast %80 : vector<8xf32> to vector<8x1xf32>
    %82 = tpu.reciprocal %81 {approx = true} : vector<8x1xf32> -> vector<8x1xf32>
    %83 = vector.broadcast %82 : vector<8x1xf32> to vector<8x16xf32>
    %84 = arith.mulf %79, %83 : vector<8x16xf32>
    %85 = arith.truncf %84 : vector<8x16xf32> to vector<8x16xbf16>
    %cst_33 = arith.constant dense<0.000000e+00> : vector<8x64xf32>
    %86 = tpu.matmul %85, %73, %cst_33 {dimension_numbers = #tpu.dot_dimension_numbers<[1], [0], [0], [1], [0, 0, 1, 1], [], []>} : vector<8x16xbf16>, vector<16x64xbf16>, vector<8x64xf32> -> vector<8x64xf32>
    %87 = arith.truncf %86 : vector<8x64xf32> to vector<8x64xbf16>
    %c0_34 = arith.constant 0 : index
    %c192 = arith.constant 192 : index
    %88 = vector.load %arg12[%c0_34, %c192] : memref<16x512xbf16, #tpu.memory_space<vmem>>, vector<8x64xbf16>
    tpu.vector_store %arg12[%c0_34, %c192], %87 {strides = array<i32>} : memref<16x512xbf16, #tpu.memory_space<vmem>>, vector<8x64xbf16>,
    %89 = vector.extract_strided_slice %14 {offsets = [0, 256], sizes = [8, 64], strides = [1, 1]} : vector<16x512xbf16> to vector<8x64xbf16>
    %90 = vector.extract_strided_slice %15 {offsets = [0, 256], sizes = [16, 64], strides = [1, 1]} : vector<32x512xbf16> to vector<16x64xbf16>
    %91 = vector.extract_strided_slice %16 {offsets = [0, 256], sizes = [16, 64], strides = [1, 1]} : vector<32x512xbf16> to vector<16x64xbf16>
    %cst_35 = arith.constant dense<0.000000e+00> : vector<8x16xf32>
    %92 = tpu.matmul %89, %90, %cst_35 {dimension_numbers = #tpu.dot_dimension_numbers<[1], [1], [0], [0], [0, 0, 1, 0], [], []>} : vector<8x64xbf16>, vector<16x64xbf16>, vector<8x16xf32> -> vector<8x16xf32>
    %cst_36 = arith.constant dense<0xFF800000> : vector<8xf32>
    %93 = vector.multi_reduction <maximumf>, %92, %cst_36 [1] : vector<8x16xf32> to vector<8xf32>
    %94 = vector.shape_cast %93 : vector<8xf32> to vector<8x1xf32>
    %95 = vector.broadcast %94 : vector<8x1xf32> to vector<8x16xf32>
    %96 = arith.subf %92, %95 : vector<8x16xf32>
    %97 = math.exp %96 : vector<8x16xf32>
    %cst_37 = arith.constant dense<0.000000e+00> : vector<8xf32>
    %98 = vector.multi_reduction <add>, %97, %cst_37 [1] : vector<8x16xf32> to vector<8xf32>
    %99 = vector.shape_cast %98 : vector<8xf32> to vector<8x1xf32>
    %100 = tpu.reciprocal %99 {approx = true} : vector<8x1xf32> -> vector<8x1xf32>
    %101 = vector.broadcast %100 : vector<8x1xf32> to vector<8x16xf32>
    %102 = arith.mulf %97, %101 : vector<8x16xf32>
    %103 = arith.truncf %102 : vector<8x16xf32> to vector<8x16xbf16>
    %cst_38 = arith.constant dense<0.000000e+00> : vector<8x64xf32>
    %104 = tpu.matmul %103, %91, %cst_38 {dimension_numbers = #tpu.dot_dimension_numbers<[1], [0], [0], [1], [0, 0, 1, 1], [], []>} : vector<8x16xbf16>, vector<16x64xbf16>, vector<8x64xf32> -> vector<8x64xf32>
    %105 = arith.truncf %104 : vector<8x64xf32> to vector<8x64xbf16>
    %c0_39 = arith.constant 0 : index
    %c256 = arith.constant 256 : index
    %106 = vector.load %arg12[%c0_39, %c256] : memref<16x512xbf16, #tpu.memory_space<vmem>>, vector<8x64xbf16>
    tpu.vector_store %arg12[%c0_39, %c256], %105 {strides = array<i32>} : memref<16x512xbf16, #tpu.memory_space<vmem>>, vector<8x64xbf16>,
    %107 = vector.extract_strided_slice %14 {offsets = [0, 320], sizes = [8, 64], strides = [1, 1]} : vector<16x512xbf16> to vector<8x64xbf16>
    %108 = vector.extract_strided_slice %15 {offsets = [0, 320], sizes = [16, 64], strides = [1, 1]} : vector<32x512xbf16> to vector<16x64xbf16>
    %109 = vector.extract_strided_slice %16 {offsets = [0, 320], sizes = [16, 64], strides = [1, 1]} : vector<32x512xbf16> to vector<16x64xbf16>
    %cst_40 = arith.constant dense<0.000000e+00> : vector<8x16xf32>
    %110 = tpu.matmul %107, %108, %cst_40 {dimension_numbers = #tpu.dot_dimension_numbers<[1], [1], [0], [0], [0, 0, 1, 0], [], []>} : vector<8x64xbf16>, vector<16x64xbf16>, vector<8x16xf32> -> vector<8x16xf32>
    %cst_41 = arith.constant dense<0xFF800000> : vector<8xf32>
    %111 = vector.multi_reduction <maximumf>, %110, %cst_41 [1] : vector<8x16xf32> to vector<8xf32>
    %112 = vector.shape_cast %111 : vector<8xf32> to vector<8x1xf32>
    %113 = vector.broadcast %112 : vector<8x1xf32> to vector<8x16xf32>
    %114 = arith.subf %110, %113 : vector<8x16xf32>
    %115 = math.exp %114 : vector<8x16xf32>
    %cst_42 = arith.constant dense<0.000000e+00> : vector<8xf32>
    %116 = vector.multi_reduction <add>, %115, %cst_42 [1] : vector<8x16xf32> to vector<8xf32>
    %117 = vector.shape_cast %116 : vector<8xf32> to vector<8x1xf32>
    %118 = tpu.reciprocal %117 {approx = true} : vector<8x1xf32> -> vector<8x1xf32>
    %119 = vector.broadcast %118 : vector<8x1xf32> to vector<8x16xf32>
    %120 = arith.mulf %115, %119 : vector<8x16xf32>
    %121 = arith.truncf %120 : vector<8x16xf32> to vector<8x16xbf16>
    %cst_43 = arith.constant dense<0.000000e+00> : vector<8x64xf32>
    %122 = tpu.matmul %121, %109, %cst_43 {dimension_numbers = #tpu.dot_dimension_numbers<[1], [0], [0], [1], [0, 0, 1, 1], [], []>} : vector<8x16xbf16>, vector<16x64xbf16>, vector<8x64xf32> -> vector<8x64xf32>
    %123 = arith.truncf %122 : vector<8x64xf32> to vector<8x64xbf16>
    %c0_44 = arith.constant 0 : index
    %c320 = arith.constant 320 : index
    %124 = vector.load %arg12[%c0_44, %c320] : memref<16x512xbf16, #tpu.memory_space<vmem>>, vector<8x64xbf16>
    tpu.vector_store %arg12[%c0_44, %c320], %123 {strides = array<i32>} : memref<16x512xbf16, #tpu.memory_space<vmem>>, vector<8x64xbf16>,
    %125 = vector.extract_strided_slice %14 {offsets = [0, 384], sizes = [8, 64], strides = [1, 1]} : vector<16x512xbf16> to vector<8x64xbf16>
    %126 = vector.extract_strided_slice %15 {offsets = [0, 384], sizes = [16, 64], strides = [1, 1]} : vector<32x512xbf16> to vector<16x64xbf16>
    %127 = vector.extract_strided_slice %16 {offsets = [0, 384], sizes = [16, 64], strides = [1, 1]} : vector<32x512xbf16> to vector<16x64xbf16>
    %cst_45 = arith.constant dense<0.000000e+00> : vector<8x16xf32>
    %128 = tpu.matmul %125, %126, %cst_45 {dimension_numbers = #tpu.dot_dimension_numbers<[1], [1], [0], [0], [0, 0, 1, 0], [], []>} : vector<8x64xbf16>, vector<16x64xbf16>, vector<8x16xf32> -> vector<8x16xf32>
    %cst_46 = arith.constant dense<0xFF800000> : vector<8xf32>
    %129 = vector.multi_reduction <maximumf>, %128, %cst_46 [1] : vector<8x16xf32> to vector<8xf32>
    %130 = vector.shape_cast %129 : vector<8xf32> to vector<8x1xf32>
    %131 = vector.broadcast %130 : vector<8x1xf32> to vector<8x16xf32>
    %132 = arith.subf %128, %131 : vector<8x16xf32>
    %133 = math.exp %132 : vector<8x16xf32>
    %cst_47 = arith.constant dense<0.000000e+00> : vector<8xf32>
    %134 = vector.multi_reduction <add>, %133, %cst_47 [1] : vector<8x16xf32> to vector<8xf32>
    %135 = vector.shape_cast %134 : vector<8xf32> to vector<8x1xf32>
    %136 = tpu.reciprocal %135 {approx = true} : vector<8x1xf32> -> vector<8x1xf32>
    %137 = vector.broadcast %136 : vector<8x1xf32> to vector<8x16xf32>
    %138 = arith.mulf %133, %137 : vector<8x16xf32>
    %139 = arith.truncf %138 : vector<8x16xf32> to vector<8x16xbf16>
    %cst_48 = arith.constant dense<0.000000e+00> : vector<8x64xf32>
    %140 = tpu.matmul %139, %127, %cst_48 {dimension_numbers = #tpu.dot_dimension_numbers<[1], [0], [0], [1], [0, 0, 1, 1], [], []>} : vector<8x16xbf16>, vector<16x64xbf16>, vector<8x64xf32> -> vector<8x64xf32>
    %141 = arith.truncf %140 : vector<8x64xf32> to vector<8x64xbf16>
    %c0_49 = arith.constant 0 : index
    %c384 = arith.constant 384 : index
    %142 = vector.load %arg12[%c0_49, %c384] : memref<16x512xbf16, #tpu.memory_space<vmem>>, vector<8x64xbf16>
    tpu.vector_store %arg12[%c0_49, %c384], %141 {strides = array<i32>} : memref<16x512xbf16, #tpu.memory_space<vmem>>, vector<8x64xbf16>,
    %143 = vector.extract_strided_slice %14 {offsets = [0, 448], sizes = [8, 64], strides = [1, 1]} : vector<16x512xbf16> to vector<8x64xbf16>
    %144 = vector.extract_strided_slice %15 {offsets = [0, 448], sizes = [16, 64], strides = [1, 1]} : vector<32x512xbf16> to vector<16x64xbf16>
    %145 = vector.extract_strided_slice %16 {offsets = [0, 448], sizes = [16, 64], strides = [1, 1]} : vector<32x512xbf16> to vector<16x64xbf16>
    %cst_50 = arith.constant dense<0.000000e+00> : vector<8x16xf32>
    %146 = tpu.matmul %143, %144, %cst_50 {dimension_numbers = #tpu.dot_dimension_numbers<[1], [1], [0], [0], [0, 0, 1, 0], [], []>} : vector<8x64xbf16>, vector<16x64xbf16>, vector<8x16xf32> -> vector<8x16xf32>
    %cst_51 = arith.constant dense<0xFF800000> : vector<8xf32>
    %147 = vector.multi_reduction <maximumf>, %146, %cst_51 [1] : vector<8x16xf32> to vector<8xf32>
    %148 = vector.shape_cast %147 : vector<8xf32> to vector<8x1xf32>
    %149 = vector.broadcast %148 : vector<8x1xf32> to vector<8x16xf32>
    %150 = arith.subf %146, %149 : vector<8x16xf32>
    %151 = math.exp %150 : vector<8x16xf32>
    %cst_52 = arith.constant dense<0.000000e+00> : vector<8xf32>
    %152 = vector.multi_reduction <add>, %151, %cst_52 [1] : vector<8x16xf32> to vector<8xf32>
    %153 = vector.shape_cast %152 : vector<8xf32> to vector<8x1xf32>
    %154 = tpu.reciprocal %153 {approx = true} : vector<8x1xf32> -> vector<8x1xf32>
    %155 = vector.broadcast %154 : vector<8x1xf32> to vector<8x16xf32>
    %156 = arith.mulf %151, %155 : vector<8x16xf32>
    %157 = arith.truncf %156 : vector<8x16xf32> to vector<8x16xbf16>
    %cst_53 = arith.constant dense<0.000000e+00> : vector<8x64xf32>
    %158 = tpu.matmul %157, %145, %cst_53 {dimension_numbers = #tpu.dot_dimension_numbers<[1], [0], [0], [1], [0, 0, 1, 1], [], []>} : vector<8x16xbf16>, vector<16x64xbf16>, vector<8x64xf32> -> vector<8x64xf32>
    %159 = arith.truncf %158 : vector<8x64xf32> to vector<8x64xbf16>
    %c0_54 = arith.constant 0 : index
    %c448 = arith.constant 448 : index
    %160 = vector.load %arg12[%c0_54, %c448] : memref<16x512xbf16, #tpu.memory_space<vmem>>, vector<8x64xbf16>
    tpu.vector_store %arg12[%c0_54, %c448], %159 {strides = array<i32>} : memref<16x512xbf16, #tpu.memory_space<vmem>>, vector<8x64xbf16>,
    %161 = vector.extract_strided_slice %14 {offsets = [8, 0], sizes = [8, 64], strides = [1, 1]} : vector<16x512xbf16> to vector<8x64xbf16>
    %162 = vector.extract_strided_slice %15 {offsets = [16, 0], sizes = [16, 64], strides = [1, 1]} : vector<32x512xbf16> to vector<16x64xbf16>
    %163 = vector.extract_strided_slice %16 {offsets = [16, 0], sizes = [16, 64], strides = [1, 1]} : vector<32x512xbf16> to vector<16x64xbf16>
    %cst_55 = arith.constant dense<0.000000e+00> : vector<8x16xf32>
    %164 = tpu.matmul %161, %162, %cst_55 {dimension_numbers = #tpu.dot_dimension_numbers<[1], [1], [0], [0], [0, 0, 1, 0], [], []>} : vector<8x64xbf16>, vector<16x64xbf16>, vector<8x16xf32> -> vector<8x16xf32>
    %cst_56 = arith.constant dense<0xFF800000> : vector<8xf32>
    %165 = vector.multi_reduction <maximumf>, %164, %cst_56 [1] : vector<8x16xf32> to vector<8xf32>
    %166 = vector.shape_cast %165 : vector<8xf32> to vector<8x1xf32>
    %167 = vector.broadcast %166 : vector<8x1xf32> to vector<8x16xf32>
    %168 = arith.subf %164, %167 : vector<8x16xf32>
    %169 = math.exp %168 : vector<8x16xf32>
    %cst_57 = arith.constant dense<0.000000e+00> : vector<8xf32>
    %170 = vector.multi_reduction <add>, %169, %cst_57 [1] : vector<8x16xf32> to vector<8xf32>
    %171 = vector.shape_cast %170 : vector<8xf32> to vector<8x1xf32>
    %172 = tpu.reciprocal %171 {approx = true} : vector<8x1xf32> -> vector<8x1xf32>
    %173 = vector.broadcast %172 : vector<8x1xf32> to vector<8x16xf32>
    %174 = arith.mulf %169, %173 : vector<8x16xf32>
    %175 = arith.truncf %174 : vector<8x16xf32> to vector<8x16xbf16>
    %cst_58 = arith.constant dense<0.000000e+00> : vector<8x64xf32>
    %176 = tpu.matmul %175, %163, %cst_58 {dimension_numbers = #tpu.dot_dimension_numbers<[1], [0], [0], [1], [0, 0, 1, 1], [], []>} : vector<8x16xbf16>, vector<16x64xbf16>, vector<8x64xf32> -> vector<8x64xf32>
    %177 = arith.truncf %176 : vector<8x64xf32> to vector<8x64xbf16>
    %c8 = arith.constant 8 : index
    %c0_59 = arith.constant 0 : index
    %178 = vector.load %arg12[%c8, %c0_59] : memref<16x512xbf16, #tpu.memory_space<vmem>>, vector<8x64xbf16>
    tpu.vector_store %arg12[%c8, %c0_59], %177 {strides = array<i32>} : memref<16x512xbf16, #tpu.memory_space<vmem>>, vector<8x64xbf16>,
    %179 = vector.extract_strided_slice %14 {offsets = [8, 64], sizes = [8, 64], strides = [1, 1]} : vector<16x512xbf16> to vector<8x64xbf16>
    %180 = vector.extract_strided_slice %15 {offsets = [16, 64], sizes = [16, 64], strides = [1, 1]} : vector<32x512xbf16> to vector<16x64xbf16>
    %181 = vector.extract_strided_slice %16 {offsets = [16, 64], sizes = [16, 64], strides = [1, 1]} : vector<32x512xbf16> to vector<16x64xbf16>
    %cst_60 = arith.constant dense<0.000000e+00> : vector<8x16xf32>
    %182 = tpu.matmul %179, %180, %cst_60 {dimension_numbers = #tpu.dot_dimension_numbers<[1], [1], [0], [0], [0, 0, 1, 0], [], []>} : vector<8x64xbf16>, vector<16x64xbf16>, vector<8x16xf32> -> vector<8x16xf32>
    %cst_61 = arith.constant dense<0xFF800000> : vector<8xf32>
    %183 = vector.multi_reduction <maximumf>, %182, %cst_61 [1] : vector<8x16xf32> to vector<8xf32>
    %184 = vector.shape_cast %183 : vector<8xf32> to vector<8x1xf32>
    %185 = vector.broadcast %184 : vector<8x1xf32> to vector<8x16xf32>
    %186 = arith.subf %182, %185 : vector<8x16xf32>
    %187 = math.exp %186 : vector<8x16xf32>
    %cst_62 = arith.constant dense<0.000000e+00> : vector<8xf32>
    %188 = vector.multi_reduction <add>, %187, %cst_62 [1] : vector<8x16xf32> to vector<8xf32>
    %189 = vector.shape_cast %188 : vector<8xf32> to vector<8x1xf32>
    %190 = tpu.reciprocal %189 {approx = true} : vector<8x1xf32> -> vector<8x1xf32>
    %191 = vector.broadcast %190 : vector<8x1xf32> to vector<8x16xf32>
    %192 = arith.mulf %187, %191 : vector<8x16xf32>
    %193 = arith.truncf %192 : vector<8x16xf32> to vector<8x16xbf16>
    %cst_63 = arith.constant dense<0.000000e+00> : vector<8x64xf32>
    %194 = tpu.matmul %193, %181, %cst_63 {dimension_numbers = #tpu.dot_dimension_numbers<[1], [0], [0], [1], [0, 0, 1, 1], [], []>} : vector<8x16xbf16>, vector<16x64xbf16>, vector<8x64xf32> -> vector<8x64xf32>
    %195 = arith.truncf %194 : vector<8x64xf32> to vector<8x64xbf16>
    %c8_64 = arith.constant 8 : index
    %c64_65 = arith.constant 64 : index
    %196 = vector.load %arg12[%c8_64, %c64_65] : memref<16x512xbf16, #tpu.memory_space<vmem>>, vector<8x64xbf16>
    tpu.vector_store %arg12[%c8_64, %c64_65], %195 {strides = array<i32>} : memref<16x512xbf16, #tpu.memory_space<vmem>>, vector<8x64xbf16>,
    %197 = vector.extract_strided_slice %14 {offsets = [8, 128], sizes = [8, 64], strides = [1, 1]} : vector<16x512xbf16> to vector<8x64xbf16>
    %198 = vector.extract_strided_slice %15 {offsets = [16, 128], sizes = [16, 64], strides = [1, 1]} : vector<32x512xbf16> to vector<16x64xbf16>
    %199 = vector.extract_strided_slice %16 {offsets = [16, 128], sizes = [16, 64], strides = [1, 1]} : vector<32x512xbf16> to vector<16x64xbf16>
    %cst_66 = arith.constant dense<0.000000e+00> : vector<8x16xf32>
    %200 = tpu.matmul %197, %198, %cst_66 {dimension_numbers = #tpu.dot_dimension_numbers<[1], [1], [0], [0], [0, 0, 1, 0], [], []>} : vector<8x64xbf16>, vector<16x64xbf16>, vector<8x16xf32> -> vector<8x16xf32>
    %cst_67 = arith.constant dense<0xFF800000> : vector<8xf32>
    %201 = vector.multi_reduction <maximumf>, %200, %cst_67 [1] : vector<8x16xf32> to vector<8xf32>
    %202 = vector.shape_cast %201 : vector<8xf32> to vector<8x1xf32>
    %203 = vector.broadcast %202 : vector<8x1xf32> to vector<8x16xf32>
    %204 = arith.subf %200, %203 : vector<8x16xf32>
    %205 = math.exp %204 : vector<8x16xf32>
    %cst_68 = arith.constant dense<0.000000e+00> : vector<8xf32>
    %206 = vector.multi_reduction <add>, %205, %cst_68 [1] : vector<8x16xf32> to vector<8xf32>
    %207 = vector.shape_cast %206 : vector<8xf32> to vector<8x1xf32>
    %208 = tpu.reciprocal %207 {approx = true} : vector<8x1xf32> -> vector<8x1xf32>
    %209 = vector.broadcast %208 : vector<8x1xf32> to vector<8x16xf32>
    %210 = arith.mulf %205, %209 : vector<8x16xf32>
    %211 = arith.truncf %210 : vector<8x16xf32> to vector<8x16xbf16>
    %cst_69 = arith.constant dense<0.000000e+00> : vector<8x64xf32>
    %212 = tpu.matmul %211, %199, %cst_69 {dimension_numbers = #tpu.dot_dimension_numbers<[1], [0], [0], [1], [0, 0, 1, 1], [], []>} : vector<8x16xbf16>, vector<16x64xbf16>, vector<8x64xf32> -> vector<8x64xf32>
    %213 = arith.truncf %212 : vector<8x64xf32> to vector<8x64xbf16>
    %c8_70 = arith.constant 8 : index
    %c128_71 = arith.constant 128 : index
    %214 = vector.load %arg12[%c8_70, %c128_71] : memref<16x512xbf16, #tpu.memory_space<vmem>>, vector<8x64xbf16>
    tpu.vector_store %arg12[%c8_70, %c128_71], %213 {strides = array<i32>} : memref<16x512xbf16, #tpu.memory_space<vmem>>, vector<8x64xbf16>,
    %215 = vector.extract_strided_slice %14 {offsets = [8, 192], sizes = [8, 64], strides = [1, 1]} : vector<16x512xbf16> to vector<8x64xbf16>
    %216 = vector.extract_strided_slice %15 {offsets = [16, 192], sizes = [16, 64], strides = [1, 1]} : vector<32x512xbf16> to vector<16x64xbf16>
    %217 = vector.extract_strided_slice %16 {offsets = [16, 192], sizes = [16, 64], strides = [1, 1]} : vector<32x512xbf16> to vector<16x64xbf16>
    %cst_72 = arith.constant dense<0.000000e+00> : vector<8x16xf32>
    %218 = tpu.matmul %215, %216, %cst_72 {dimension_numbers = #tpu.dot_dimension_numbers<[1], [1], [0], [0], [0, 0, 1, 0], [], []>} : vector<8x64xbf16>, vector<16x64xbf16>, vector<8x16xf32> -> vector<8x16xf32>
    %cst_73 = arith.constant dense<0xFF800000> : vector<8xf32>
    %219 = vector.multi_reduction <maximumf>, %218, %cst_73 [1] : vector<8x16xf32> to vector<8xf32>
    %220 = vector.shape_cast %219 : vector<8xf32> to vector<8x1xf32>
    %221 = vector.broadcast %220 : vector<8x1xf32> to vector<8x16xf32>
    %222 = arith.subf %218, %221 : vector<8x16xf32>
    %223 = math.exp %222 : vector<8x16xf32>
    %cst_74 = arith.constant dense<0.000000e+00> : vector<8xf32>
    %224 = vector.multi_reduction <add>, %223, %cst_74 [1] : vector<8x16xf32> to vector<8xf32>
    %225 = vector.shape_cast %224 : vector<8xf32> to vector<8x1xf32>
    %226 = tpu.reciprocal %225 {approx = true} : vector<8x1xf32> -> vector<8x1xf32>
    %227 = vector.broadcast %226 : vector<8x1xf32> to vector<8x16xf32>
    %228 = arith.mulf %223, %227 : vector<8x16xf32>
    %229 = arith.truncf %228 : vector<8x16xf32> to vector<8x16xbf16>
    %cst_75 = arith.constant dense<0.000000e+00> : vector<8x64xf32>
    %230 = tpu.matmul %229, %217, %cst_75 {dimension_numbers = #tpu.dot_dimension_numbers<[1], [0], [0], [1], [0, 0, 1, 1], [], []>} : vector<8x16xbf16>, vector<16x64xbf16>, vector<8x64xf32> -> vector<8x64xf32>
    %231 = arith.truncf %230 : vector<8x64xf32> to vector<8x64xbf16>
    %c8_76 = arith.constant 8 : index
    %c192_77 = arith.constant 192 : index
    %232 = vector.load %arg12[%c8_76, %c192_77] : memref<16x512xbf16, #tpu.memory_space<vmem>>, vector<8x64xbf16>
    tpu.vector_store %arg12[%c8_76, %c192_77], %231 {strides = array<i32>} : memref<16x512xbf16, #tpu.memory_space<vmem>>, vector<8x64xbf16>,
    %233 = vector.extract_strided_slice %14 {offsets = [8, 256], sizes = [8, 64], strides = [1, 1]} : vector<16x512xbf16> to vector<8x64xbf16>
    %234 = vector.extract_strided_slice %15 {offsets = [16, 256], sizes = [16, 64], strides = [1, 1]} : vector<32x512xbf16> to vector<16x64xbf16>
    %235 = vector.extract_strided_slice %16 {offsets = [16, 256], sizes = [16, 64], strides = [1, 1]} : vector<32x512xbf16> to vector<16x64xbf16>
    %cst_78 = arith.constant dense<0.000000e+00> : vector<8x16xf32>
    %236 = tpu.matmul %233, %234, %cst_78 {dimension_numbers = #tpu.dot_dimension_numbers<[1], [1], [0], [0], [0, 0, 1, 0], [], []>} : vector<8x64xbf16>, vector<16x64xbf16>, vector<8x16xf32> -> vector<8x16xf32>
    %cst_79 = arith.constant dense<0xFF800000> : vector<8xf32>
    %237 = vector.multi_reduction <maximumf>, %236, %cst_79 [1] : vector<8x16xf32> to vector<8xf32>
    %238 = vector.shape_cast %237 : vector<8xf32> to vector<8x1xf32>
    %239 = vector.broadcast %238 : vector<8x1xf32> to vector<8x16xf32>
    %240 = arith.subf %236, %239 : vector<8x16xf32>
    %241 = math.exp %240 : vector<8x16xf32>
    %cst_80 = arith.constant dense<0.000000e+00> : vector<8xf32>
    %242 = vector.multi_reduction <add>, %241, %cst_80 [1] : vector<8x16xf32> to vector<8xf32>
    %243 = vector.shape_cast %242 : vector<8xf32> to vector<8x1xf32>
    %244 = tpu.reciprocal %243 {approx = true} : vector<8x1xf32> -> vector<8x1xf32>
    %245 = vector.broadcast %244 : vector<8x1xf32> to vector<8x16xf32>
    %246 = arith.mulf %241, %245 : vector<8x16xf32>
    %247 = arith.truncf %246 : vector<8x16xf32> to vector<8x16xbf16>
    %cst_81 = arith.constant dense<0.000000e+00> : vector<8x64xf32>
    %248 = tpu.matmul %247, %235, %cst_81 {dimension_numbers = #tpu.dot_dimension_numbers<[1], [0], [0], [1], [0, 0, 1, 1], [], []>} : vector<8x16xbf16>, vector<16x64xbf16>, vector<8x64xf32> -> vector<8x64xf32>
    %249 = arith.truncf %248 : vector<8x64xf32> to vector<8x64xbf16>
    %c8_82 = arith.constant 8 : index
    %c256_83 = arith.constant 256 : index
    %250 = vector.load %arg12[%c8_82, %c256_83] : memref<16x512xbf16, #tpu.memory_space<vmem>>, vector<8x64xbf16>
    tpu.vector_store %arg12[%c8_82, %c256_83], %249 {strides = array<i32>} : memref<16x512xbf16, #tpu.memory_space<vmem>>, vector<8x64xbf16>,
    %251 = vector.extract_strided_slice %14 {offsets = [8, 320], sizes = [8, 64], strides = [1, 1]} : vector<16x512xbf16> to vector<8x64xbf16>
    %252 = vector.extract_strided_slice %15 {offsets = [16, 320], sizes = [16, 64], strides = [1, 1]} : vector<32x512xbf16> to vector<16x64xbf16>
    %253 = vector.extract_strided_slice %16 {offsets = [16, 320], sizes = [16, 64], strides = [1, 1]} : vector<32x512xbf16> to vector<16x64xbf16>
    %cst_84 = arith.constant dense<0.000000e+00> : vector<8x16xf32>
    %254 = tpu.matmul %251, %252, %cst_84 {dimension_numbers = #tpu.dot_dimension_numbers<[1], [1], [0], [0], [0, 0, 1, 0], [], []>} : vector<8x64xbf16>, vector<16x64xbf16>, vector<8x16xf32> -> vector<8x16xf32>
    %cst_85 = arith.constant dense<0xFF800000> : vector<8xf32>
    %255 = vector.multi_reduction <maximumf>, %254, %cst_85 [1] : vector<8x16xf32> to vector<8xf32>
    %256 = vector.shape_cast %255 : vector<8xf32> to vector<8x1xf32>
    %257 = vector.broadcast %256 : vector<8x1xf32> to vector<8x16xf32>
    %258 = arith.subf %254, %257 : vector<8x16xf32>
    %259 = math.exp %258 : vector<8x16xf32>
    %cst_86 = arith.constant dense<0.000000e+00> : vector<8xf32>
    %260 = vector.multi_reduction <add>, %259, %cst_86 [1] : vector<8x16xf32> to vector<8xf32>
    %261 = vector.shape_cast %260 : vector<8xf32> to vector<8x1xf32>
    %262 = tpu.reciprocal %261 {approx = true} : vector<8x1xf32> -> vector<8x1xf32>
    %263 = vector.broadcast %262 : vector<8x1xf32> to vector<8x16xf32>
    %264 = arith.mulf %259, %263 : vector<8x16xf32>
    %265 = arith.truncf %264 : vector<8x16xf32> to vector<8x16xbf16>
    %cst_87 = arith.constant dense<0.000000e+00> : vector<8x64xf32>
    %266 = tpu.matmul %265, %253, %cst_87 {dimension_numbers = #tpu.dot_dimension_numbers<[1], [0], [0], [1], [0, 0, 1, 1], [], []>} : vector<8x16xbf16>, vector<16x64xbf16>, vector<8x64xf32> -> vector<8x64xf32>
    %267 = arith.truncf %266 : vector<8x64xf32> to vector<8x64xbf16>
    %c8_88 = arith.constant 8 : index
    %c320_89 = arith.constant 320 : index
    %268 = vector.load %arg12[%c8_88, %c320_89] : memref<16x512xbf16, #tpu.memory_space<vmem>>, vector<8x64xbf16>
    tpu.vector_store %arg12[%c8_88, %c320_89], %267 {strides = array<i32>} : memref<16x512xbf16, #tpu.memory_space<vmem>>, vector<8x64xbf16>,
    %269 = vector.extract_strided_slice %14 {offsets = [8, 384], sizes = [8, 64], strides = [1, 1]} : vector<16x512xbf16> to vector<8x64xbf16>
    %270 = vector.extract_strided_slice %15 {offsets = [16, 384], sizes = [16, 64], strides = [1, 1]} : vector<32x512xbf16> to vector<16x64xbf16>
    %271 = vector.extract_strided_slice %16 {offsets = [16, 384], sizes = [16, 64], strides = [1, 1]} : vector<32x512xbf16> to vector<16x64xbf16>
    %cst_90 = arith.constant dense<0.000000e+00> : vector<8x16xf32>
    %272 = tpu.matmul %269, %270, %cst_90 {dimension_numbers = #tpu.dot_dimension_numbers<[1], [1], [0], [0], [0, 0, 1, 0], [], []>} : vector<8x64xbf16>, vector<16x64xbf16>, vector<8x16xf32> -> vector<8x16xf32>
    %cst_91 = arith.constant dense<0xFF800000> : vector<8xf32>
    %273 = vector.multi_reduction <maximumf>, %272, %cst_91 [1] : vector<8x16xf32> to vector<8xf32>
    %274 = vector.shape_cast %273 : vector<8xf32> to vector<8x1xf32>
    %275 = vector.broadcast %274 : vector<8x1xf32> to vector<8x16xf32>
    %276 = arith.subf %272, %275 : vector<8x16xf32>
    %277 = math.exp %276 : vector<8x16xf32>
    %cst_92 = arith.constant dense<0.000000e+00> : vector<8xf32>
    %278 = vector.multi_reduction <add>, %277, %cst_92 [1] : vector<8x16xf32> to vector<8xf32>
    %279 = vector.shape_cast %278 : vector<8xf32> to vector<8x1xf32>
    %280 = tpu.reciprocal %279 {approx = true} : vector<8x1xf32> -> vector<8x1xf32>
    %281 = vector.broadcast %280 : vector<8x1xf32> to vector<8x16xf32>
    %282 = arith.mulf %277, %281 : vector<8x16xf32>
    %283 = arith.truncf %282 : vector<8x16xf32> to vector<8x16xbf16>
    %cst_93 = arith.constant dense<0.000000e+00> : vector<8x64xf32>
    %284 = tpu.matmul %283, %271, %cst_93 {dimension_numbers = #tpu.dot_dimension_numbers<[1], [0], [0], [1], [0, 0, 1, 1], [], []>} : vector<8x16xbf16>, vector<16x64xbf16>, vector<8x64xf32> -> vector<8x64xf32>
    %285 = arith.truncf %284 : vector<8x64xf32> to vector<8x64xbf16>
    %c8_94 = arith.constant 8 : index
    %c384_95 = arith.constant 384 : index
    %286 = vector.load %arg12[%c8_94, %c384_95] : memref<16x512xbf16, #tpu.memory_space<vmem>>, vector<8x64xbf16>
    tpu.vector_store %arg12[%c8_94, %c384_95], %285 {strides = array<i32>} : memref<16x512xbf16, #tpu.memory_space<vmem>>, vector<8x64xbf16>,
    %287 = vector.extract_strided_slice %14 {offsets = [8, 448], sizes = [8, 64], strides = [1, 1]} : vector<16x512xbf16> to vector<8x64xbf16>
    %288 = vector.extract_strided_slice %15 {offsets = [16, 448], sizes = [16, 64], strides = [1, 1]} : vector<32x512xbf16> to vector<16x64xbf16>
    %289 = vector.extract_strided_slice %16 {offsets = [16, 448], sizes = [16, 64], strides = [1, 1]} : vector<32x512xbf16> to vector<16x64xbf16>
    %cst_96 = arith.constant dense<0.000000e+00> : vector<8x16xf32>
    %290 = tpu.matmul %287, %288, %cst_96 {dimension_numbers = #tpu.dot_dimension_numbers<[1], [1], [0], [0], [0, 0, 1, 0], [], []>} : vector<8x64xbf16>, vector<16x64xbf16>, vector<8x16xf32> -> vector<8x16xf32>
    %cst_97 = arith.constant dense<0xFF800000> : vector<8xf32>
    %291 = vector.multi_reduction <maximumf>, %290, %cst_97 [1] : vector<8x16xf32> to vector<8xf32>
    %292 = vector.shape_cast %291 : vector<8xf32> to vector<8x1xf32>
    %293 = vector.broadcast %292 : vector<8x1xf32> to vector<8x16xf32>
    %294 = arith.subf %290, %293 : vector<8x16xf32>
    %295 = math.exp %294 : vector<8x16xf32>
    %cst_98 = arith.constant dense<0.000000e+00> : vector<8xf32>
    %296 = vector.multi_reduction <add>, %295, %cst_98 [1] : vector<8x16xf32> to vector<8xf32>
    %297 = vector.shape_cast %296 : vector<8xf32> to vector<8x1xf32>
    %298 = tpu.reciprocal %297 {approx = true} : vector<8x1xf32> -> vector<8x1xf32>
    %299 = vector.broadcast %298 : vector<8x1xf32> to vector<8x16xf32>
    %300 = arith.mulf %295, %299 : vector<8x16xf32>
    %301 = arith.truncf %300 : vector<8x16xf32> to vector<8x16xbf16>
    %cst_99 = arith.constant dense<0.000000e+00> : vector<8x64xf32>
    %302 = tpu.matmul %301, %289, %cst_99 {dimension_numbers = #tpu.dot_dimension_numbers<[1], [0], [0], [1], [0, 0, 1, 1], [], []>} : vector<8x16xbf16>, vector<16x64xbf16>, vector<8x64xf32> -> vector<8x64xf32>
    %303 = arith.truncf %302 : vector<8x64xf32> to vector<8x64xbf16>
    %c8_100 = arith.constant 8 : index
    %c448_101 = arith.constant 448 : index
    %304 = vector.load %arg12[%c8_100, %c448_101] : memref<16x512xbf16, #tpu.memory_space<vmem>>, vector<8x64xbf16>
    tpu.vector_store %arg12[%c8_100, %c448_101], %303 {strides = array<i32>} : memref<16x512xbf16, #tpu.memory_space<vmem>>, vector<8x64xbf16>,
    %c0_102 = arith.constant 0 : index
    %c0_103 = arith.constant 0 : index
    %305 = vector.load %arg9[%c0_102, %c0_103] : memref<8x256xf32, #tpu.memory_space<vmem>>, vector<8x256xf32>
    %c0_104 = arith.constant 0 : index
    %c0_105 = arith.constant 0 : index
    %306 = vector.load %arg12[%c0_104, %c0_105] : memref<16x512xbf16, #tpu.memory_space<vmem>>, vector<16x512xbf16>
    %c0_106 = arith.constant 0 : index
    %c0_107 = arith.constant 0 : index
    %307 = vector.load %arg6[%c0_106, %c0_107] : memref<512x256xbf16, #tpu.memory_space<vmem>>, vector<512x256xbf16>
    %cst_108 = arith.constant dense<0.000000e+00> : vector<16x256xf32>
    %308 = tpu.matmul %306, %307, %cst_108 {dimension_numbers = #tpu.dot_dimension_numbers<[1], [0], [0], [1], [0, 0, 1, 1], [], []>} : vector<16x512xbf16>, vector<512x256xbf16>, vector<16x256xf32> -> vector<16x256xf32>
    %309 = vector.extract_strided_slice %305 {offsets = [0, 0], sizes = [1, 256], strides = [1, 1]} : vector<8x256xf32> to vector<1x256xf32>
    %310 = vector.shape_cast %309 : vector<1x256xf32> to vector<256xf32>
    %311 = vector.shape_cast %310 : vector<256xf32> to vector<1x256xf32>
    %312 = vector.broadcast %311 : vector<1x256xf32> to vector<16x256xf32>
    %313 = arith.addf %308, %312 : vector<16x256xf32>
    %314 = arith.addf %313, %1 : vector<16x256xf32>
    %315 = vector.extract_strided_slice %305 {offsets = [1, 0], sizes = [1, 256], strides = [1, 1]} : vector<8x256xf32> to vector<1x256xf32>
    %316 = vector.shape_cast %315 : vector<1x256xf32> to vector<256xf32>
    %317 = vector.extract_strided_slice %305 {offsets = [2, 0], sizes = [1, 256], strides = [1, 1]} : vector<8x256xf32> to vector<1x256xf32>
    %318 = vector.shape_cast %317 : vector<1x256xf32> to vector<256xf32>
    %cst_109 = arith.constant dense<0.000000e+00> : vector<16xf32>
    %319 = vector.multi_reduction <add>, %314, %cst_109 [1] : vector<16x256xf32> to vector<16xf32>
    %320 = vector.shape_cast %319 : vector<16xf32> to vector<16x1xf32>
    %cst_110 = arith.constant 2.560000e+02 : f32
    %321 = vector.broadcast %cst_110 : f32 to vector<16x1xf32>
    %322 = arith.divf %320, %321 : vector<16x1xf32>
    %323 = vector.broadcast %322 : vector<16x1xf32> to vector<16x256xf32>
    %324 = arith.subf %314, %323 : vector<16x256xf32>
    %325 = arith.mulf %324, %324 : vector<16x256xf32>
    %cst_111 = arith.constant dense<0.000000e+00> : vector<16xf32>
    %326 = vector.multi_reduction <add>, %325, %cst_111 [1] : vector<16x256xf32> to vector<16xf32>
    %327 = vector.shape_cast %326 : vector<16xf32> to vector<16x1xf32>
    %cst_112 = arith.constant 2.560000e+02 : f32
    %328 = vector.broadcast %cst_112 : f32 to vector<16x1xf32>
    %329 = arith.divf %327, %328 : vector<16x1xf32>
    %cst_113 = arith.constant 9.99999974E-6 : f32
    %330 = vector.broadcast %cst_113 : f32 to vector<16x1xf32>
    %331 = arith.addf %329, %330 : vector<16x1xf32>
    %332 = math.rsqrt %331 : vector<16x1xf32>
    %333 = vector.broadcast %332 : vector<16x1xf32> to vector<16x256xf32>
    %334 = arith.mulf %324, %333 : vector<16x256xf32>
    %335 = vector.shape_cast %316 : vector<256xf32> to vector<1x256xf32>
    %336 = vector.broadcast %335 : vector<1x256xf32> to vector<16x256xf32>
    %337 = arith.mulf %334, %336 : vector<16x256xf32>
    %338 = vector.shape_cast %318 : vector<256xf32> to vector<1x256xf32>
    %339 = vector.broadcast %338 : vector<1x256xf32> to vector<16x256xf32>
    %340 = arith.addf %337, %339 : vector<16x256xf32>
    %341 = vector.extract_strided_slice %305 {offsets = [3, 0], sizes = [1, 256], strides = [1, 1]} : vector<8x256xf32> to vector<1x256xf32>
    %342 = vector.shape_cast %341 : vector<1x256xf32> to vector<256xf32>
    %343 = vector.extract_strided_slice %305 {offsets = [4, 0], sizes = [1, 256], strides = [1, 1]} : vector<8x256xf32> to vector<1x256xf32>
    %344 = vector.shape_cast %343 : vector<1x256xf32> to vector<256xf32>
    %cst_114 = arith.constant dense<0.000000e+00> : vector<16xf32>
    %345 = vector.multi_reduction <add>, %340, %cst_114 [1] : vector<16x256xf32> to vector<16xf32>
    %346 = vector.shape_cast %345 : vector<16xf32> to vector<16x1xf32>
    %cst_115 = arith.constant 2.560000e+02 : f32
    %347 = vector.broadcast %cst_115 : f32 to vector<16x1xf32>
    %348 = arith.divf %346, %347 : vector<16x1xf32>
    %349 = vector.broadcast %348 : vector<16x1xf32> to vector<16x256xf32>
    %350 = arith.subf %340, %349 : vector<16x256xf32>
    %351 = arith.mulf %350, %350 : vector<16x256xf32>
    %cst_116 = arith.constant dense<0.000000e+00> : vector<16xf32>
    %352 = vector.multi_reduction <add>, %351, %cst_116 [1] : vector<16x256xf32> to vector<16xf32>
    %353 = vector.shape_cast %352 : vector<16xf32> to vector<16x1xf32>
    %cst_117 = arith.constant 2.560000e+02 : f32
    %354 = vector.broadcast %cst_117 : f32 to vector<16x1xf32>
    %355 = arith.divf %353, %354 : vector<16x1xf32>
    %cst_118 = arith.constant 9.99999974E-6 : f32
    %356 = vector.broadcast %cst_118 : f32 to vector<16x1xf32>
    %357 = arith.addf %355, %356 : vector<16x1xf32>
    %358 = math.rsqrt %357 : vector<16x1xf32>
    %359 = vector.broadcast %358 : vector<16x1xf32> to vector<16x256xf32>
    %360 = arith.mulf %350, %359 : vector<16x256xf32>
    %361 = vector.shape_cast %342 : vector<256xf32> to vector<1x256xf32>
    %362 = vector.broadcast %361 : vector<1x256xf32> to vector<16x256xf32>
    %363 = arith.mulf %360, %362 : vector<16x256xf32>
    %364 = vector.shape_cast %344 : vector<256xf32> to vector<1x256xf32>
    %365 = vector.broadcast %364 : vector<1x256xf32> to vector<16x256xf32>
    %366 = arith.addf %363, %365 : vector<16x256xf32>
    %367 = arith.truncf %366 : vector<16x256xf32> to vector<16x256xbf16>
    %c0_119 = arith.constant 0 : index
    %c0_120 = arith.constant 0 : index
    %368 = vector.load %arg7[%c0_119, %c0_120] : memref<256x512xbf16, #tpu.memory_space<vmem>>, vector<256x512xbf16>
    %cst_121 = arith.constant dense<0.000000e+00> : vector<16x512xf32>
    %369 = tpu.matmul %367, %368, %cst_121 {dimension_numbers = #tpu.dot_dimension_numbers<[1], [0], [0], [1], [0, 0, 1, 1], [], []>} : vector<16x256xbf16>, vector<256x512xbf16>, vector<16x512xf32> -> vector<16x512xf32>
    %c0_122 = arith.constant 0 : index
    %c0_123 = arith.constant 0 : index
    %370 = vector.load %arg10[%c0_122, %c0_123] : memref<1x512xf32, #tpu.memory_space<vmem>>, vector<1x512xf32>
    %371 = vector.shape_cast %370 : vector<1x512xf32> to vector<512xf32>
    %372 = vector.shape_cast %371 : vector<512xf32> to vector<1x512xf32>
    %373 = vector.broadcast %372 : vector<1x512xf32> to vector<16x512xf32>
    %374 = arith.addf %369, %373 : vector<16x512xf32>
    %cst_124 = arith.constant 5.000000e-01 : f32
    %375 = vector.broadcast %cst_124 : f32 to vector<16x512xf32>
    %376 = arith.mulf %375, %374 : vector<16x512xf32>
    %cst_125 = arith.constant 4.471500e-02 : f32
    %377 = vector.broadcast %cst_125 : f32 to vector<16x512xf32>
    %378 = arith.mulf %377, %374 : vector<16x512xf32>
    %379 = arith.mulf %378, %374 : vector<16x512xf32>
    %380 = arith.mulf %379, %374 : vector<16x512xf32>
    %381 = arith.addf %374, %380 : vector<16x512xf32>
    %cst_126 = arith.constant 0.797884583 : f32
    %382 = vector.broadcast %cst_126 : f32 to vector<16x512xf32>
    %383 = arith.mulf %382, %381 : vector<16x512xf32>
    %384 = math.tanh %383 : vector<16x512xf32>
    %cst_127 = arith.constant 1.000000e+00 : f32
    %385 = vector.broadcast %cst_127 : f32 to vector<16x512xf32>
    %386 = arith.addf %385, %384 : vector<16x512xf32>
    %387 = arith.mulf %376, %386 : vector<16x512xf32>
    %388 = arith.truncf %387 : vector<16x512xf32> to vector<16x512xbf16>
    %c0_128 = arith.constant 0 : index
    %c0_129 = arith.constant 0 : index
    %389 = vector.load %arg8[%c0_128, %c0_129] : memref<512x256xbf16, #tpu.memory_space<vmem>>, vector<512x256xbf16>
    %cst_130 = arith.constant dense<0.000000e+00> : vector<16x256xf32>
    %390 = tpu.matmul %388, %389, %cst_130 {dimension_numbers = #tpu.dot_dimension_numbers<[1], [0], [0], [1], [0, 0, 1, 1], [], []>} : vector<16x512xbf16>, vector<512x256xbf16>, vector<16x256xf32> -> vector<16x256xf32>
    %391 = vector.extract_strided_slice %305 {offsets = [5, 0], sizes = [1, 256], strides = [1, 1]} : vector<8x256xf32> to vector<1x256xf32>
    %392 = vector.shape_cast %391 : vector<1x256xf32> to vector<256xf32>
    %393 = vector.shape_cast %392 : vector<256xf32> to vector<1x256xf32>
    %394 = vector.broadcast %393 : vector<1x256xf32> to vector<16x256xf32>
    %395 = arith.addf %390, %394 : vector<16x256xf32>
    %396 = arith.addf %395, %340 : vector<16x256xf32>
    %397 = vector.extract_strided_slice %305 {offsets = [6, 0], sizes = [1, 256], strides = [1, 1]} : vector<8x256xf32> to vector<1x256xf32>
    %398 = vector.shape_cast %397 : vector<1x256xf32> to vector<256xf32>
    %399 = vector.extract_strided_slice %305 {offsets = [7, 0], sizes = [1, 256], strides = [1, 1]} : vector<8x256xf32> to vector<1x256xf32>
    %400 = vector.shape_cast %399 : vector<1x256xf32> to vector<256xf32>
    %cst_131 = arith.constant dense<0.000000e+00> : vector<16xf32>
    %401 = vector.multi_reduction <add>, %396, %cst_131 [1] : vector<16x256xf32> to vector<16xf32>
    %402 = vector.shape_cast %401 : vector<16xf32> to vector<16x1xf32>
    %cst_132 = arith.constant 2.560000e+02 : f32
    %403 = vector.broadcast %cst_132 : f32 to vector<16x1xf32>
    %404 = arith.divf %402, %403 : vector<16x1xf32>
    %405 = vector.broadcast %404 : vector<16x1xf32> to vector<16x256xf32>
    %406 = arith.subf %396, %405 : vector<16x256xf32>
    %407 = arith.mulf %406, %406 : vector<16x256xf32>
    %cst_133 = arith.constant dense<0.000000e+00> : vector<16xf32>
    %408 = vector.multi_reduction <add>, %407, %cst_133 [1] : vector<16x256xf32> to vector<16xf32>
    %409 = vector.shape_cast %408 : vector<16xf32> to vector<16x1xf32>
    %cst_134 = arith.constant 2.560000e+02 : f32
    %410 = vector.broadcast %cst_134 : f32 to vector<16x1xf32>
    %411 = arith.divf %409, %410 : vector<16x1xf32>
    %cst_135 = arith.constant 9.99999974E-6 : f32
    %412 = vector.broadcast %cst_135 : f32 to vector<16x1xf32>
    %413 = arith.addf %411, %412 : vector<16x1xf32>
    %414 = math.rsqrt %413 : vector<16x1xf32>
    %415 = vector.broadcast %414 : vector<16x1xf32> to vector<16x256xf32>
    %416 = arith.mulf %406, %415 : vector<16x256xf32>
    %417 = vector.shape_cast %398 : vector<256xf32> to vector<1x256xf32>
    %418 = vector.broadcast %417 : vector<1x256xf32> to vector<16x256xf32>
    %419 = arith.mulf %416, %418 : vector<16x256xf32>
    %420 = vector.shape_cast %400 : vector<256xf32> to vector<1x256xf32>
    %421 = vector.broadcast %420 : vector<1x256xf32> to vector<16x256xf32>
    %422 = arith.addf %419, %421 : vector<16x256xf32>
    %423 = vector.shape_cast %422 : vector<16x256xf32> to vector<2x8x256xf32>
    %c0_136 = arith.constant 0 : index
    %c0_137 = arith.constant 0 : index
    %c0_138 = arith.constant 0 : index
    %424 = vector.load %arg11[%c0_136, %c0_137, %c0_138] : memref<2x8x256xf32, #tpu.memory_space<vmem>>, vector<2x8x256xf32>
    tpu.vector_store %arg11[%c0_136, %c0_137, %c0_138], %423 {strides = array<i32>} : memref<2x8x256xf32, #tpu.memory_space<vmem>>, vector<2x8x256xf32>,
    return
  }
  func.func @transform_0(%arg0: i32) -> (i32, i32, i32) {
    %c0_i32 = arith.constant 0 : i32
    %c0_i32_0 = arith.constant 0 : i32
    %c0_i32_1 = arith.constant 0 : i32
    return %arg0, %c0_i32, %c0_i32_0 : i32, i32, i32
  }
  func.func @transform_1(%arg0: i32) -> (i32, i32, i32) {
    %c0_i32 = arith.constant 0 : i32
    %c0_i32_0 = arith.constant 0 : i32
    %c0_i32_1 = arith.constant 0 : i32
    return %arg0, %c0_i32, %c0_i32_0 : i32, i32, i32
  }
  func.func @transform_2(%arg0: i32) -> (i32, i32) {
    %c0_i32 = arith.constant 0 : i32
    %c0_i32_0 = arith.constant 0 : i32
    %c0_i32_1 = arith.constant 0 : i32
    return %c0_i32, %c0_i32_0 : i32, i32
  }
  func.func @transform_3(%arg0: i32) -> (i32, i32) {
    %c0_i32 = arith.constant 0 : i32
    %c0_i32_0 = arith.constant 0 : i32
    %c0_i32_1 = arith.constant 0 : i32
    return %c0_i32, %c0_i32_0 : i32, i32
  }
  func.func @transform_4(%arg0: i32) -> (i32, i32) {
    %c0_i32 = arith.constant 0 : i32
    %c0_i32_0 = arith.constant 0 : i32
    %c0_i32_1 = arith.constant 0 : i32
    return %c0_i32, %c0_i32_0 : i32, i32
  }
  func.func @transform_5(%arg0: i32) -> (i32, i32) {
    %c0_i32 = arith.constant 0 : i32
    %c0_i32_0 = arith.constant 0 : i32
    %c0_i32_1 = arith.constant 0 : i32
    return %c0_i32, %c0_i32_0 : i32, i32
  }
  func.func @transform_6(%arg0: i32) -> (i32, i32) {
    %c0_i32 = arith.constant 0 : i32
    %c0_i32_0 = arith.constant 0 : i32
    %c0_i32_1 = arith.constant 0 : i32
    return %c0_i32, %c0_i32_0 : i32, i32
  }
  func.func @transform_7(%arg0: i32) -> (i32, i32) {
    %c0_i32 = arith.constant 0 : i32
    %c0_i32_0 = arith.constant 0 : i32
    %c0_i32_1 = arith.constant 0 : i32
    return %c0_i32, %c0_i32_0 : i32, i32
  }
  func.func @transform_8(%arg0: i32) -> (i32, i32) {
    %c0_i32 = arith.constant 0 : i32
    %c0_i32_0 = arith.constant 0 : i32
    %c0_i32_1 = arith.constant 0 : i32
    return %c0_i32, %c0_i32_0 : i32, i32
  }
  func.func @transform_9(%arg0: i32) -> (i32, i32) {
    %c0_i32 = arith.constant 0 : i32
    %c0_i32_0 = arith.constant 0 : i32
    %c0_i32_1 = arith.constant 0 : i32
    return %c0_i32, %c0_i32_0 : i32, i32
  }
  func.func @transform_10(%arg0: i32) -> (i32, i32, i32) {
    %c0_i32 = arith.constant 0 : i32
    %c0_i32_0 = arith.constant 0 : i32
    %c0_i32_1 = arith.constant 0 : i32
    return %arg0, %c0_i32, %c0_i32_0 : i32, i32, i32
  }
}

</mosaic_0001>

<bundles_post_ra>
// kernel: tpu_custom_call.1
= control target key start
LH: loop header
LB: loop body
LE: loop exit
PB: predicated region body
PF: predicated region fallthrough
CT: control target
= control target key end

     0   :  { %15 = vsyncpa [#allocation4], 0  ;;  %s7677_s0 = inlined_call_operand.hbm [shape: f32[2,8,256], index: 0, kind: input, shape index: {}]   ;;  %s7678_s1 = inlined_call_operand.hbm [shape: f32[2,16,256], index: 1, kind: input, shape index: {}]   ;;  %s7679_s2 = inlined_call_operand.hbm [shape: bf16[256,512], index: 2, kind: input, shape index: {}]   ;;  %s7680_s3 = inlined_call_operand.hbm [shape: bf16[256,512], index: 3, kind: input, shape index: {}]   ;;  %s7681_s4 = inlined_call_operand.hbm [shape: bf16[256,512], index: 4, kind: input, shape index: {}]   ;;  %s7682_s5 = inlined_call_operand.hbm [shape: bf16[512,256], index: 5, kind: input, shape index: {}]   ;;  %s7683_s6 = inlined_call_operand.hbm [shape: bf16[256,512], index: 6, kind: input, shape index: {}]   ;;  %s7684_s7 = inlined_call_operand.hbm [shape: bf16[512,256], index: 7, kind: input, shape index: {}]   ;;  %s7685_s8 = inlined_call_operand.hbm [shape: f32[8,256], index: 8, kind: input, shape index: {}]   ;;  %s7686_s9 = inlined_call_operand.vmem [shape: f32[1,512], index: 9, kind: input, shape index: {}]   ;;  %s7687_s10 = inlined_call_operand.hbm [shape: f32[2,8,256], index: 10, kind: output, shape index: {}]  }
   0x1   :  { %16 = vsyncpa [#allocation7], 0 }
   0x2   :  { %17 = vsyncpa [#allocation10], 0 }
   0x3   :  { %18 = vsyncpa [#allocation13], 0 }
   0x4   :  { %19 = vsyncpa [#allocation16], 0 }
   0x5   :  { %20 = vsyncpa [#allocation5], 0  ;;  %s38_s15 = sshll.u32 %s7678_s1, 4  ;;  %s6931_s16 = smov [#allocation6]   ;;  %s39_s15 = int_to_ptr.hbm [resolvable:$true] %s38_s15 }
   0x6   :  { %s40_s17 = sshll.u32 %s6931_s16, 4  ;;  %s64_s20 = sshll.u32 %s7680_s3, 4  ;;  %s41_s17 = int_to_ptr.vmem [resolvable:$true] %s40_s17  ;;  %s65_s20 = int_to_ptr.hbm [resolvable:$true] %s64_s20 }
   0x7   :  { %s6932_s21 = smov 256   ;;  %s6933_s22 = smov 16  }
   0x8   :  { %46 = dma.hbm_to_vmem [thread:$0]  %s39_s15, 1024, %s41_s17, [#allocation7], %s6932_s21, %s6932_s21, %s6933_s22  }
   0x9   :  { %s6934_s23 = smov [#allocation9]   ;;  %s90_s1 = sshll.u32 %s7682_s5, 4  ;;  %s91_s1 = int_to_ptr.hbm [resolvable:$true] %s90_s1 }
   0xa   :  { %s66_s24 = sshll.u32 %s6934_s23, 4  ;;  %s6935_s3 = smov [#allocation12]   ;;  %s67_s24 = int_to_ptr.vmem [resolvable:$true] %s66_s24 }
   0xb   :  { %72 = dma.hbm_to_vmem [thread:$0]  %s65_s20, 8192, %s67_s24, [#allocation10], %s6932_s21, %s6932_s21, %s6933_s22  }
   0xc   :  { %s92_s27 = sshll.u32 %s6935_s3, 4  ;;  %s116_s30 = sshll.u32 %s7684_s7, 4  ;;  %s93_s27 = int_to_ptr.vmem [resolvable:$true] %s92_s27  ;;  %s117_s30 = int_to_ptr.hbm [resolvable:$true] %s116_s30 }
   0xd   :  { %s6936_s11 = smov 128   ;;  %s6937_s12 = smov 8  }
   0xe   :  { %98 = dma.hbm_to_vmem [thread:$0]  %s91_s1, 8192, %s93_s27, [#allocation13], %s6936_s11, %s6936_s11, %s6937_s12  }
   0xf   :  { %s6938_s13 = smov [#allocation15]   ;;  %s25_s16 = sshll.u32 %s7677_s0, 4  ;;  %s26_s16 = int_to_ptr.hbm [resolvable:$true] %s25_s16 }
  0x10   :  { %s118_s14 = sshll.u32 %s6938_s13, 4  ;;  %s51_s19 = sshll.u32 %s7679_s2, 4  ;;  %s119_s14 = int_to_ptr.vmem [resolvable:$true] %s118_s14  ;;  %s52_s19 = int_to_ptr.hbm [resolvable:$true] %s51_s19 }
  0x11   :  { %124 = dma.hbm_to_vmem [thread:$0]  %s117_s30, 8192, %s119_s14, [#allocation16], %s6936_s11, %s6936_s11, %s6937_s12  }
  0x12   :  { %s6939_s20 = smov [#allocation3]   ;;  %s6940_s7 = smov [#allocation8]  }
  0x13   :  { %s27_s23 = sshll.u32 %s6939_s20, 4  ;;  %s53_s24 = sshll.u32 %s6940_s7, 4  ;;  %s28_s23 = int_to_ptr.vmem [resolvable:$true] %s27_s23  ;;  %s54_s24 = int_to_ptr.vmem [resolvable:$true] %s53_s24 }
  0x14   :  { %33 = dma.hbm_to_vmem [thread:$0]  %s26_s16, 512, %s28_s23, [#allocation4], %s6932_s21, %s6932_s21, %s6933_s22  }
  0x15   :  { %s77_s0 = sshll.u32 %s7681_s4, 4  ;;  %s103_s3 = sshll.u32 %s7683_s6, 4  ;;  %s78_s0 = int_to_ptr.hbm [resolvable:$true] %s77_s0  ;;  %s104_s3 = int_to_ptr.hbm [resolvable:$true] %s103_s3 }
  0x16   :  { %59 = dma.hbm_to_vmem [thread:$0]  %s52_s19, 8192, %s54_s24, [#allocation7], %s6932_s21, %s6932_s21, %s6933_s22  }
  0x17   :  { %s6941_s27 = smov [#allocation11]   ;;  %s6942_s29 = smov [#allocation14]  }
  0x18   :  { %s79_s28 = sshll.u32 %s6941_s27, 4  ;;  %s105_s4 = sshll.u32 %s6942_s29, 4  ;;  %s80_s28 = int_to_ptr.vmem [resolvable:$true] %s79_s28  ;;  %s106_s4 = int_to_ptr.vmem [resolvable:$true] %s105_s4 }
  0x19   :  { %85 = dma.hbm_to_vmem [thread:$0]  %s78_s0, 8192, %s80_s28, [#allocation10], %s6932_s21, %s6932_s21, %s6933_s22  }
  0x1a   :  { %s130_s12 = sshll.u32 %s7685_s8, 4  ;;  %s6943_s6 = smov [#allocation17]   ;;  %s131_s12 = int_to_ptr.hbm [resolvable:$true] %s130_s12 }
  0x1b   :  { %111 = dma.hbm_to_vmem [thread:$0]  %s104_s3, 8192, %s106_s4, [#allocation13], %s6932_s21, %s6932_s21, %s6933_s22  }
  0x1c   :  { %s132_s13 = sshll.u32 %s6943_s6, 4  ;;  %s133_s13 = int_to_ptr.vmem [resolvable:$true] %s132_s13 }
  0x1d   :  { %135 = dma.hbm_to_vmem [thread:$0]  %s131_s12, 256, %s133_s13, [#allocation16]  }
  0x1e   :  { %6919 = dma.done.wait [#allocation4], 512  }
  0x1f   :  { %6920 = vsyncadd [#allocation4], 4294966784 }
  0x20   :  { %6921 = dma.done.wait [#allocation7], 9216  }
  0x21   :  { %6922 = vsyncadd [#allocation7], 4294958080 }
  0x22   :  { %6923 = dma.done.wait [#allocation10], 16384  }
  0x23   :  { %6924 = vsyncadd [#allocation10], 4294950912 }
  0x24   :  { %6925 = dma.done.wait [#allocation13], 16384  }
  0x25   :  { %6926 = vsyncadd [#allocation13], 4294950912 }
  0x26   :  { %6927 = dma.done.wait [#allocation16], 8448  }
  0x27   :  { %6928 = vsyncadd [#allocation16], 4294958848  ;;  %v4705_v0 = vld [vmem:[#allocation8 + $0xe0] sm:$0xf]  ;;  %v6205_v1 = vld [vmem:[#allocation8 + $0xec] sm:$0xf0] }
  0x28   :  { %v4833_v2 = vld [vmem:[#allocation8 + $0x1e0] sm:$0xf]  ;;  %v4706_v3 = vor.u32 %v6205_v1, %v4705_v0  ;;  %v6237_v4 = vld [vmem:[#allocation8 + $0x1ec] sm:$0xf0]  ;;  %v6203_v5 = vld [vmem:[#allocation8 + $0xe4] sm:$0xf] }
  0x29   :  { %v4707_v6 = vld [vmem:[#allocation8 + $0xf0] sm:$0xf0]  ;;  %v4834_v7 = vor.u32 %v6237_v4, %v4833_v2  ;;  %v6235_v9 = vld [vmem:[#allocation8 + $0x1e4] sm:$0xf]  ;;  %v4689_v11 = vld [vmem:[#allocation8 + $0xc0] sm:$0xf] }
  0x2a   :  { %v4710_v8 = vor.u32 %v6203_v5, %v4707_v6  ;;  %v4835_v10 = vld [vmem:[#allocation8 + $0x1f0] sm:$0xf0]  ;;  %577 = vmatpush.bf16.msra.mxu0 %v4706_v3  ;;  %v6201_v13 = vld [vmem:[#allocation8 + $0xcc] sm:$0xf0]  ;;  %v4817_v14 = vld [vmem:[#allocation8 + $0x1c0] sm:$0xf] }
  0x2b   :  { %v4838_v12 = vor.u32 %v6235_v9, %v4835_v10  ;;  %v6233_v15 = vld [vmem:[#allocation8 + $0x1cc] sm:$0xf0]  ;;  %591 = vmatpush.bf16.msra.mxu1 %v4834_v7  ;;  %v4690_v16 = vor.u32 %v6201_v13, %v4689_v11  ;;  %v6199_v18 = vld [vmem:[#allocation8 + $0xc4] sm:$0xf]  ;;  %v4691_v19 = vld [vmem:[#allocation8 + $0xd0] sm:$0xf0] }
  0x2c   :  { %605 = vmatpush.bf16.msra.mxu2 %v4710_v8  ;;  %v4818_v17 = vor.u32 %v6233_v15, %v4817_v14  ;;  %v6231_v20 = vld [vmem:[#allocation8 + $0x1c4] sm:$0xf]  ;;  %v4694_v21 = vor.u32 %v6199_v18, %v4691_v19  ;;  %v4819_v22 = vld [vmem:[#allocation8 + $0x1d0] sm:$0xf0]  ;;  %v4673_v23 = vld [vmem:[#allocation8 + $0xa0] sm:$0xf] }
  0x2d   :  { %619 = vmatpush.bf16.msra.mxu3 %v4838_v12  ;;  %v6197_v24 = vld [vmem:[#allocation8 + $0xac] sm:$0xf0]  ;;  %v4822_v25 = vor.u32 %v6231_v20, %v4819_v22  ;;  %v4801_v26 = vld [vmem:[#allocation8 + $0x1a0] sm:$0xf]  ;;  %v6195_v28 = vld [vmem:[#allocation8 + $0xa4] sm:$0xf] }
  0x2e   :  { %v6229_v27 = vld [vmem:[#allocation8 + $0x1ac] sm:$0xf0]  ;;  %578 = vmatpush.bf16.msra.mxu0 %v4690_v16  ;;  %v4674_v29 = vor.u32 %v6197_v24, %v4673_v23  ;;  %v4675_v30 = vld [vmem:[#allocation8 + $0xb0] sm:$0xf0]  ;;  %v6227_v31 = vld [vmem:[#allocation8 + $0x1a4] sm:$0xf] }
  0x2f   :  { %v4803_v32 = vld [vmem:[#allocation8 + $0x1b0] sm:$0xf0]  ;;  %592 = vmatpush.bf16.msra.mxu1 %v4818_v17  ;;  %v4802_v33 = vor.u32 %v6229_v27, %v4801_v26  ;;  %v4678_v34 = vor.u32 %v6195_v28, %v4675_v30  ;;  %v4657_v35 = vld [vmem:[#allocation8 + $0x80] sm:$0xf]  ;;  %v6193_v36 = vld [vmem:[#allocation8 + $0x8c] sm:$0xf0] }
  0x30   :  { %606 = vmatpush.bf16.msra.mxu2 %v4694_v21  ;;  %v4785_v37 = vld [vmem:[#allocation8 + $0x180] sm:$0xf]  ;;  %v4806_v38 = vor.u32 %v6227_v31, %v4803_v32  ;;  %v6225_v39 = vld [vmem:[#allocation8 + $0x18c] sm:$0xf0]  ;;  %v6191_v40 = vld [vmem:[#allocation8 + $0x84] sm:$0xf]  ;;  %v4658_v44 = vor.u32 %v6193_v36, %v4657_v35 }
  0x31   :  { %620 = vmatpush.bf16.msra.mxu3 %v4822_v25  ;;  %v4659_v41 = vld [vmem:[#allocation8 + $0x90] sm:$0xf0]  ;;  %v6223_v42 = vld [vmem:[#allocation8 + $0x184] sm:$0xf]  ;;  %v4786_v45 = vor.u32 %v6225_v39, %v4785_v37  ;;  %v4641_v47 = vld [vmem:[#allocation8 + $0x60] sm:$0xf] }
  0x32   :  { %v4787_v43 = vld [vmem:[#allocation8 + $0x190] sm:$0xf0]  ;;  %579 = vmatpush.bf16.msra.mxu0 %v4674_v29  ;;  %v4662_v46 = vor.u32 %v6191_v40, %v4659_v41  ;;  %v6189_v48 = vld [vmem:[#allocation8 + $0x6c] sm:$0xf0]  ;;  %v4769_v49 = vld [vmem:[#allocation8 + $0x160] sm:$0xf] }
  0x33   :  { %593 = vmatpush.bf16.msra.mxu1 %v4802_v33  ;;  %v4790_v50 = vor.u32 %v6223_v42, %v4787_v43  ;;  %v6221_v51 = vld [vmem:[#allocation8 + $0x16c] sm:$0xf0]  ;;  %v6187_v52 = vld [vmem:[#allocation8 + $0x64] sm:$0xf]  ;;  %v4643_v53 = vld [vmem:[#allocation8 + $0x70] sm:$0xf0]  ;;  %v4642_v56 = vor.u32 %v6189_v48, %v4641_v47 }
  0x34   :  { %607 = vmatpush.bf16.msra.mxu2 %v4678_v34  ;;  %v6219_v54 = vld [vmem:[#allocation8 + $0x164] sm:$0xf]  ;;  %v4771_v55 = vld [vmem:[#allocation8 + $0x170] sm:$0xf0]  ;;  %v4770_v57 = vor.u32 %v6221_v51, %v4769_v49  ;;  %v4646_v58 = vor.u32 %v6187_v52, %v4643_v53  ;;  %v4625_v59 = vld [vmem:[#allocation8 + $0x40] sm:$0xf] }
  0x35   :  { %621 = vmatpush.bf16.msra.mxu3 %v4806_v38  ;;  %v6185_v60 = vld [vmem:[#allocation8 + $0x4c] sm:$0xf0]  ;;  %v4753_v61 = vld [vmem:[#allocation8 + $0x140] sm:$0xf]  ;;  %v4774_v62 = vor.u32 %v6219_v54, %v4771_v55  ;;  %v6183_v0 = vld [vmem:[#allocation8 + $0x44] sm:$0xf] }
  0x36   :  { %580 = vmatpush.bf16.msra.mxu0 %v4658_v44  ;;  %v6217_v63 = vld [vmem:[#allocation8 + $0x14c] sm:$0xf0]  ;;  %v4627_v1 = vld [vmem:[#allocation8 + $0x50] sm:$0xf0]  ;;  %v6215_v2 = vld [vmem:[#allocation8 + $0x144] sm:$0xf]  ;;  %v4626_v4 = vor.u32 %v6185_v60, %v4625_v59 }
  0x37   :  { %594 = vmatpush.bf16.msra.mxu1 %v4786_v45  ;;  %v4755_v3 = vld [vmem:[#allocation8 + $0x150] sm:$0xf0]  ;;  %v4754_v5 = vor.u32 %v6217_v63, %v4753_v61  ;;  %v4630_v6 = vor.u32 %v6183_v0, %v4627_v1  ;;  %v4609_v7 = vld [vmem:[#allocation8 + $0x20] sm:$0xf]  ;;  %v6181_v8 = vld [vmem:[#allocation8 + $0x2c] sm:$0xf0] }
  0x38   :  { %608 = vmatpush.bf16.msra.mxu2 %v4662_v46  ;;  %v4737_v9 = vld [vmem:[#allocation8 + $0x120] sm:$0xf]  ;;  %v4758_v10 = vor.u32 %v6215_v2, %v4755_v3  ;;  %v6213_v11 = vld [vmem:[#allocation8 + $0x12c] sm:$0xf0]  ;;  %v6179_v12 = vld [vmem:[#allocation8 + $0x24] sm:$0xf]  ;;  %v4610_v16 = vor.u32 %v6181_v8, %v4609_v7 }
  0x39   :  { %622 = vmatpush.bf16.msra.mxu3 %v4790_v50  ;;  %v4611_v13 = vld [vmem:[#allocation8 + $0x30] sm:$0xf0]  ;;  %v6211_v14 = vld [vmem:[#allocation8 + $0x124] sm:$0xf]  ;;  %v4593_v17 = vld [vmem:[#allocation8] sm:$0xf]  ;;  %v4738_v19 = vor.u32 %v6213_v11, %v4737_v9 }
  0x3a   :  { %581 = vmatpush.bf16.msra.mxu0 %v4642_v56  ;;  %v4739_v15 = vld [vmem:[#allocation8 + $0x130] sm:$0xf0]  ;;  %v6177_v18 = vld [vmem:[#allocation8 + $0xc] sm:$0xf0]  ;;  %v4614_v20 = vor.u32 %v6179_v12, %v4611_v13  ;;  %v4721_v21 = vld [vmem:[#allocation8 + $0x100] sm:$0xf] }
  0x3b   :  { %595 = vmatpush.bf16.msra.mxu1 %v4770_v57  ;;  %v6209_v22 = vld [vmem:[#allocation8 + $0x10c] sm:$0xf0]  ;;  %v6175_v23 = vld [vmem:[#allocation8 + $0x4] sm:$0xf]  ;;  %v4742_v24 = vor.u32 %v6211_v14, %v4739_v15  ;;  %v4595_v25 = vld [vmem:[#allocation8 + $0x10] sm:$0xf0]  ;;  %v4594_v31 = vor.u32 %v6177_v18, %v4593_v17 }
  0x3c   :  { %609 = vmatpush.bf16.msra.mxu2 %v4646_v58  ;;  %v6207_v26 = vld [vmem:[#allocation8 + $0x104] sm:$0xf]  ;;  %v4723_v27 = vld [vmem:[#allocation8 + $0x110] sm:$0xf0]  ;;  %v4713_v28 = vld [vmem:[#allocation8 + $0xe8] sm:$0xf]  ;;  %v4722_v35 = vor.u32 %v6209_v22, %v4721_v21  ;;  %v4598_v36 = vor.u32 %v6175_v23, %v4595_v25 }
  0x3d   :  { %623 = vmatpush.bf16.msra.mxu3 %v4774_v62  ;;  %v6206_v29 = vld [vmem:[#allocation8 + $0xf4] sm:$0xf0]  ;;  %v4841_v30 = vld [vmem:[#allocation8 + $0x1e8] sm:$0xf]  ;;  %v6204_v33 = vld [vmem:[#allocation8 + $0xec] sm:$0xf]  ;;  %v4726_v39 = vor.u32 %v6207_v26, %v4723_v27 }
  0x3e   :  { %582 = vmatpush.bf16.msra.mxu0 %v4626_v4  ;;  %v6238_v32 = vld [vmem:[#allocation8 + $0x1f4] sm:$0xf0]  ;;  %v4715_v34 = vld [vmem:[#allocation8 + $0xf8] sm:$0xf0]  ;;  %v6236_v37 = vld [vmem:[#allocation8 + $0x1ec] sm:$0xf]  ;;  %v4714_v40 = vor.u32 %v6206_v29, %v4713_v28 }
  0x3f   :  { %596 = vmatpush.bf16.msra.mxu1 %v4754_v5  ;;  %v4843_v38 = vld [vmem:[#allocation8 + $0x1f8] sm:$0xf0]  ;;  %v4842_v41 = vor.u32 %v6238_v32, %v4841_v30  ;;  %v4718_v42 = vor.u32 %v6204_v33, %v4715_v34  ;;  %v4697_v43 = vld [vmem:[#allocation8 + $0xc8] sm:$0xf]  ;;  %v6202_v44 = vld [vmem:[#allocation8 + $0xd4] sm:$0xf0] }
  0x40   :  { %610 = vmatpush.bf16.msra.mxu2 %v4630_v6  ;;  %v4825_v45 = vld [vmem:[#allocation8 + $0x1c8] sm:$0xf]  ;;  %v4846_v46 = vor.u32 %v6236_v37, %v4843_v38  ;;  %v6234_v47 = vld [vmem:[#allocation8 + $0x1d4] sm:$0xf0]  ;;  %v6200_v48 = vld [vmem:[#allocation8 + $0xcc] sm:$0xf]  ;;  %v4698_v53 = vor.u32 %v6202_v44, %v4697_v43 }
  0x41   :  { %624 = vmatpush.bf16.msra.mxu3 %v4758_v10  ;;  %v4699_v49 = vld [vmem:[#allocation8 + $0xd8] sm:$0xf0]  ;;  %v6232_v50 = vld [vmem:[#allocation8 + $0x1cc] sm:$0xf]  ;;  %v4681_v52 = vld [vmem:[#allocation8 + $0xa8] sm:$0xf]  ;;  %v4826_v57 = vor.u32 %v6234_v47, %v4825_v45 }
  0x42   :  { %583 = vmatpush.bf16.msra.mxu0 %v4610_v16  ;;  %v4827_v51 = vld [vmem:[#allocation8 + $0x1d8] sm:$0xf0]  ;;  %v6198_v54 = vld [vmem:[#allocation8 + $0xb4] sm:$0xf0]  ;;  %v4809_v55 = vld [vmem:[#allocation8 + $0x1a8] sm:$0xf]  ;;  %v4702_v58 = vor.u32 %v6200_v48, %v4699_v49 }
  0x43   :  { %597 = vmatpush.bf16.msra.mxu1 %v4738_v19  ;;  %v6230_v56 = vld [vmem:[#allocation8 + $0x1b4] sm:$0xf0]  ;;  %v6196_v59 = vld [vmem:[#allocation8 + $0xac] sm:$0xf]  ;;  %v4683_v60 = vld [vmem:[#allocation8 + $0xb8] sm:$0xf0]  ;;  %v4830_v62 = vor.u32 %v6232_v50, %v4827_v51  ;;  %v4682_v6 = vor.u32 %v6198_v54, %v4681_v52 }
  0x44   :  { %611 = vmatpush.bf16.msra.mxu2 %v4614_v20  ;;  %v175_v61 = vld [vmem:[#allocation3] sm:$0xff]  ;;  %v177_v63 = vld [vmem:[#allocation3 + $0x10] sm:$0xff]  ;;  %v176_v0 = vld [vmem:[#allocation3 + $0x8] sm:$0xff]  ;;  %v4810_v7 = vor.u32 %v6230_v56, %v4809_v55  ;;  %v4686_v8 = vor.u32 %v6196_v59, %v4683_v60  ;;  %vm1794_vm0 = vcmask 523264   ;;  %s6944_s8 = smov 64   ;;  %vm1814_vm1 = vcmask 130048  }
  0x45   :  { %625 = vmatpush.bf16.msra.mxu3 %v4742_v24  ;;  %v178_v1 = vld [vmem:[#allocation3 + $0x18] sm:$0xff]  ;;  %v6228_v2 = vld [vmem:[#allocation8 + $0x1ac] sm:$0xf]  ;;  %v7047_v4 = vpack.c.bf16 %v177_v63, %v175_v61  ;;  %v4665_v9 = vld [vmem:[#allocation8 + $0x88] sm:$0xf]  ;;  %vm1850_vm2 = vcmask 519168  }
  0x46   :  { %584 = vmatpush.bf16.msra.mxu0 %v4594_v31  ;;  %v4811_v3 = vld [vmem:[#allocation8 + $0x1b8] sm:$0xf0]  ;;  %v7049_v5 = vpack.c.bf16 %v178_v1, %v176_v0  ;;  %v6194_v10 = vld [vmem:[#allocation8 + $0x94] sm:$0xf0]  ;;  %v4793_v11 = vld [vmem:[#allocation8 + $0x188] sm:$0xf] }
  0x47   :  { %598 = vmatpush.bf16.msra.mxu1 %v4722_v35  ;;  %v4814_v12 = vor.u32 %v6228_v2, %v4811_v3  ;;  %v6226_v13 = vld [vmem:[#allocation8 + $0x194] sm:$0xf0]  ;;  %v6192_v14 = vld [vmem:[#allocation8 + $0x8c] sm:$0xf]  ;;  %v4667_v15 = vld [vmem:[#allocation8 + $0x98] sm:$0xf0]  ;;  %v4666_v18 = vor.u32 %v6194_v10, %v4665_v9 }
  0x48   :  { %612 = vmatpush.bf16.msra.mxu2 %v4598_v36  ;;  %v6224_v16 = vld [vmem:[#allocation8 + $0x18c] sm:$0xf]  ;;  %v4795_v17 = vld [vmem:[#allocation8 + $0x198] sm:$0xf0]  ;;  %v4794_v19 = vor.u32 %v6226_v13, %v4793_v11  ;;  %v4670_v20 = vor.u32 %v6192_v14, %v4667_v15  ;;  %v4649_v21 = vld [vmem:[#allocation8 + $0x68] sm:$0xf] }
  0x49   :  { %626 = vmatpush.bf16.msra.mxu3 %v4726_v39  ;;  %585 = vmatmul.bf16.vlgmr.msra.gmra.mxu0 %v7047_v4  ;;  %v6190_v22 = vld [vmem:[#allocation8 + $0x74] sm:$0xf0]  ;;  %v4777_v23 = vld [vmem:[#allocation8 + $0x168] sm:$0xf]  ;;  %v4798_v24 = vor.u32 %v6224_v16, %v4795_v17  ;;  %v6188_v26 = vld [vmem:[#allocation8 + $0x6c] sm:$0xf] }
  0x4a   :  { %633 = vmatpush.bf16.msrb.mxu0 %v4714_v40  ;;  %599 = vmatmul.bf16.vlgmr.msra.gmra.mxu1 %v7049_v5  ;;  %v6222_v25 = vld [vmem:[#allocation8 + $0x174] sm:$0xf0]  ;;  %v4651_v27 = vld [vmem:[#allocation8 + $0x78] sm:$0xf0]  ;;  %v6220_v28 = vld [vmem:[#allocation8 + $0x16c] sm:$0xf]  ;;  %v4650_v30 = vor.u32 %v6190_v22, %v4649_v21 }
  0x4b   :  { %647 = vmatpush.bf16.msrb.mxu1 %v4842_v41  ;;  %613 = vmatmul.bf16.vlgmr.msra.gmra.mxu2 %v7047_v4  ;;  %v4779_v29 = vld [vmem:[#allocation8 + $0x178] sm:$0xf0]  ;;  %v4778_v31 = vor.u32 %v6222_v25, %v4777_v23  ;;  %v4654_v32 = vor.u32 %v6188_v26, %v4651_v27  ;;  %v4633_v33 = vld [vmem:[#allocation8 + $0x48] sm:$0xf]  ;;  %v6186_v34 = vld [vmem:[#allocation8 + $0x54] sm:$0xf0] }
  0x4c   :  { %661 = vmatpush.bf16.msrb.mxu2 %v4718_v42  ;;  %627 = vmatmul.bf16.vlgmr.msra.gmra.mxu3 %v7049_v5  ;;  %v4761_v35 = vld [vmem:[#allocation8 + $0x148] sm:$0xf]  ;;  %v4782_v36 = vor.u32 %v6220_v28, %v4779_v29  ;;  %v6218_v37 = vld [vmem:[#allocation8 + $0x154] sm:$0xf0]  ;;  %v6184_v38 = vld [vmem:[#allocation8 + $0x4c] sm:$0xf]  ;;  %v4634_v42 = vor.u32 %v6186_v34, %v4633_v33 }
  0x4d   :  { %675 = vmatpush.bf16.msrb.mxu3 %v4846_v46  ;;  %v4635_v39 = vld [vmem:[#allocation8 + $0x58] sm:$0xf0]  ;;  %v6216_v40 = vld [vmem:[#allocation8 + $0x14c] sm:$0xf]  ;;  %v4762_v43 = vor.u32 %v6218_v37, %v4761_v35  ;;  %v4617_v45 = vld [vmem:[#allocation8 + $0x28] sm:$0xf] }
  0x4e   :  { %634 = vmatpush.bf16.msrb.mxu0 %v4698_v53  ;;  %v4763_v41 = vld [vmem:[#allocation8 + $0x158] sm:$0xf0]  ;;  %v4638_v44 = vor.u32 %v6184_v38, %v4635_v39  ;;  %v6182_v46 = vld [vmem:[#allocation8 + $0x34] sm:$0xf0]  ;;  %v4745_v47 = vld [vmem:[#allocation8 + $0x128] sm:$0xf] }
  0x4f   :  { %648 = vmatpush.bf16.msrb.mxu1 %v4826_v57  ;;  %v4766_v48 = vor.u32 %v6216_v40, %v4763_v41  ;;  %v6214_v49 = vld [vmem:[#allocation8 + $0x134] sm:$0xf0]  ;;  %v6180_v50 = vld [vmem:[#allocation8 + $0x2c] sm:$0xf]  ;;  %v4619_v51 = vld [vmem:[#allocation8 + $0x38] sm:$0xf0]  ;;  %v4618_v54 = vor.u32 %v6182_v46, %v4617_v45 }
  0x50   :  { %662 = vmatpush.bf16.msrb.mxu2 %v4702_v58  ;;  %v6212_v52 = vld [vmem:[#allocation8 + $0x12c] sm:$0xf]  ;;  %v4747_v53 = vld [vmem:[#allocation8 + $0x138] sm:$0xf0]  ;;  %v4601_v55 = vld [vmem:[#allocation8 + $0x8] sm:$0xf]  ;;  %v4746_v57 = vor.u32 %v6214_v49, %v4745_v47  ;;  %v4622_v58 = vor.u32 %v6180_v50, %v4619_v51 }
  0x51   :  { %676 = vmatpush.bf16.msrb.mxu3 %v4830_v62  ;;  %v6178_v56 = vld [vmem:[#allocation8 + $0x14] sm:$0xf0]  ;;  %v4729_v59 = vld [vmem:[#allocation8 + $0x108] sm:$0xf]  ;;  %v6176_v61 = vld [vmem:[#allocation8 + $0xc] sm:$0xf]  ;;  %v4750_v62 = vor.u32 %v6212_v52, %v4747_v53 }
  0x52   :  { %635 = vmatpush.bf16.msrb.mxu0 %v4682_v6  ;;  %v6210_v60 = vld [vmem:[#allocation8 + $0x114] sm:$0xf0]  ;;  %v4603_v63 = vld [vmem:[#allocation8 + $0x18] sm:$0xf0]  ;;  %v6208_v0 = vld [vmem:[#allocation8 + $0x10c] sm:$0xf] }
  0x53   :  { %649 = vmatpush.bf16.msrb.mxu1 %v4810_v7  ;;  %v4731_v1 = vld [vmem:[#allocation8 + $0x118] sm:$0xf0]  ;;  %v4961_v2 = vld [vmem:[#allocation9 + $0xe0] sm:$0xf]  ;;  %v6269_v3 = vld [vmem:[#allocation9 + $0xec] sm:$0xf0]  ;;  %v4602_v7 = vor.u32 %v6178_v56, %v4601_v55  ;;  %v4730_v11 = vor.u32 %v6210_v60, %v4729_v59 }
  0x54   :  { %663 = vmatpush.bf16.msrb.mxu2 %v4686_v8  ;;  %v5089_v6 = vld [vmem:[#allocation9 + $0x1e0] sm:$0xf]  ;;  %v6301_v8 = vld [vmem:[#allocation9 + $0x1ec] sm:$0xf0]  ;;  %v6267_v9 = vld [vmem:[#allocation9 + $0xe4] sm:$0xf]  ;;  %v4734_v15 = vor.u32 %v6208_v0, %v4731_v1  ;;  %v4962_v16 = vor.u32 %v6269_v3, %v4961_v2 }
  0x55   :  { %677 = vmatpush.bf16.msrb.mxu3 %v4814_v12  ;;  %v4963_v10 = vld [vmem:[#allocation9 + $0xf0] sm:$0xf0]  ;;  %v4606_v12 = vor.u32 %v6176_v61, %v4603_v63  ;;  %v6299_v13 = vld [vmem:[#allocation9 + $0x1e4] sm:$0xf]  ;;  %v5090_v17 = vor.u32 %v6301_v8, %v5089_v6  ;;  %v5073_v21 = vld [vmem:[#allocation9 + $0x1c0] sm:$0xf] }
  0x56   :  { %636 = vmatpush.bf16.msrb.mxu0 %v4666_v18  ;;  %v5091_v14 = vld [vmem:[#allocation9 + $0x1f0] sm:$0xf0]  ;;  %v4966_v18 = vor.u32 %v6267_v9, %v4963_v10  ;;  %v6297_v23 = vld [vmem:[#allocation9 + $0x1cc] sm:$0xf0]  ;;  %v6295_v26 = vld [vmem:[#allocation9 + $0x1c4] sm:$0xf] }
  0x57   :  { %650 = vmatpush.bf16.msrb.mxu1 %v4794_v19  ;;  %v4945_v19 = vld [vmem:[#allocation9 + $0xc0] sm:$0xf]  ;;  %v5094_v22 = vor.u32 %v6299_v13, %v5091_v14  ;;  %v4947_v25 = vld [vmem:[#allocation9 + $0xd0] sm:$0xf0]  ;;  %v5074_v29 = vor.u32 %v6297_v23, %v5073_v21  ;;  %v6293_v35 = vld [vmem:[#allocation9 + $0x1ac] sm:$0xf0] }
  0x58   :  { %664 = vmatpush.bf16.msrb.mxu2 %v4670_v20  ;;  %v6265_v20 = vld [vmem:[#allocation9 + $0xcc] sm:$0xf0]  ;;  %v5075_v27 = vld [vmem:[#allocation9 + $0x1d0] sm:$0xf0]  ;;  %v5057_v33 = vld [vmem:[#allocation9 + $0x1a0] sm:$0xf] }
  0x59   :  { %678 = vmatpush.bf16.msrb.mxu3 %v4798_v24  ;;  %v6263_v24 = vld [vmem:[#allocation9 + $0xc4] sm:$0xf]  ;;  %v4946_v28 = vor.u32 %v6265_v20, %v4945_v19  ;;  %v5078_v34 = vor.u32 %v6295_v26, %v5075_v27  ;;  %v4931_v37 = vld [vmem:[#allocation9 + $0xb0] sm:$0xf0]  ;;  %v5058_v41 = vor.u32 %v6293_v35, %v5057_v33  ;;  %v5041_v45 = vld [vmem:[#allocation9 + $0x180] sm:$0xf] }
  0x5a   :  { %637 = vmatpush.bf16.msrb.mxu0 %v4650_v30  ;;  %v4950_v30 = vor.u32 %v6263_v24, %v4947_v25  ;;  %v6291_v38 = vld [vmem:[#allocation9 + $0x1a4] sm:$0xf]  ;;  %v5059_v39 = vld [vmem:[#allocation9 + $0x1b0] sm:$0xf0]  ;;  %v6289_v47 = vld [vmem:[#allocation9 + $0x18c] sm:$0xf0] }
  0x5b   :  { %651 = vmatpush.bf16.msrb.mxu1 %v4778_v31  ;;  %v4929_v31 = vld [vmem:[#allocation9 + $0xa0] sm:$0xf]  ;;  %v5062_v46 = vor.u32 %v6291_v38, %v5059_v39  ;;  %v4915_v49 = vld [vmem:[#allocation9 + $0x90] sm:$0xf0]  ;;  %v6287_v50 = vld [vmem:[#allocation9 + $0x184] sm:$0xf]  ;;  %v5042_v52 = vor.u32 %v6289_v47, %v5041_v45 }
  0x5c   :  { %665 = vmatpush.bf16.msrb.mxu2 %v4654_v32  ;;  %v6261_v32 = vld [vmem:[#allocation9 + $0xac] sm:$0xf0]  ;;  %v5043_v51 = vld [vmem:[#allocation9 + $0x190] sm:$0xf0]  ;;  %v4897_v53 = vld [vmem:[#allocation9 + $0x60] sm:$0xf] }
  0x5d   :  { %679 = vmatpush.bf16.msrb.mxu3 %v4782_v36  ;;  %v6259_v36 = vld [vmem:[#allocation9 + $0xa4] sm:$0xf]  ;;  %v4930_v40 = vor.u32 %v6261_v32, %v4929_v31  ;;  %v5025_v55 = vld [vmem:[#allocation9 + $0x160] sm:$0xf]  ;;  %v5046_v56 = vor.u32 %v6287_v50, %v5043_v51  ;;  %v4899_v59 = vld [vmem:[#allocation9 + $0x70] sm:$0xf0] }
  0x5e   :  { %638 = vmatpush.bf16.msrb.mxu0 %v4634_v42  ;;  %v4934_v42 = vor.u32 %v6259_v36, %v4931_v37  ;;  %v6283_v60 = vld [vmem:[#allocation9 + $0x164] sm:$0xf]  ;;  %v5027_v61 = vld [vmem:[#allocation9 + $0x170] sm:$0xf0]  ;;  %v4881_v1 = vld [vmem:[#allocation9 + $0x40] sm:$0xf] }
  0x5f   :  { %652 = vmatpush.bf16.msrb.mxu1 %v4762_v43  ;;  %v4913_v43 = vld [vmem:[#allocation9 + $0x80] sm:$0xf]  ;;  %v6249_v2 = vld [vmem:[#allocation9 + $0x4c] sm:$0xf0]  ;;  %v5030_v6 = vor.u32 %v6283_v60, %v5027_v61  ;;  %v6247_v8 = vld [vmem:[#allocation9 + $0x44] sm:$0xf] }
  0x60   :  { %666 = vmatpush.bf16.msrb.mxu2 %v4638_v44  ;;  %v6257_v44 = vld [vmem:[#allocation9 + $0x8c] sm:$0xf0]  ;;  %v5009_v3 = vld [vmem:[#allocation9 + $0x140] sm:$0xf]  ;;  %v4883_v9 = vld [vmem:[#allocation9 + $0x50] sm:$0xf0] }
  0x61   :  { %680 = vmatpush.bf16.msrb.mxu3 %v4766_v48  ;;  %v6255_v48 = vld [vmem:[#allocation9 + $0x84] sm:$0xf]  ;;  %v4886_v14 = vor.u32 %v6247_v8, %v4883_v9  ;;  %v6277_v19 = vld [vmem:[#allocation9 + $0x12c] sm:$0xf0]  ;;  %v4867_v21 = vld [vmem:[#allocation9 + $0x30] sm:$0xf0] }
  0x62   :  { %639 = vmatpush.bf16.msrb.mxu0 %v4618_v54  ;;  %v6253_v54 = vld [vmem:[#allocation9 + $0x6c] sm:$0xf0]  ;;  %v6279_v10 = vld [vmem:[#allocation9 + $0x144] sm:$0xf]  ;;  %v4995_v23 = vld [vmem:[#allocation9 + $0x130] sm:$0xf0] }
  0x63   :  { %653 = vmatpush.bf16.msrb.mxu1 %v4746_v57  ;;  %v6285_v57 = vld [vmem:[#allocation9 + $0x16c] sm:$0xf0]  ;;  %v6243_v20 = vld [vmem:[#allocation9 + $0x24] sm:$0xf]  ;;  %v4849_v25 = vld [vmem:[#allocation9] sm:$0xf] }
  0x64   :  { %667 = vmatpush.bf16.msrb.mxu2 %v4622_v58  ;;  %v6251_v58 = vld [vmem:[#allocation9 + $0x64] sm:$0xf]  ;;  %v5026_v63 = vor.u32 %v6285_v57, %v5025_v55  ;;  %v6241_v26 = vld [vmem:[#allocation9 + $0xc] sm:$0xf0]  ;;  %v4851_v33 = vld [vmem:[#allocation9 + $0x10] sm:$0xf0] }
  0x65   :  { %681 = vmatpush.bf16.msrb.mxu3 %v4750_v62  ;;  %v4898_v62 = vor.u32 %v6253_v54, %v4897_v53  ;;  %v4902_v0 = vor.u32 %v6251_v58, %v4899_v59  ;;  %v6239_v31 = vld [vmem:[#allocation9 + $0x4] sm:$0xf]  ;;  %v4979_v35 = vld [vmem:[#allocation9 + $0x110] sm:$0xf0]  ;;  %v6268_v37 = vld [vmem:[#allocation9 + $0xec] sm:$0xf]  ;;  %v4850_v39 = vor.u32 %v6241_v26, %v4849_v25 }
  0x66   :  { %640 = vmatpush.bf16.msrb.mxu0 %v4602_v7  ;;  %v6281_v7 = vld [vmem:[#allocation9 + $0x14c] sm:$0xf0]  ;;  %v179_v36 = vld [vmem:[#allocation6] sm:$0xff]  ;;  %v4971_v38 = vld [vmem:[#allocation9 + $0xf8] sm:$0xf0]  ;;  %vm1914_vm3 = vcmask 1043968  }
  0x67   :  { %654 = vmatpush.bf16.msrb.mxu1 %v4730_v11  ;;  %v5011_v11 = vld [vmem:[#allocation9 + $0x150] sm:$0xf0]  ;;  %v5010_v13 = vor.u32 %v6281_v7, %v5009_v3  ;;  %v180_v45 = vld [vmem:[#allocation6 + $0x8] sm:$0xff]  ;;  %v6270_v51 = vld [vmem:[#allocation9 + $0xf4] sm:$0xf0]  ;;  %s4574_s18 = sshll.u32 %s7687_s10, 4  ;;  %s4575_s18 = int_to_ptr.hbm [resolvable:$true] %s4574_s18 }
  0x68   :  { %668 = vmatpush.bf16.msrb.mxu2 %v4606_v12  ;;  %v4882_v12 = vor.u32 %v6249_v2, %v4881_v1  ;;  %v4969_v50 = vld [vmem:[#allocation9 + $0xe8] sm:$0xf]  ;;  %v6302_v54 = vld [vmem:[#allocation9 + $0x1f4] sm:$0xf0]  ;;  %v5083_v57 = vld [vmem:[#allocation9 + $0x1d8] sm:$0xf0] }
  0x69   :  { %682 = vmatpush.bf16.msrb.mxu3 %v4734_v15  ;;  %641 = vmatmul.bf16.vlgmr.msrb.gmra.mxu0 %v7047_v4  ;;  %v4865_v15 = vld [vmem:[#allocation9 + $0x20] sm:$0xf]  ;;  %v5097_v53 = vld [vmem:[#allocation9 + $0x1e8] sm:$0xf]  ;;  %v4970_v58 = vor.u32 %v6270_v51, %v4969_v50  ;;  %v6260_v61 = vld [vmem:[#allocation9 + $0xac] sm:$0xf] }
  0x6a   :  { %1081 = vmatpush.bf16.msra.mxu0 %v4962_v16  ;;  %655 = vmatmul.bf16.vlgmr.msrb.gmra.mxu1 %v7049_v5  ;;  %v6245_v16 = vld [vmem:[#allocation9 + $0x2c] sm:$0xf0]  ;;  %v5098_v60 = vor.u32 %v6302_v54, %v5097_v53  ;;  %v4939_v1 = vld [vmem:[#allocation9 + $0xb8] sm:$0xf0]  ;;  %v5081_v2 = vld [vmem:[#allocation9 + $0x1c8] sm:$0xf] }
  0x6b   :  { %1100 = vmatpush.bf16.msra.mxu1 %v5090_v17  ;;  %669 = vmatmul.bf16.vlgmr.msrb.gmra.mxu2 %v7047_v4  ;;  %v4914_v4 = vor.u32 %v6257_v44, %v4913_v43  ;;  %v4993_v17 = vld [vmem:[#allocation9 + $0x120] sm:$0xf]  ;;  %v4866_v24 = vor.u32 %v6245_v16, %v4865_v15  ;;  %v4854_v44 = vor.u32 %v6239_v31, %v4851_v33  ;;  %v6298_v3 = vld [vmem:[#allocation9 + $0x1d4] sm:$0xf0]  ;;  %v5067_v7 = vld [vmem:[#allocation9 + $0x1b8] sm:$0xf0] }
  0x6c   :  { %1119 = vmatpush.bf16.msra.mxu2 %v4966_v18  ;;  %683 = vmatmul.bf16.vlgmr.msrb.gmra.mxu3 %v7049_v5  ;;  %v4918_v5 = vor.u32 %v6255_v48, %v4915_v49  ;;  %v5014_v18 = vor.u32 %v6279_v10, %v5011_v11  ;;  %v4994_v27 = vor.u32 %v6277_v19, %v4993_v17  ;;  %v6264_v49 = vld [vmem:[#allocation9 + $0xcc] sm:$0xf]  ;;  %v4923_v15 = vld [vmem:[#allocation9 + $0x98] sm:$0xf0]  ;;  %v5065_v16 = vld [vmem:[#allocation9 + $0x1a8] sm:$0xf] }
  0x6d   :  { %1138 = vmatpush.bf16.msra.mxu3 %v5094_v22  ;;  %v6275_v22 = vld [vmem:[#allocation9 + $0x124] sm:$0xf]  ;;  %v4974_v48 = vor.u32 %v6268_v37, %v4971_v38  ;;  %v4942_v9 = vor.u32 %v6260_v61, %v4939_v1  ;;  %v5082_v10 = vor.u32 %v6298_v3, %v5081_v2  ;;  %v6256_v11 = vld [vmem:[#allocation9 + $0x8c] sm:$0xf]  ;;  %v6294_v17 = vld [vmem:[#allocation9 + $0x1b4] sm:$0xf0] }
  0x6e   :  { %1082 = vmatpush.bf16.msra.mxu0 %v4946_v28  ;;  %v4870_v28 = vor.u32 %v6243_v20, %v4867_v21  ;;  %v4998_v32 = vor.u32 %v6275_v22, %v4995_v23  ;;  %v5051_v19 = vld [vmem:[#allocation9 + $0x198] sm:$0xf0]  ;;  %v4926_v21 = vor.u32 %v6256_v11, %v4923_v15  ;;  %v5066_v22 = vor.u32 %v6294_v17, %v5065_v16  ;;  %v6252_v23 = vld [vmem:[#allocation9 + $0x6c] sm:$0xf]  ;;  %v6258_v25 = vld [vmem:[#allocation9 + $0x94] sm:$0xf0] }
  0x6f   :  { %1101 = vmatpush.bf16.msra.mxu1 %v5074_v29  ;;  %v4977_v29 = vld [vmem:[#allocation9 + $0x100] sm:$0xf]  ;;  %v6284_v31 = vld [vmem:[#allocation9 + $0x16c] sm:$0xf]  ;;  %v185_v33 = vld [vmem:[#allocation6 + $0x30] sm:$0xff] }
  0x70   :  { %1120 = vmatpush.bf16.msra.mxu2 %v4950_v30  ;;  %v6273_v30 = vld [vmem:[#allocation9 + $0x10c] sm:$0xf0]  ;;  %v4889_v53 = vld [vmem:[#allocation9 + $0x48] sm:$0xf]  ;;  %v6250_v54 = vld [vmem:[#allocation9 + $0x54] sm:$0xf0] }
  0x71   :  { %1139 = vmatpush.bf16.msra.mxu3 %v5078_v34  ;;  %v6271_v34 = vld [vmem:[#allocation9 + $0x104] sm:$0xf]  ;;  %v4978_v43 = vor.u32 %v6273_v30, %v4977_v29  ;;  %v6290_v29 = vld [vmem:[#allocation9 + $0x194] sm:$0xf0]  ;;  %v5003_v61 = vld [vmem:[#allocation9 + $0x138] sm:$0xf0] }
  0x72   :  { %1083 = vmatpush.bf16.msra.mxu0 %v4930_v40  ;;  %v181_v40 = vld [vmem:[#allocation6 + $0x10] sm:$0xff]  ;;  %v4982_v47 = vor.u32 %v6271_v34, %v4979_v35  ;;  %v183_v30 = vld [vmem:[#allocation6 + $0x20] sm:$0xff]  ;;  %v184_v34 = vld [vmem:[#allocation6 + $0x28] sm:$0xff] }
  0x73   :  { %1102 = vmatpush.bf16.msra.mxu1 %v5058_v41  ;;  %v6300_v41 = vld [vmem:[#allocation9 + $0x1ec] sm:$0xf]  ;;  %v186_v35 = vld [vmem:[#allocation6 + $0x38] sm:$0xff]  ;;  %v4873_v3 = vld [vmem:[#allocation9 + $0x28] sm:$0xf] }
  0x74   :  { %1121 = vmatpush.bf16.msra.mxu2 %v4934_v42  ;;  %v5099_v42 = vld [vmem:[#allocation9 + $0x1f8] sm:$0xf0]  ;;  %v4857_v15 = vld [vmem:[#allocation9 + $0x8] sm:$0xf]  ;;  %v6363_v16 = vld [vmem:[#allocation11 + $0x1e4] sm:$0xf] }
  0x75   :  { %1140 = vmatpush.bf16.msra.mxu3 %v5062_v46  ;;  %v182_v46 = vld [vmem:[#allocation6 + $0x18] sm:$0xff]  ;;  %v5347_v17 = vld [vmem:[#allocation11 + $0x1f0] sm:$0xf0] }
  0x76   :  { %1084 = vmatpush.bf16.msra.mxu0 %v4914_v4  ;;  %v7059_v4 = vpack.c.bf16 %v181_v40, %v179_v36  ;;  %v7061_v55 = vpack.c.bf16 %v182_v46, %v180_v45  ;;  %v4905_v40 = vld [vmem:[#allocation9 + $0x68] sm:$0xf]  ;;  %v6286_v45 = vld [vmem:[#allocation9 + $0x174] sm:$0xf0]  ;;  %v7067_v46 = vpack.c.bf16 %v185_v33, %v183_v30  ;;  %v4859_v2 = vld [vmem:[#allocation9 + $0x18] sm:$0xf0] }
  0x77   :  { %1103 = vmatpush.bf16.msra.mxu1 %v5042_v52  ;;  %v5102_v52 = vor.u32 %v6300_v41, %v5099_v42  ;;  %v6254_v41 = vld [vmem:[#allocation9 + $0x74] sm:$0xf0]  ;;  %v4987_v11 = vld [vmem:[#allocation9 + $0x118] sm:$0xf0]  ;;  %v5345_v30 = vld [vmem:[#allocation11 + $0x1e0] sm:$0xf] }
  0x78   :  { %1122 = vmatpush.bf16.msra.mxu2 %v4918_v5  ;;  %v4955_v5 = vld [vmem:[#allocation9 + $0xd8] sm:$0xf0]  ;;  %v4906_v50 = vor.u32 %v6254_v41, %v4905_v40  ;;  %v6323_v41 = vld [vmem:[#allocation11 + $0xa4] sm:$0xf] }
  0x79   :  { %1141 = vmatpush.bf16.msra.mxu3 %v5046_v56  ;;  %v6296_v56 = vld [vmem:[#allocation9 + $0x1cc] sm:$0xf]  ;;  %v4958_v59 = vor.u32 %v6264_v49, %v4955_v5  ;;  %v7069_v49 = vpack.c.bf16 %v186_v35, %v184_v34  ;;  %v5201_v35 = vld [vmem:[#allocation11 + $0xc0] sm:$0xf] }
  0x7a   :  { %1085 = vmatpush.bf16.msra.mxu0 %v4898_v62  ;;  %v4953_v62 = vld [vmem:[#allocation9 + $0xc8] sm:$0xf]  ;;  %v6244_v5 = vld [vmem:[#allocation9 + $0x2c] sm:$0xf] }
  0x7b   :  { %1104 = vmatpush.bf16.msra.mxu1 %v5026_v63  ;;  %v6266_v63 = vld [vmem:[#allocation9 + $0xd4] sm:$0xf0] }
  0x7c   :  { %1123 = vmatpush.bf16.msra.mxu2 %v4902_v0  ;;  %v5086_v0 = vor.u32 %v6296_v56, %v5083_v57  ;;  %v4954_v8 = vor.u32 %v6266_v63, %v4953_v62  ;;  %v4875_v57 = vld [vmem:[#allocation9 + $0x38] sm:$0xf0]  ;;  %v4890_v62 = vor.u32 %v6250_v54, %v4889_v53  ;;  %v6240_v63 = vld [vmem:[#allocation9 + $0xc] sm:$0xf]  ;;  %v6319_v54 = vld [vmem:[#allocation11 + $0x84] sm:$0xf] }
  0x7d   :  { %1142 = vmatpush.bf16.msra.mxu3 %v5030_v6  ;;  %v6292_v6 = vld [vmem:[#allocation9 + $0x1ac] sm:$0xf] }
  0x7e   :  { %1086 = vmatpush.bf16.msra.mxu0 %v4882_v12  ;;  %v4937_v12 = vld [vmem:[#allocation9 + $0xa8] sm:$0xf] }
  0x7f   :  { %1105 = vmatpush.bf16.msra.mxu1 %v5010_v13  ;;  %v6262_v13 = vld [vmem:[#allocation9 + $0xb4] sm:$0xf0] }
  0x80   :  { %1124 = vmatpush.bf16.msra.mxu2 %v4886_v14  ;;  %v5070_v14 = vor.u32 %v6292_v6, %v5067_v7  ;;  %v4938_v20 = vor.u32 %v6262_v13, %v4937_v12  ;;  %v6246_v6 = vld [vmem:[#allocation9 + $0x34] sm:$0xf0]  ;;  %v6331_v12 = vld [vmem:[#allocation11 + $0xe4] sm:$0xf]  ;;  %v5219_v13 = vld [vmem:[#allocation11 + $0xf0] sm:$0xf0] }
  0x81   :  { %1143 = vmatpush.bf16.msra.mxu3 %v5014_v18  ;;  %v6288_v18 = vld [vmem:[#allocation9 + $0x18c] sm:$0xf] }
  0x82   :  { %1087 = vmatpush.bf16.msra.mxu0 %v4866_v24  ;;  %v4921_v24 = vld [vmem:[#allocation9 + $0x88] sm:$0xf]  ;;  %v5054_v26 = vor.u32 %v6288_v18, %v5051_v19  ;;  %v4862_v18 = vor.u32 %v6240_v63, %v4859_v2  ;;  %v5299_v63 = vld [vmem:[#allocation11 + $0x190] sm:$0xf0]  ;;  %v5153_v2 = vld [vmem:[#allocation11 + $0x60] sm:$0xf] }
  0x83   :  { %1106 = vmatpush.bf16.msra.mxu1 %v4994_v27  ;;  %v4907_v27 = vld [vmem:[#allocation9 + $0x78] sm:$0xf0]  ;;  %v4922_v36 = vor.u32 %v6258_v25, %v4921_v24  ;;  %v5217_v24 = vld [vmem:[#allocation11 + $0xe0] sm:$0xf]  ;;  %v6333_v25 = vld [vmem:[#allocation11 + $0xec] sm:$0xf0] }
  0x84   :  { %1125 = vmatpush.bf16.msra.mxu2 %v4870_v28  ;;  %v5049_v28 = vld [vmem:[#allocation9 + $0x188] sm:$0xf]  ;;  %v4910_v37 = vor.u32 %v6252_v23, %v4907_v27  ;;  %v6327_v27 = vld [vmem:[#allocation11 + $0xc4] sm:$0xf]  ;;  %v5218_v34 = vor.u32 %v6333_v25, %v5217_v24  ;;  %v6334_v25 = vld [vmem:[#allocation11 + $0xf4] sm:$0xf0] }
  0x85   :  { %1144 = vmatpush.bf16.msra.mxu3 %v4998_v32  ;;  %v5035_v32 = vld [vmem:[#allocation9 + $0x178] sm:$0xf0]  ;;  %v5050_v38 = vor.u32 %v6290_v29, %v5049_v28  ;;  %v5350_v28 = vor.u32 %v6363_v16, %v5347_v17  ;;  %v5203_v29 = vld [vmem:[#allocation11 + $0xd0] sm:$0xf0]  ;;  %v6305_v16 = vld [vmem:[#allocation11 + $0xc] sm:$0xf0] }
  0x86   :  { %1088 = vmatpush.bf16.msra.mxu0 %v4850_v39  ;;  %v6248_v39 = vld [vmem:[#allocation9 + $0x4c] sm:$0xf]  ;;  %v5038_v42 = vor.u32 %v6284_v31, %v5035_v32  ;;  %v6365_v31 = vld [vmem:[#allocation11 + $0x1ec] sm:$0xf0]  ;;  %v5225_v24 = vld [vmem:[#allocation11 + $0xe8] sm:$0xf] }
  0x87   :  { %1107 = vmatpush.bf16.msra.mxu1 %v4978_v43  ;;  %v4891_v43 = vld [vmem:[#allocation9 + $0x58] sm:$0xf0]  ;;  %v5346_v40 = vor.u32 %v6365_v31, %v5345_v30  ;;  %v5139_v30 = vld [vmem:[#allocation11 + $0x50] sm:$0xf0]  ;;  %v6343_v31 = vld [vmem:[#allocation11 + $0x144] sm:$0xf] }
  0x88   :  { %1126 = vmatpush.bf16.msra.mxu2 %v4854_v44  ;;  %v5033_v44 = vld [vmem:[#allocation9 + $0x168] sm:$0xf]  ;;  %v4894_v51 = vor.u32 %v6248_v39, %v4891_v43  ;;  %v5331_v39 = vld [vmem:[#allocation11 + $0x1d0] sm:$0xf0]  ;;  %v5329_v43 = vld [vmem:[#allocation11 + $0x1c0] sm:$0xf] }
  0x89   :  { %1145 = vmatpush.bf16.msra.mxu3 %v4982_v47  ;;  %1089 = vmatmul.bf16.vlgmr.msra.gmra.mxu0 %v7059_v4  ;;  %v6280_v47 = vld [vmem:[#allocation9 + $0x14c] sm:$0xf] }
  0x8a   :  { %1108 = vmatmul.bf16.vlgmr.msra.gmra.mxu1 %v7061_v55  ;;  %1157 = vmatpush.bf16.msrb.mxu0 %v4970_v58  ;;  %v5017_v58 = vld [vmem:[#allocation9 + $0x148] sm:$0xf] }
  0x8b   :  { %1127 = vmatmul.bf16.vlgmr.msra.gmra.mxu2 %v7059_v4  ;;  %1176 = vmatpush.bf16.msrb.mxu1 %v5098_v60  ;;  %v6276_v60 = vld [vmem:[#allocation9 + $0x12c] sm:$0xf] }
  0x8c   :  { %1195 = vmatpush.bf16.msrb.mxu2 %v4974_v48  ;;  %1146 = vmatmul.bf16.vlgmr.msra.gmra.mxu3 %v7061_v55  ;;  %v5019_v48 = vld [vmem:[#allocation9 + $0x158] sm:$0xf0]  ;;  %v5006_v7 = vor.u32 %v6276_v60, %v5003_v61  ;;  %v6321_v60 = vld [vmem:[#allocation11 + $0x8c] sm:$0xf0] }
  0x8d   :  { %1214 = vmatpush.bf16.msrb.mxu3 %v5102_v52  ;;  %v5034_v52 = vor.u32 %v6286_v45, %v5033_v44  ;;  %v5022_v56 = vor.u32 %v6280_v47, %v5019_v48  ;;  %v6361_v44 = vld [vmem:[#allocation11 + $0x1cc] sm:$0xf0]  ;;  %v5185_v47 = vld [vmem:[#allocation11 + $0xa0] sm:$0xf] }
  0x8e   :  { %1158 = vmatpush.bf16.msrb.mxu0 %v4954_v8  ;;  %v6272_v8 = vld [vmem:[#allocation9 + $0x10c] sm:$0xf]  ;;  %v5330_v53 = vor.u32 %v6361_v44, %v5329_v43  ;;  %v5123_v43 = vld [vmem:[#allocation11 + $0x30] sm:$0xf0] }
  0x8f   :  { %1177 = vmatpush.bf16.msrb.mxu1 %v5082_v10  ;;  %v6278_v10 = vld [vmem:[#allocation9 + $0x134] sm:$0xf0]  ;;  %v4990_v23 = vor.u32 %v6272_v8, %v4987_v11  ;;  %v6313_v8 = vld [vmem:[#allocation11 + $0x4c] sm:$0xf0] }
  0x90   :  { %1196 = vmatpush.bf16.msrb.mxu2 %v4958_v59  ;;  %v6282_v59 = vld [vmem:[#allocation9 + $0x154] sm:$0xf0]  ;;  %v6309_v11 = vld [vmem:[#allocation11 + $0x2c] sm:$0xf0] }
  0x91   :  { %1215 = vmatpush.bf16.msrb.mxu3 %v5086_v0  ;;  %v4878_v0 = vor.u32 %v6244_v5, %v4875_v57  ;;  %v5018_v1 = vor.u32 %v6282_v59, %v5017_v58  ;;  %v5315_v5 = vld [vmem:[#allocation11 + $0x1b0] sm:$0xf0]  ;;  %v5169_v58 = vld [vmem:[#allocation11 + $0x80] sm:$0xf] }
  0x92   :  { %1159 = vmatpush.bf16.msrb.mxu0 %v4938_v20  ;;  %v6242_v20 = vld [vmem:[#allocation9 + $0x14] sm:$0xf0] }
  0x93   :  { %1178 = vmatpush.bf16.msrb.mxu1 %v5066_v22  ;;  %v6274_v22 = vld [vmem:[#allocation9 + $0x114] sm:$0xf0]  ;;  %v4858_v32 = vor.u32 %v6242_v20, %v4857_v15 }
  0x94   :  { %1197 = vmatpush.bf16.msrb.mxu2 %v4942_v9  ;;  %v5001_v9 = vld [vmem:[#allocation9 + $0x128] sm:$0xf] }
  0x95   :  { %1216 = vmatpush.bf16.msrb.mxu3 %v5070_v14  ;;  %v4874_v14 = vor.u32 %v6246_v6, %v4873_v3  ;;  %v5002_v19 = vor.u32 %v6278_v10, %v5001_v9  ;;  %v6317_v3 = vld [vmem:[#allocation11 + $0x6c] sm:$0xf0]  ;;  %v5121_v10 = vld [vmem:[#allocation11 + $0x20] sm:$0xf] }
  0x96   :  { %1160 = vmatpush.bf16.msrb.mxu0 %v4922_v36  ;;  %v6329_v36 = vld [vmem:[#allocation11 + $0xcc] sm:$0xf0]  ;;  %v5154_v6 = vor.u32 %v6317_v3, %v5153_v2  ;;  %v5122_v15 = vor.u32 %v6309_v11, %v5121_v10  ;;  %v5249_v2 = vld [vmem:[#allocation11 + $0x120] sm:$0xf] }
  0x97   :  { %1179 = vmatpush.bf16.msrb.mxu1 %v5050_v38  ;;  %v6359_v38 = vld [vmem:[#allocation11 + $0x1c4] sm:$0xf]  ;;  %v5202_v45 = vor.u32 %v6329_v36, %v5201_v35  ;;  %v5226_v35 = vor.u32 %v6334_v25, %v5225_v24  ;;  %v6341_v3 = vld [vmem:[#allocation11 + $0x12c] sm:$0xf0] }
  0x98   :  { %1198 = vmatpush.bf16.msrb.mxu2 %v4926_v21  ;;  %v4985_v21 = vld [vmem:[#allocation9 + $0x108] sm:$0xf]  ;;  %v5334_v48 = vor.u32 %v6359_v38, %v5331_v39  ;;  %v6330_v38 = vld [vmem:[#allocation11 + $0xd4] sm:$0xf0]  ;;  %v5281_v39 = vld [vmem:[#allocation11 + $0x160] sm:$0xf] }
  0x99   :  { %1217 = vmatpush.bf16.msrb.mxu3 %v5054_v26  ;;  %1094 = vmatmul.bf16.gmra.mxu0 %v7067_v46  ;;  %v5222_v26 = vor.u32 %v6331_v12, %v5219_v13  ;;  %v4986_v33 = vor.u32 %v6274_v22, %v4985_v21  ;;  %v5105_v12 = vld [vmem:[#allocation11] sm:$0xf]  ;;  %v6347_v21 = vld [vmem:[#allocation11 + $0x164] sm:$0xf]  ;;  %v5283_v22 = vld [vmem:[#allocation11 + $0x170] sm:$0xf0] }
  0x9a   :  { %1113 = vmatmul.bf16.gmra.mxu1 %v7069_v49  ;;  %1161 = vmatpush.bf16.msrb.mxu0 %v4906_v50  ;;  %v6325_v50 = vld [vmem:[#allocation11 + $0xac] sm:$0xf0]  ;;  %v5313_v13 = vld [vmem:[#allocation11 + $0x1a0] sm:$0xf] }
  0x9b   :  { %1132 = vmatmul.bf16.gmra.mxu2 %v7067_v46  ;;  %1180 = vmatpush.bf16.msrb.mxu1 %v5034_v52  ;;  %v6355_v52 = vld [vmem:[#allocation11 + $0x1a4] sm:$0xf]  ;;  %v5186_v57 = vor.u32 %v6325_v50, %v5185_v47  ;;  %v5265_v50 = vld [vmem:[#allocation11 + $0x140] sm:$0xf]  ;;  %v6337_v11 = vld [vmem:[#allocation11 + $0x10c] sm:$0xf0] }
  0x9c   :  { %1199 = vmatpush.bf16.msrb.mxu2 %v4910_v37  ;;  %1151 = vmatmul.bf16.gmra.mxu3 %v7069_v49  ;;  %v5206_v37 = vor.u32 %v6327_v27, %v5203_v29  ;;  %v5318_v59 = vor.u32 %v6355_v52, %v5315_v5  ;;  %v6353_v27 = vld [vmem:[#allocation11 + $0x18c] sm:$0xf0]  ;;  %v6311_v29 = vld [vmem:[#allocation11 + $0x44] sm:$0xf]  ;;  %v6326_v52 = vld [vmem:[#allocation11 + $0xb4] sm:$0xf0] }
  0x9d   :  { %1218 = vmatpush.bf16.msrb.mxu3 %v5038_v42  ;;  %v5187_v42 = vld [vmem:[#allocation11 + $0xb0] sm:$0xf0]  ;;  %v6339_v47 = vld [vmem:[#allocation11 + $0x124] sm:$0xf] }
  0x9e   :  { %1162 = vmatpush.bf16.msrb.mxu0 %v4890_v62  ;;  %v6351_v62 = vld [vmem:[#allocation11 + $0x184] sm:$0xf] }
  0x9f   :  { %1181 = vmatpush.bf16.msrb.mxu1 %v5018_v1  ;;  %v5302_v1 = vor.u32 %v6351_v62, %v5299_v63  ;;  %v5177_v63 = vld [vmem:[#allocation11 + $0x88] sm:$0xf] }
  0xa0   :  { %1200 = vmatpush.bf16.msrb.mxu2 %v4894_v51  ;;  %v5190_v51 = vor.u32 %v6323_v41, %v5187_v42  ;;  %v6307_v42 = vld [vmem:[#allocation11 + $0x24] sm:$0xf] }
  0xa1   :  { %1219 = vmatpush.bf16.msrb.mxu3 %v5022_v56  ;;  %v5171_v56 = vld [vmem:[#allocation11 + $0x90] sm:$0xf0] }
  0xa2   :  { %1163 = vmatpush.bf16.msrb.mxu0 %v4874_v14  ;;  %v5174_v61 = vor.u32 %v6319_v54, %v5171_v56  ;;  %v6357_v14 = vld [vmem:[#allocation11 + $0x1ac] sm:$0xf0]  ;;  %v6303_v56 = vld [vmem:[#allocation11 + $0x4] sm:$0xf] }
  0xa3   :  { %1182 = vmatpush.bf16.msrb.mxu1 %v5002_v19  ;;  %v5314_v17 = vor.u32 %v6357_v14, %v5313_v13  ;;  %v5155_v19 = vld [vmem:[#allocation11 + $0x70] sm:$0xf0]  ;;  %v6314_v13 = vld [vmem:[#allocation11 + $0x54] sm:$0xf0] }
  0xa4   :  { %1201 = vmatpush.bf16.msrb.mxu2 %v4878_v0  ;;  %v5170_v0 = vor.u32 %v6321_v60, %v5169_v58  ;;  %v6335_v58 = vld [vmem:[#allocation11 + $0x104] sm:$0xf]  ;;  %v5235_v60 = vld [vmem:[#allocation11 + $0x110] sm:$0xf0] }
  0xa5   :  { %1220 = vmatpush.bf16.msrb.mxu3 %v5006_v7  ;;  %v5137_v7 = vld [vmem:[#allocation11 + $0x40] sm:$0xf]  ;;  %v5238_v62 = vor.u32 %v6335_v58, %v5235_v60  ;;  %v5353_v58 = vld [vmem:[#allocation11 + $0x1e8] sm:$0xf] }
  0xa6   :  { %1164 = vmatpush.bf16.msrb.mxu0 %v4858_v32  ;;  %v5138_v9 = vor.u32 %v6313_v8, %v5137_v7  ;;  %v5106_v32 = vor.u32 %v6305_v16, %v5105_v12  ;;  %v5161_v7 = vld [vmem:[#allocation11 + $0x68] sm:$0xf]  ;;  %v6318_v8 = vld [vmem:[#allocation11 + $0x74] sm:$0xf0] }
  0xa7   :  { %1183 = vmatpush.bf16.msrb.mxu1 %v4986_v33  ;;  %v5142_v33 = vor.u32 %v6311_v29, %v5139_v30  ;;  %v5162_v10 = vor.u32 %v6318_v8, %v5161_v7  ;;  %v5145_v12 = vld [vmem:[#allocation11 + $0x48] sm:$0xf]  ;;  %v6362_v8 = vld [vmem:[#allocation11 + $0x1d4] sm:$0xf0] }
  0xa8   :  { %1202 = vmatpush.bf16.msrb.mxu2 %v4862_v18  ;;  %v6315_v18 = vld [vmem:[#allocation11 + $0x64] sm:$0xf]  ;;  %v5129_v16 = vld [vmem:[#allocation11 + $0x28] sm:$0xf] }
  0xa9   :  { %1221 = vmatpush.bf16.msrb.mxu3 %v4990_v23  ;;  %1165 = vmatmul.bf16.vlgmr.msrb.gmra.mxu0 %v7059_v4  ;;  %v5158_v20 = vor.u32 %v6315_v18, %v5155_v19  ;;  %v5297_v23 = vld [vmem:[#allocation11 + $0x180] sm:$0xf]  ;;  %v5113_v18 = vld [vmem:[#allocation11 + $0x8] sm:$0xf] }
  0xaa   :  { %1617 = vmatpush.bf16.msra.mxu0 %v5218_v34  ;;  %1184 = vmatmul.bf16.vlgmr.msrb.gmra.mxu1 %v7061_v55  ;;  %v5267_v34 = vld [vmem:[#allocation11 + $0x150] sm:$0xf0]  ;;  %v5337_v7 = vld [vmem:[#allocation11 + $0x1c8] sm:$0xf] }
  0xab   :  { %1636 = vmatpush.bf16.msra.mxu1 %v5346_v40  ;;  %1203 = vmatmul.bf16.vlgmr.msrb.gmra.mxu2 %v7059_v4  ;;  %v5270_v36 = vor.u32 %v6343_v31, %v5267_v34  ;;  %v6349_v40 = vld [vmem:[#allocation11 + $0x16c] sm:$0xf0] }
  0xac   :  { %1655 = vmatpush.bf16.msra.mxu2 %v5222_v26  ;;  %1222 = vmatmul.bf16.vlgmr.msrb.gmra.mxu3 %v7061_v55  ;;  %v5286_v26 = vor.u32 %v6347_v21, %v5283_v22  ;;  %v5282_v41 = vor.u32 %v6349_v40, %v5281_v39  ;;  %v6332_v40 = vld [vmem:[#allocation11 + $0xec] sm:$0xf] }
  0xad   :  { %1674 = vmatpush.bf16.msra.mxu3 %v5350_v28  ;;  %v5298_v28 = vor.u32 %v6353_v27, %v5297_v23 }
  0xae   :  { %1618 = vmatpush.bf16.msra.mxu0 %v5202_v45  ;;  %v5126_v45 = vor.u32 %v6307_v42, %v5123_v43  ;;  %v6364_v42 = vld [vmem:[#allocation11 + $0x1ec] sm:$0xf] }
  0xaf   :  { %1637 = vmatpush.bf16.msra.mxu1 %v5330_v53  ;;  %v6345_v53 = vld [vmem:[#allocation11 + $0x14c] sm:$0xf0] }
  0xb0   :  { %1656 = vmatpush.bf16.msra.mxu2 %v5206_v37  ;;  %v5209_v37 = vld [vmem:[#allocation11 + $0xc8] sm:$0xf]  ;;  %v5266_v54 = vor.u32 %v6345_v53, %v5265_v50  ;;  %v5211_v50 = vld [vmem:[#allocation11 + $0xd8] sm:$0xf0] }
  0xb1   :  { %1675 = vmatpush.bf16.msra.mxu3 %v5334_v48  ;;  %v5210_v44 = vor.u32 %v6330_v38, %v5209_v37  ;;  %v5251_v48 = vld [vmem:[#allocation11 + $0x130] sm:$0xf0] }
  0xb2   :  { %1619 = vmatpush.bf16.msra.mxu0 %v5186_v57  ;;  %v5254_v5 = vor.u32 %v6339_v47, %v5251_v48  ;;  %v5107_v57 = vld [vmem:[#allocation11 + $0x10] sm:$0xf0]  ;;  %v6328_v48 = vld [vmem:[#allocation11 + $0xcc] sm:$0xf] }
  0xb3   :  { %1638 = vmatpush.bf16.msra.mxu1 %v5314_v17  ;;  %v6310_v17 = vld [vmem:[#allocation11 + $0x34] sm:$0xf0]  ;;  %v5214_v53 = vor.u32 %v6328_v48, %v5211_v50  ;;  %v5291_v50 = vld [vmem:[#allocation11 + $0x178] sm:$0xf0] }
  0xb4   :  { %1657 = vmatpush.bf16.msra.mxu2 %v5190_v51  ;;  %v5193_v51 = vld [vmem:[#allocation11 + $0xa8] sm:$0xf]  ;;  %v5130_v19 = vor.u32 %v6310_v17, %v5129_v16 }
  0xb5   :  { %1676 = vmatpush.bf16.msra.mxu3 %v5318_v59  ;;  %v5110_v59 = vor.u32 %v6303_v56, %v5107_v57 }
  0xb6   :  { %1620 = vmatpush.bf16.msra.mxu0 %v5170_v0  ;;  %v6322_v0 = vld [vmem:[#allocation11 + $0x94] sm:$0xf0] }
  0xb7   :  { %1639 = vmatpush.bf16.msra.mxu1 %v5298_v28 }
  0xb8   :  { %1658 = vmatpush.bf16.msra.mxu2 %v5174_v61  ;;  %v5194_v61 = vor.u32 %v6326_v52, %v5193_v51  ;;  %v6360_v51 = vld [vmem:[#allocation11 + $0x1cc] sm:$0xf] }
  0xb9   :  { %1677 = vmatpush.bf16.msra.mxu3 %v5302_v1  ;;  %1170 = vmatmul.bf16.gmra.mxu0 %v7067_v46  ;;  %v5178_v1 = vor.u32 %v6322_v0, %v5177_v63  ;;  %v6356_v63 = vld [vmem:[#allocation11 + $0x1ac] sm:$0xf] }
  0xba   :  { %1621 = vmatpush.bf16.msra.mxu0 %v5154_v6  ;;  %1189 = vmatmul.bf16.gmra.mxu1 %v7069_v49  ;;  %v5250_v6 = vor.u32 %v6341_v3, %v5249_v2  ;;  %v5323_v3 = vld [vmem:[#allocation11 + $0x1b8] sm:$0xf0] }
  0xbb   :  { %1208 = vmatmul.bf16.gmra.mxu2 %v7067_v46  ;;  %1640 = vmatpush.bf16.msra.mxu1 %v5282_v41  ;;  %v5227_v41 = vld [vmem:[#allocation11 + $0xf8] sm:$0xf0] }
  0xbc   :  { %1227 = vmatmul.bf16.gmra.mxu3 %v7069_v49  ;;  %1659 = vmatpush.bf16.msra.mxu2 %v5158_v20  ;;  %v6306_v20 = vld [vmem:[#allocation11 + $0x14] sm:$0xf0]  ;;  %v5230_v43 = vor.u32 %v6332_v40, %v5227_v41 }
  0xbd   :  { %1678 = vmatpush.bf16.msra.mxu3 %v5286_v26  ;;  %v5114_v22 = vor.u32 %v6306_v20, %v5113_v18  ;;  %v5307_v20 = vld [vmem:[#allocation11 + $0x198] sm:$0xf0] }
  0xbe   :  { %1622 = vmatpush.bf16.msra.mxu0 %v5138_v9  ;;  %v5233_v9 = vld [vmem:[#allocation11 + $0x100] sm:$0xf] }
  0xbf   :  { %1641 = vmatpush.bf16.msra.mxu1 %v5266_v54  ;;  %v5234_v14 = vor.u32 %v6337_v11, %v5233_v9  ;;  %v5339_v54 = vld [vmem:[#allocation11 + $0x1d8] sm:$0xf0]  ;;  %v5338_v11 = vor.u32 %v6362_v8, %v5337_v7 }
  0xc0   :  { %1660 = vmatpush.bf16.msra.mxu2 %v5142_v33  ;;  %v5342_v57 = vor.u32 %v6360_v51, %v5339_v54  ;;  %v5305_v54 = vld [vmem:[#allocation11 + $0x188] sm:$0xf] }
  0xc1   :  { %1679 = vmatpush.bf16.msra.mxu3 %v5270_v36 }
  0xc2   :  { %1623 = vmatpush.bf16.msra.mxu0 %v5122_v15  ;;  %v5146_v15 = vor.u32 %v6314_v13, %v5145_v12  ;;  %v6320_v13 = vld [vmem:[#allocation11 + $0x8c] sm:$0xf] }
  0xc3   :  { %1642 = vmatpush.bf16.msra.mxu1 %v5250_v6  ;;  %v5326_v6 = vor.u32 %v6356_v63, %v5323_v3 }
  0xc4   :  { %1661 = vmatpush.bf16.msra.mxu2 %v5126_v45 }
  0xc5   :  { %1680 = vmatpush.bf16.msra.mxu3 %v5254_v5 }
  0xc6   :  { %1624 = vmatpush.bf16.msra.mxu0 %v5106_v32  ;;  %v586_v21 = vpop.f32.mrf.mxu0 }
  0xc7   :  { %1643 = vmatpush.bf16.msra.mxu1 %v5234_v14  ;;  %v600_v23 = vpop.f32.mrf.mxu1  ;;  %v5179_v14 = vld [vmem:[#allocation11 + $0x98] sm:$0xf0] }
  0xc8   :  { %1662 = vmatpush.bf16.msra.mxu2 %v5110_v59  ;;  %v6366_v59 = vld [vmem:[#allocation11 + $0x1f4] sm:$0xf0]  ;;  %v601_v9 = vadd.f32 %v600_v23, %v586_v21  ;;  %v5321_v23 = vld [vmem:[#allocation11 + $0x1a8] sm:$0xf] }
  0xc9   :  { %1625 = vmatmul.bf16.vlgmr.msra.gmra.mxu0 %v7059_v4  ;;  %1681 = vmatpush.bf16.msra.mxu3 %v5238_v62  ;;  %v5354_v60 = vor.u32 %v6366_v59, %v5353_v58  ;;  %v5195_v62 = vld [vmem:[#allocation11 + $0xb8] sm:$0xf0] }
  0xca   :  { %1693 = vmatpush.bf16.msrb.mxu0 %v5226_v35  ;;  %1644 = vmatmul.bf16.vlgmr.msra.gmra.mxu1 %v7061_v55 }
  0xcb   :  { %1663 = vmatmul.bf16.vlgmr.msra.gmra.mxu2 %v7059_v4  ;;  %1712 = vmatpush.bf16.msrb.mxu1 %v5354_v60 }
  0xcc   :  { %1682 = vmatmul.bf16.vlgmr.msra.gmra.mxu3 %v7061_v55  ;;  %1731 = vmatpush.bf16.msrb.mxu2 %v5230_v43  ;;  %v6316_v43 = vld [vmem:[#allocation11 + $0x6c] sm:$0xf] }
  0xce   :  { %1694 = vmatpush.bf16.msrb.mxu0 %v5210_v44  ;;  %v614_v24 = vpop.f32.mrf.mxu2  ;;  %v7090_v26 = vpop.f32.mrf.mxu0  ;;  %v5355_v44 = vld [vmem:[#allocation11 + $0x1f8] sm:$0xf0] }
  0xcf   :  { %v628_v25 = vpop.f32.mrf.mxu3  ;;  %v7093_v27 = vpop.f32.mrf.mxu1  ;;  %v5358_v45 = vor.u32 %v6364_v42, %v5355_v44  ;;  %1713 = vmatpush.bf16.msrb.mxu1 %v5338_v11  ;;  %v5163_v44 = vld [vmem:[#allocation11 + $0x78] sm:$0xf0] }
  0xd0   :  { %1732 = vmatpush.bf16.msrb.mxu2 %v5214_v53  ;;  %v5166_v48 = vor.u32 %v6316_v43, %v5163_v44  ;;  %v6304_v43 = vld [vmem:[#allocation11 + $0xc] sm:$0xf]  ;;  %v5115_v44 = vld [vmem:[#allocation11 + $0x18] sm:$0xf0] }
  0xd1   :  { %1750 = vmatpush.bf16.msrb.mxu3 %v5358_v45  ;;  %v6348_v45 = vld [vmem:[#allocation11 + $0x16c] sm:$0xf] }
  0xd2   :  { %1695 = vmatpush.bf16.msrb.mxu0 %v5194_v61  ;;  %v6324_v61 = vld [vmem:[#allocation11 + $0xac] sm:$0xf]  ;;  %v5294_v53 = vor.u32 %v6348_v45, %v5291_v50 }
  0xd3   :  { %v5198_v2 = vor.u32 %v6324_v61, %v5195_v62  ;;  %v6336_v45 = vld [vmem:[#allocation11 + $0x10c] sm:$0xf] }
  0xd5   :  { %1751 = vmatpush.bf16.msrb.mxu3 %v5342_v57  ;;  %1733 = vmatpush.bf16.msrb.mxu2 %v5198_v2  ;;  %v6344_v2 = vld [vmem:[#allocation11 + $0x14c] sm:$0xf] }
  0xd6   :  { %1696 = vmatpush.bf16.msrb.mxu0 %v5178_v1  ;;  %v7096_v28 = vpop.f32.mrf.mxu2 }
  0xd7   :  { %v7098_v29 = vpop.f32.mrf.mxu3 }
  0xd9   :  { %1630 = vmatmul.bf16.gmra.mxu0 %v7067_v46  ;;  %1752 = vmatpush.bf16.msrb.mxu3 %v5326_v6 }
  0xda   :  { %1697 = vmatpush.bf16.msrb.mxu0 %v5162_v10  ;;  %1649 = vmatmul.bf16.gmra.mxu1 %v7069_v49  ;;  %v629_v10 = vadd.f32 %v628_v25, %v614_v24  ;;  %v6358_v24 = vld [vmem:[#allocation11 + $0x1b4] sm:$0xf0]  ;;  %v689_v25 = vmul.f32 0.125, %v601_v9  ;;  %v5289_v9 = vld [vmem:[#allocation11 + $0x168] sm:$0xf] }
  0xdb   :  { %1668 = vmatmul.bf16.gmra.mxu2 %v7067_v46  ;;  %v5322_v41 = vor.u32 %v6358_v24, %v5321_v23  ;;  %v6346_v23 = vld [vmem:[#allocation11 + $0x154] sm:$0xf0] }
  0xdc   :  { %1687 = vmatmul.bf16.gmra.mxu3 %v7069_v49  ;;  %v690_v40 = vmul.f32 0.125, %v629_v10  ;;  %v6350_v10 = vld [vmem:[#allocation11 + $0x174] sm:$0xf0] }
  0xdd   :  { %1714 = vmatpush.bf16.msrb.mxu1 %v5322_v41 }
  0xde   :  { %1698 = vmatpush.bf16.msrb.mxu0 %v5146_v15  ;;  %v6352_v15 = vld [vmem:[#allocation11 + $0x18c] sm:$0xf]  ;;  %v7125_v60 = vpack.c.bf16 %v690_v40, %v689_v25 }
  0xdf   :  { %v5310_v21 = vor.u32 %v6352_v15, %v5307_v20 }
  0xe0   :  { %v1853_v15 = vunpack.c.l.b16 %v7125_v60 }
  0xe1   :  { %1753 = vmatpush.bf16.msrb.mxu3 %v5310_v21  ;;  %v5273_v21 = vld [vmem:[#allocation11 + $0x148] sm:$0xf] }
  0xe2   :  { %1699 = vmatpush.bf16.msrb.mxu0 %v5130_v19  ;;  %v5182_v19 = vor.u32 %v6320_v13, %v5179_v14  ;;  %v5290_v13 = vor.u32 %v6350_v10, %v5289_v9  ;;  %v1916_v14 = vunpack.c.h.b16 %v7125_v60  ;;  %v5274_v24 = vor.u32 %v6346_v23, %v5273_v21 }
  0xe4   :  { %1734 = vmatpush.bf16.msrb.mxu2 %v5182_v19  ;;  %v6340_v19 = vld [vmem:[#allocation11 + $0x12c] sm:$0xf]  ;;  %v1917_v41 = vpack.c.b16 %v1916_v14, %v1916_v14 }
  0xe5   :  { %1754 = vmatpush.bf16.msrb.mxu3 %v5294_v53 }
  0xe6   :  { %1700 = vmatpush.bf16.msrb.mxu0 %v5114_v22  ;;  %v7100_v30 = vpop.f32.mrf.mxu0 }
  0xe7   :  { %v7102_v31 = vpop.f32.mrf.mxu1 }
  0xe8   :  { %v657_v57 = vadd.f32 %v7102_v31, %v7100_v30  ;;  %1735 = vmatpush.bf16.msrb.mxu2 %v5166_v48  ;;  %v5275_v30 = vld [vmem:[#allocation11 + $0x158] sm:$0xf0] }
  0xe9   :  { %1701 = vmatmul.bf16.vlgmr.msrb.gmra.mxu0 %v7059_v4  ;;  %v5278_v8 = vor.u32 %v6344_v2, %v5275_v30 }
  0xea   :  { %v691_v11 = vmul.f32 0.125, %v657_v57  ;;  %v5257_v57 = vld [vmem:[#allocation11 + $0x128] sm:$0xf] }
  0xeb   :  { %1755 = vmatpush.bf16.msrb.mxu3 %v5278_v8 }
  0xee   :  { %v7105_v32 = vpop.f32.mrf.mxu2  ;;  %v7109_v34 = vpop.f32.mrf.mxu0 }
  0xef   :  { %v7107_v33 = vpop.f32.mrf.mxu3  ;;  %v7111_v35 = vpop.f32.mrf.mxu1 }
  0xf0   :  { %v685_v58 = vadd.f32 %v7107_v33, %v7105_v32 }
  0xf6   :  { %v7113_v36 = vpop.f32.mrf.mxu2 }
  0xf7   :  { %v7115_v37 = vpop.f32.mrf.mxu3 }
  0xf9   :  { %1706 = vmatmul.bf16.gmra.mxu0 %v7067_v46 }
 0x106   :  { %v1090_v38 = vpop.f32.mrf.mxu0 }
 0x107   :  { %v1109_v39 = vpop.f32.mrf.mxu1 }
 0x108   :  { %v1110_v0 = vadd.f32 %v1109_v39, %v1090_v38 }
 0x10e   :  { %v1128_v47 = vpop.f32.mrf.mxu2  ;;  %v1092_v5 = vpop.f32.mrf.mxu0 }
 0x10f   :  { %v1147_v52 = vpop.f32.mrf.mxu3  ;;  %v1111_v56 = vpop.f32.mrf.mxu1 }
 0x110   :  { %v1148_v1 = vadd.f32 %v1147_v52, %v1128_v47  ;;  %v1112_v22 = vadd.f32 %v1111_v56, %v1092_v5  ;;  %v6354_v56 = vld [vmem:[#allocation11 + $0x194] sm:$0xf0] }
 0x111   :  { %v5306_v59 = vor.u32 %v6354_v56, %v5305_v54 }
 0x112   :  { %v1773_v16 = vpack.c.bf16 %v1148_v1, %v1110_v0  ;;  %v6312_v0 = vld [vmem:[#allocation11 + $0x4c] sm:$0xf]  ;;  %v5147_v1 = vld [vmem:[#allocation11 + $0x58] sm:$0xf0] }
 0x113   :  { %1715 = vmatpush.bf16.msrb.mxu1 %v5306_v59  ;;  %v5150_v7 = vor.u32 %v6312_v0, %v5147_v1  ;;  %v6338_v0 = vld [vmem:[#allocation11 + $0x114] sm:$0xf0] }
 0x114   :  { %v1918_v47 = vunpack.c.h.b16 %v1773_v16  ;;  %v1791_v52 = vunpack.c.l.b16 %v1773_v16  ;;  %v6308_v16 = vld [vmem:[#allocation11 + $0x2c] sm:$0xf] }
 0x115   :  { %1736 = vmatpush.bf16.msrb.mxu2 %v5150_v7 }
 0x116   :  { %v1130_v12 = vpop.f32.mrf.mxu2  ;;  %v7117_v18 = vpop.f32.mrf.mxu0 }
 0x117   :  { %v1149_v17 = vpop.f32.mrf.mxu3  ;;  %v7119_v39 = vpop.f32.mrf.mxu1  ;;  %1716 = vmatpush.bf16.msrb.mxu1 %v5290_v13 }
 0x118   :  { %v1150_v38 = vadd.f32 %v1149_v17, %v1130_v12  ;;  %v692_v12 = vmul.f32 0.125, %v685_v58  ;;  %v5131_v17 = vld [vmem:[#allocation11 + $0x38] sm:$0xf0]  ;;  %v6342_v58 = vld [vmem:[#allocation11 + $0x134] sm:$0xf0] }
 0x119   :  { %v5134_v20 = vor.u32 %v6308_v16, %v5131_v17 }
 0x11a   :  { %v1775_v42 = vpack.c.bf16 %v1150_v38, %v1112_v22  ;;  %v5259_v22 = vld [vmem:[#allocation11 + $0x138] sm:$0xf0]  ;;  %v7133_v25 = vpack.c.bf16 %v692_v12, %v691_v11 }
 0x11b   :  { %v5262_v38 = vor.u32 %v6340_v19, %v5259_v22  ;;  %1737 = vmatpush.bf16.msrb.mxu2 %v5134_v20  ;;  %1717 = vmatpush.bf16.msrb.mxu1 %v5274_v24 }
 0x11c   :  { %v1919_v51 = vunpack.c.h.b16 %v1775_v42  ;;  %v1792_v5 = vunpack.c.l.b16 %v1775_v42  ;;  %v1854_v42 = vpack.c.b16 %v1853_v15, %v1853_v15 }
 0x11d   :  { %1756 = vmatpush.bf16.msrb.mxu3 %v5262_v38 }
 0x11e   :  { %v1133_v61 = vpop.f32.mrf.mxu2  ;;  %v1920_v62 = vpack.c.b16 %v1919_v51, %v1918_v47  ;;  %v1793_v63 = vpack.c.b16 %v1792_v5, %v1791_v52  ;;  %v1097_v6 = vpop.f32.mrf.mxu0  ;;  %v1115_v47 = vadd.f32 %v7119_v39, %v7117_v18  ;;  %v5118_v51 = vor.u32 %v6304_v43, %v5115_v44  ;;  %v5243_v52 = vld [vmem:[#allocation11 + $0x118] sm:$0xf0] }
 0x11f   :  { %v1152_v3 = vpop.f32.mrf.mxu3  ;;  %v1116_v33 = vpop.f32.mrf.mxu1  ;;  %v5246_v56 = vor.u32 %v6336_v45, %v5243_v52  ;;  %v5258_v18 = vor.u32 %v6342_v58, %v5257_v57  ;;  %v2157_v39 = vunpack.c.h.b16 %v7133_v25 }
 0x120   :  { %1976 = vrot.lane.b32.xlu1 %v1920_v62, %s6944_s8  ;;  %1857 = vrot.lane.b32.xlu0 %v1793_v63, %s6944_s8  ;;  %v1799_v31 = vsel %vm1794_vm0, %v1793_v63, 0  ;;  %v1925_v32 = vsel %vm1794_vm0, %v1920_v62, 0  ;;  %v1153_v48 = vadd.f32 %v1152_v3, %v1133_v61  ;;  %v1117_v5 = vadd.f32 %v1116_v33, %v1097_v6  ;;  %v5241_v63 = vld [vmem:[#allocation11 + $0x108] sm:$0xf] }
 0x121   :  { %1808 = vmatpush.bf16.xpose.msra.mxu0 %v1799_v31  ;;  %1738 = vmatpush.bf16.msrb.mxu2 %v5118_v51  ;;  %v5242_v1 = vor.u32 %v6338_v0, %v5241_v63  ;;  %v659_v3 = vadd.f32 %v7111_v35, %v7109_v34  ;;  %v687_v6 = vadd.f32 %v7115_v37, %v7113_v36 }
 0x122   :  { %1757 = vmatpush.bf16.msrb.mxu3 %v5246_v56  ;;  %1718 = vmatpush.bf16.msrb.mxu1 %v5258_v18  ;;  %v7142_v61 = vpack.c.bf16 %v1153_v48, %v1115_v47  ;;  %v603_v36 = vadd.f32 %v7093_v27, %v7090_v26  ;;  %v631_v37 = vadd.f32 %v7098_v29, %v7096_v28  ;;  %v2095_v48 = vunpack.c.l.b16 %v7133_v25 }
 0x123   :  { %v695_v9 = vmul.f32 0.125, %v659_v3  ;;  %v696_v34 = vmul.f32 0.125, %v687_v6 }
 0x124   :  { %1739 = vmatmul.bf16.vlgmr.msrb.gmra.mxu2 %v7059_v4  ;;  %v2400_v30 = vunpack.c.h.b16 %v7142_v61  ;;  %v694_v19 = vmul.f32 0.125, %v631_v37  ;;  %v2277_v44 = vunpack.c.l.b16 %v7142_v61  ;;  %v2096_v57 = vpack.c.b16 %v2095_v48, %v2095_v48 }
 0x125   :  { %1758 = vmatmul.bf16.vlgmr.msrb.gmra.mxu3 %v7061_v55  ;;  %v7165_v13 = vpack.c.bf16 %v696_v34, %v695_v9 }
 0x126   :  { %v1135_v40 = vpop.f32.mrf.mxu2  ;;  %v1166_v54 = vpop.f32.mrf.mxu0  ;;  %1719 = vmatpush.bf16.msrb.mxu1 %v5242_v1 }
 0x127   :  { %v1154_v50 = vpop.f32.mrf.mxu3  ;;  %v1185_v59 = vpop.f32.mrf.mxu1  ;;  %v2577_v28 = vunpack.c.l.b16 %v7165_v13  ;;  %v2639_v1 = vunpack.c.h.b16 %v7165_v13 }
 0x128   :  { %v1155_v53 = vadd.f32 %v1154_v50, %v1135_v40  ;;  %1974 = vrot.lane.b32.xlu1 %v1917_v41, %s6944_s8  ;;  %1855 = vrot.lane.b32.xlu0 %v1854_v42, %s6944_s8  ;;  %v1186_v33 = vadd.f32 %v1185_v59, %v1166_v54 }
 0x129   :  { %1934 = vmatpush.bf16.xpose.msrb.mxu0 %v1925_v32  ;;  %1720 = vmatmul.bf16.vlgmr.msrb.gmra.mxu1 %v7061_v55  ;;  %v693_v55 = vmul.f32 0.125, %v603_v36  ;;  %v2640_v6 = vpack.c.b16 %v2639_v1, %v2639_v1 }
 0x12a   :  { %5359 = vmatmul.msk.bf16.vlgmr.msra.gmra.mxu0 %vm1794_vm0, %v7125_v60  ;;  %v7144_v62 = vpack.c.bf16 %v1155_v53, %v1117_v5  ;;  %v7148_v60 = vpack.c.b16 %v2157_v39, %v2157_v39 }
 0x12b   :  { %v7173_v38 = vpack.c.bf16 %v694_v19, %v693_v55 }
 0x12c   :  { %v2401_v4 = vunpack.c.h.b16 %v7144_v62 }
 0x12d   :  { %v2336_v50 = vunpack.c.l.b16 %v7173_v38  ;;  %v2398_v0 = vunpack.c.h.b16 %v7173_v38 }
 0x12e   :  { %v1204_v2 = vpop.f32.mrf.mxu2  ;;  %v1168_v31 = vpop.f32.mrf.mxu0  ;;  %v7159_v35 = vpack.c.b16 %v2401_v4, %v2400_v30 }
 0x12f   :  { %v1223_v7 = vpop.f32.mrf.mxu3  ;;  %v1187_v32 = vpop.f32.mrf.mxu1  ;;  %v2337_v58 = vpack.c.b16 %v2336_v50, %v2336_v50  ;;  %v2399_v3 = vpack.c.b16 %v2398_v0, %v2398_v0 }
 0x130   :  { %2215 = vrot.lane.b32.xlu1 %v7148_v60, %s6944_s8  ;;  %v1224_v8 = vadd.f32 %v1223_v7, %v1204_v2  ;;  %v1188_v11 = vadd.f32 %v1187_v32, %v1168_v31  ;;  %v2407_v7 = vsel %vm1794_vm0, %v7159_v35, 0 }
 0x132   :  { %v1774_v10 = vpack.c.bf16 %v1224_v8, %v1186_v33 }
 0x134   :  { %v2159_v26 = vunpack.c.h.b16 %v1774_v10  ;;  %v2036_v20 = vunpack.c.l.b16 %v1774_v10  ;;  %1744 = vmatmul.bf16.gmra.mxu2 %v7067_v46  ;;  %v2278_v46 = vunpack.c.l.b16 %v7144_v62 }
 0x135   :  { %1763 = vmatmul.bf16.gmra.mxu3 %v7069_v49 }
 0x136   :  { %v1206_v12 = vpop.f32.mrf.mxu2  ;;  %v1171_v16 = vpop.f32.mrf.mxu0  ;;  %v2279_v5 = vpack.c.b16 %v2278_v46, %v2277_v44 }
 0x137   :  { %v1225_v14 = vpop.f32.mrf.mxu3  ;;  %v1190_v17 = vpop.f32.mrf.mxu1 }
 0x138   :  { %v1226_v15 = vadd.f32 %v1225_v14, %v1206_v12  ;;  %2458 = vrot.lane.b32.xlu1 %v7159_v35, %s6944_s8  ;;  %v1191_v45 = vadd.f32 %v1190_v17, %v1171_v16  ;;  %v2284_v18 = vsel %vm1794_vm0, %v2279_v5, 0 }
 0x139   :  { %1725 = vmatmul.bf16.gmra.mxu1 %v7069_v49 }
 0x13a   :  { %5363 = vmatmul.msk.bf16.vlgmr.msrb.gmra.mxu0 %vm1794_vm0, %v1917_v41  ;;  %v1776_v27 = vpack.c.bf16 %v1226_v15, %v1188_v11  ;;  %v2578_v41 = vpack.c.b16 %v2577_v28, %v2577_v28 }
 0x13c   :  { %v2160_v29 = vunpack.c.h.b16 %v1776_v27  ;;  %v2037_v22 = vunpack.c.l.b16 %v1776_v27 }
 0x13e   :  { %v1209_v21 = vpop.f32.mrf.mxu2  ;;  %v2161_v23 = vpack.c.b16 %v2160_v29, %v2159_v26  ;;  %v2038_v24 = vpack.c.b16 %v2037_v22, %v2036_v20  ;;  %v1173_v51 = vpop.f32.mrf.mxu0 }
 0x13f   :  { %v1228_v40 = vpop.f32.mrf.mxu3  ;;  %v1192_v52 = vpop.f32.mrf.mxu1 }
 0x140   :  { %2217 = vrot.lane.b32.xlu0 %v2161_v23, %s6944_s8  ;;  %2099 = vrot.lane.b32.xlu2 %v2038_v24, %s6944_s8  ;;  %v2043_v42 = vsel %vm1794_vm0, %v2038_v24, 0  ;;  %v2166_v43 = vsel %vm1794_vm0, %v2161_v23, 0  ;;  %v1229_v47 = vadd.f32 %v1228_v40, %v1209_v21  ;;  %v1193_v54 = vadd.f32 %v1192_v52, %v1173_v51 }
 0x141   :  { %2579 = vrot.lane.b32.xlu1 %v2578_v41, %s6944_s8  ;;  %2052 = vmatpush.bf16.xpose.msra.mxu0 %v2043_v42 }
 0x142   :  { %v1778_v53 = vpack.c.bf16 %v1229_v47, %v1191_v45 }
 0x144   :  { %v2518_v49 = vunpack.c.l.b16 %v1778_v53 }
 0x146   :  { %v1211_v56 = vpop.f32.mrf.mxu2  ;;  %v1626_v2 = vpop.f32.mrf.mxu0 }
 0x147   :  { %v1230_v59 = vpop.f32.mrf.mxu3  ;;  %v1645_v32 = vpop.f32.mrf.mxu1 }
 0x148   :  { %v1231_v39 = vadd.f32 %v1230_v59, %v1211_v56  ;;  %2097 = vrot.lane.b32.xlu2 %v2096_v57, %s6944_s8  ;;  %2338 = vrot.lane.b32.xlu0 %v2337_v58, %s6944_s8  ;;  %v1646_v9 = vadd.f32 %v1645_v32, %v1626_v2 }
 0x149   :  { %2175 = vmatpush.bf16.xpose.msrb.mxu0 %v2166_v43 }
 0x14a   :  { %5367 = vmatmul.msk.bf16.vlgmr.msra.gmra.mxu0 %vm1794_vm0, %v7133_v25  ;;  %v1780_v61 = vpack.c.bf16 %v1231_v39, %v1193_v54  ;;  %v2641_v25 = vunpack.c.h.b16 %v1778_v53 }
 0x14c   :  { %v2519_v62 = vunpack.c.l.b16 %v1780_v61  ;;  %v2642_v30 = vunpack.c.h.b16 %v1780_v61 }
 0x14e   :  { %v2520_v63 = vpack.c.b16 %v2519_v62, %v2518_v49  ;;  %v1664_v4 = vpop.f32.mrf.mxu2  ;;  %v2643_v33 = vpack.c.b16 %v2642_v30, %v2641_v25  ;;  %v1628_v8 = vpop.f32.mrf.mxu0 }
 0x14f   :  { %v1683_v31 = vpop.f32.mrf.mxu3  ;;  %v1647_v11 = vpop.f32.mrf.mxu1 }
 0x150   :  { %2340 = vrot.lane.b32.xlu2 %v2279_v5, %s6944_s8  ;;  %2581 = vrot.lane.b32.xlu0 %v2520_v63, %s6944_s8  ;;  %v1684_v34 = vadd.f32 %v1683_v31, %v1664_v4  ;;  %v1648_v12 = vadd.f32 %v1647_v11, %v1628_v8  ;;  %v2525_v15 = vsel %vm1794_vm0, %v2520_v63, 0  ;;  %v2648_v26 = vsel %vm1794_vm0, %v2643_v33, 0 }
 0x151   :  { %2293 = vmatpush.bf16.xpose.msra.mxu0 %v2284_v18 }
 0x152   :  { %v1781_v37 = vpack.c.bf16 %v1684_v34, %v1646_v9 }
 0x154   :  { %v1952_v14 = vunpack.c.h.b16 %v1781_v37  ;;  %v1829_v23 = vunpack.c.l.b16 %v1781_v37 }
 0x156   :  { %v1666_v35 = vpop.f32.mrf.mxu2  ;;  %v7204_v55 = vpop.f32.mrf.mxu0 }
 0x157   :  { %v1685_v36 = vpop.f32.mrf.mxu3  ;;  %v7222_v44 = vpop.f32.mrf.mxu1 }
 0x158   :  { %2456 = vrot.lane.b32.xlu2 %v2399_v3, %s6944_s8  ;;  %2697 = vrot.lane.b32.xlu0 %v2640_v6, %s6944_s8  ;;  %v1686_v10 = vadd.f32 %v1685_v36, %v1666_v35 }
 0x15a   :  { %5371 = vmatmul.msk.bf16.vlgmr.msrb.gmra.mxu0 %vm1794_vm0, %v7148_v60  ;;  %v1783_v60 = vpack.c.bf16 %v1686_v10, %v1648_v12 }
 0x15b   :  { %2416 = vmatpush.bf16.xpose.msrb.mxu0 %v2407_v7 }
 0x15c   :  { %v1953_v16 = vunpack.c.h.b16 %v1783_v60  ;;  %v1830_v24 = vunpack.c.l.b16 %v1783_v60 }
 0x15e   :  { %v1954_v17 = vpack.c.b16 %v1953_v16, %v1952_v14  ;;  %v7207_v19 = vpop.f32.mrf.mxu0  ;;  %v1831_v43 = vpack.c.b16 %v1830_v24, %v1829_v23  ;;  %v7224_v46 = vpop.f32.mrf.mxu2 }
 0x15f   :  { %v7227_v45 = vpop.f32.mrf.mxu3  ;;  %v7233_v50 = vpop.f32.mrf.mxu1 }
 0x160   :  { %2699 = vrot.lane.b32.xlu2 %v2643_v33, %s6944_s8  ;;  %2009 = vrot.lane.b32.xlu0 %v1954_v17, %s6944_s8 }
 0x161   :  { %1843 = vmatpush.bf16.msra.mxu1 %v1831_v43  ;;  %1890 = vrot.lane.b32.xlu1 %v1831_v43, %s6944_s8 }
 0x165   :  { %1966 = vmatpush.bf16.msrb.mxu1 %v1954_v17 }
 0x166   :  { %v7211_v27 = vpop.f32.mrf.mxu0  ;;  %v7235_v51 = vpop.f32.mrf.mxu2 }
 0x167   :  { %v7237_v52 = vpop.f32.mrf.mxu3 }
 0x16a   :  { %5375 = vmatmul.msk.bf16.vlgmr.msra.gmra.mxu0 %vm1794_vm0, %v7173_v38 }
 0x16b   :  { %2534 = vmatpush.bf16.xpose.msra.mxu0 %v2525_v15 }
 0x16e   :  { %v7213_v20 = vpop.f32.mrf.mxu0 }
 0x176   :  { %v1707_v28 = vpop.f32.mrf.mxu0 }
 0x17a   :  { %5379 = vmatmul.msk.bf16.vlgmr.msrb.gmra.mxu0 %vm1794_vm0, %v2399_v3 }
 0x17b   :  { %2657 = vmatpush.bf16.xpose.msrb.mxu0 %v2648_v26 }
 0x18a   :  { %5383 = vmatmul.msk.bf16.vlgmr.msra.gmra.mxu0 %vm1794_vm0, %v7165_v13  ;;  %v1709_v13 = vpop.f32.mrf.mxu0 }
 0x192   :  { %v1977_v29 = vpop.permute.xlu1 %1976  ;;  %v1858_v22 = vpop.permute.xlu0 %1857 }
 0x193   :  { %v1982_v38 = vsel %vm1794_vm0, %v1977_v29, 0  ;;  %v1863_v21 = vsel %vm1794_vm0, %v1858_v22, 0 }
 0x194   :  { %1872 = vmatpush.bf16.xpose.msra.mxu2 %v1863_v21 }
 0x19a   :  { %5387 = vmatmul.msk.bf16.vlgmr.msrb.gmra.mxu0 %vm1794_vm0, %v2640_v6  ;;  %v1856_v40 = vpop.permute.xlu0 %1855  ;;  %v2100_v41 = vpop.permute.xlu2 %2099 }
 0x19b   :  { %5361 = vmatmul.msk.bf16.vlgmr.msra.gmra.mxu2 %vm1794_vm0, %v1856_v40  ;;  %v2105_v42 = vsel %vm1794_vm0, %v2100_v41, 0  ;;  %v1975_v5 = vpop.permute.xlu1 %1974 }
 0x19c   :  { %1991 = vmatpush.bf16.xpose.msrb.mxu2 %v1982_v38 }
 0x1a2   :  { %v2098_v53 = vpop.permute.xlu2 %2097 }
 0x1a3   :  { %v2216_v2 = vpop.permute.xlu1 %2215 }
 0x1a4   :  { %2114 = vmatpush.bf16.xpose.msra.mxu2 %v2105_v42 }
 0x1a6   :  { %v7240_v56 = vpop.f32.mrf.mxu1 }
 0x1a7   :  { %v7229_v47 = vpop.f32.mrf.mxu0  ;;  %v7242_v57 = vpop.f32.mrf.mxu2 }
 0x1a8   :  { %v1815_v48 = vsel %vm1814_vm1, %v7229_v47, -inf  ;;  %v7244_v58 = vpop.f32.mrf.mxu3 }
 0x1a9   :  { %1816 = vmax.xlane.f32.xlu2 %v1815_v48 }
 0x1aa   :  { %v2341_v63 = vpop.permute.xlu2 %2340 }
 0x1ab   :  { %5365 = vmatmul.msk.bf16.vlgmr.msrb.gmra.mxu2 %vm1794_vm0, %v1975_v5  ;;  %v2346_v1 = vsel %vm1794_vm0, %v2341_v63, 0  ;;  %v2459_v33 = vpop.permute.xlu1 %2458 }
 0x1ac   :  { %v2464_v36 = vsel %vm1794_vm0, %v2459_v33, 0 }
 0x1ae   :  { %v7251_v61 = vpop.f32.mrf.mxu1 }
 0x1af   :  { %v1812_v54 = vpop.f32.mrf.mxu0  ;;  %v7253_v62 = vpop.f32.mrf.mxu2 }
 0x1b0   :  { %v7255_v0 = vpop.f32.mrf.mxu3 }
 0x1b2   :  { %v2218_v59 = vpop.permute.xlu0 %2217  ;;  %v2457_v22 = vpop.permute.xlu2 %2456 }
 0x1b3   :  { %v2223_v18 = vsel %vm1794_vm0, %v2218_v59, 0  ;;  %v2580_v42 = vpop.permute.xlu1 %2579 }
 0x1b4   :  { %2232 = vmatpush.bf16.xpose.msrb.mxu2 %v2223_v18 }
 0x1b6   :  { %v1726_v6 = vpop.f32.mrf.mxu1 }
 0x1b7   :  { %v7247_v39 = vpop.f32.mrf.mxu0  ;;  %v1745_v7 = vpop.f32.mrf.mxu2  ;;  %v1727_v8 = vadd.f32 %v1726_v6, %v1707_v28 }
 0x1b8   :  { %v1940_v49 = vsel %vm1814_vm1, %v7247_v39, -inf  ;;  %v1764_v25 = vpop.f32.mrf.mxu3 }
 0x1b9   :  { %1941 = vmax.xlane.f32.xlu0 %v1940_v49  ;;  %v1765_v9 = vadd.f32 %v1764_v25, %v1745_v7 }
 0x1ba   :  { %v2339_v15 = vpop.permute.xlu0 %2338  ;;  %v2700_v23 = vpop.permute.xlu2 %2699 }
 0x1bb   :  { %5369 = vmatmul.msk.bf16.vlgmr.msra.gmra.mxu2 %vm1794_vm0, %v2098_v53  ;;  %v7264_v10 = vpack.c.bf16 %v1765_v9, %v1727_v8  ;;  %v2705_v24 = vsel %vm1794_vm0, %v2700_v23, 0 }
 0x1bc   :  { %2355 = vmatpush.bf16.xpose.msra.mxu2 %v2346_v1 }
 0x1bd   :  { %v2675_v12 = vunpack.c.h.b16 %v7264_v10 }
 0x1be   :  { %v1728_v31 = vpop.f32.mrf.mxu1 }
 0x1bf   :  { %v1938_v3 = vpop.f32.mrf.mxu0  ;;  %v1747_v32 = vpop.f32.mrf.mxu2  ;;  %v1729_v34 = vadd.f32 %v1728_v31, %v1709_v13 }
 0x1c0   :  { %v1766_v35 = vpop.f32.mrf.mxu3 }
 0x1c1   :  { %v1767_v37 = vadd.f32 %v1766_v35, %v1747_v32 }
 0x1c2   :  { %v2582_v28 = vpop.permute.xlu0 %2581 }
 0x1c3   :  { %v7267_v11 = vpack.c.bf16 %v1767_v37, %v1729_v34  ;;  %v2587_v29 = vsel %vm1794_vm0, %v2582_v28, 0 }
 0x1c5   :  { %v2676_v14 = vunpack.c.h.b16 %v7267_v11 }
 0x1c7   :  { %v7259_v30 = vpop.f32.mrf.mxu0  ;;  %v7271_v16 = vpack.c.b16 %v2676_v14, %v2675_v12 }
 0x1c8   :  { %v2058_v4 = vsel %vm1814_vm1, %v7259_v30, -inf }
 0x1c9   :  { %2059 = vmax.xlane.f32.xlu2 %v2058_v4 }
 0x1ca   :  { %v2698_v48 = vpop.permute.xlu0 %2697 }
 0x1cb   :  { %5373 = vmatmul.msk.bf16.vlgmr.msrb.gmra.mxu2 %vm1794_vm0, %v2216_v2 }
 0x1cc   :  { %2473 = vmatpush.bf16.xpose.msrb.mxu2 %v2464_v36 }
 0x1cf   :  { %v2056_v60 = vpop.f32.mrf.mxu0 }
 0x1d2   :  { %v2010_v54 = vpop.permute.xlu0 %2009 }
 0x1d3   :  { %v1891_v53 = vpop.permute.xlu1 %1890 }
 0x1d4   :  { %1903 = vmatpush.bf16.msra.mxu3 %v1891_v53 }
 0x1d7   :  { %v7273_v17 = vpop.f32.mrf.mxu0 }
 0x1d8   :  { %v2181_v26 = vsel %vm1814_vm1, %v7273_v17, -inf  ;;  %2022 = vmatpush.bf16.msrb.mxu3 %v2010_v54 }
 0x1d9   :  { %2182 = vmax.xlane.f32.xlu2 %v2181_v26 }
 0x1db   :  { %5377 = vmatmul.msk.bf16.vlgmr.msra.gmra.mxu2 %vm1794_vm0, %v2339_v15 }
 0x1dc   :  { %2596 = vmatpush.bf16.xpose.msra.mxu2 %v2587_v29 }
 0x1df   :  { %v2179_v38 = vpop.f32.mrf.mxu0 }
 0x1e7   :  { %v7279_v21 = vpop.f32.mrf.mxu0 }
 0x1eb   :  { %5381 = vmatmul.msk.bf16.vlgmr.msrb.gmra.mxu2 %vm1794_vm0, %v2457_v22 }
 0x1ec   :  { %2714 = vmatpush.bf16.xpose.msrb.mxu2 %v2705_v24 }
 0x1ef   :  { %v2297_v40 = vpop.f32.mrf.mxu0 }
 0x1f7   :  { %v7283_v41 = vpop.f32.mrf.mxu0 }
 0x1fb   :  { %5385 = vmatmul.msk.bf16.vlgmr.msra.gmra.mxu2 %vm1794_vm0, %v2580_v42 }
 0x1ff   :  { %v2420_v13 = vpop.f32.mrf.mxu0 }
 0x207   :  { %v7286_v43 = vpop.f32.mrf.mxu0 }
 0x20b   :  { %5389 = vmatmul.msk.bf16.vlgmr.msrb.gmra.mxu2 %vm1794_vm0, %v2698_v48 }
 0x20f   :  { %v2538_v5 = vpop.f32.mrf.mxu0 }
 0x217   :  { %v7289_v59 = vpop.f32.mrf.mxu0 }
 0x21c   :  { %v1817_v29 = vpop.xlane.xlu2 %1816 }
 0x21d   :  { %v1818_v42 = vsub.f32 %v7229_v47, %v1817_v29  ;;  %v1689_v29 = vadd.f32 %v7227_v45, %v7224_v46 }
 0x21e   :  { %v1874_v49 = vpop.f32.mrf.mxu2 }
 0x21f   :  { %v2661_v18 = vpop.f32.mrf.mxu0  ;;  %v1878_v63 = vsel %vm1814_vm1, %v1874_v49, -inf  ;;  %v1819_v5 = vmul.f32 1.442695, %v1818_v42 }
 0x220   :  { %1879 = vmax.xlane.f32.xlu1 %v1878_v63 }
 0x226   :  { %v1876_v1 = vpop.f32.mrf.mxu2 }
 0x22c   :  { %v1942_v4 = vpop.xlane.xlu0 %1941 }
 0x22d   :  { %v1943_v31 = vsub.f32 %v7247_v39, %v1942_v4  ;;  %v2299_v4 = vsel %vm1814_vm1, %v7279_v21, -inf }
 0x22e   :  { %v1993_v2 = vpop.f32.mrf.mxu2 }
 0x22f   :  { %v1997_v3 = vsel %vm1814_vm1, %v1993_v2, -inf  ;;  %v1944_v33 = vmul.f32 1.442695, %v1943_v31 }
 0x230   :  { %1998 = vmax.xlane.f32.xlu2 %v1997_v3 }
 0x231   :  { %6579 = vpow2.f32 %v1944_v33  ;;  %v1760_v33 = vadd.f32 %v7244_v58, %v7242_v57 }
 0x236   :  { %v1995_v6 = vpop.f32.mrf.mxu2 }
 0x237   :  { %v7299_v34 = vpop.eup %6579 }
 0x238   :  { %v1946_v36 = vsel %vm1814_vm1, %v7299_v34, 0.0 }
 0x23c   :  { %v2060_v23 = vpop.xlane.xlu2 %2059 }
 0x23e   :  { %v2116_v7 = vpop.f32.mrf.mxu2 }
 0x23f   :  { %v2120_v25 = vsel %vm1814_vm1, %v2116_v7, -inf }
 0x240   :  { %2121 = vmax.xlane.f32.xlu0 %v2120_v25 }
 0x246   :  { %v2118_v32 = vpop.f32.mrf.mxu2 }
 0x24c   :  { %v2183_v53 = vpop.xlane.xlu2 %2182 }
 0x24e   :  { %v7295_v8 = vpop.f32.mrf.mxu2 }
 0x24f   :  { %v2238_v9 = vsel %vm1814_vm1, %v7295_v8, -inf }
 0x250   :  { %2239 = vmax.xlane.f32.xlu1 %v2238_v9  ;;  %v1724_v9 = vadd.f32 %v7251_v61, %v7213_v20 }
 0x256   :  { %v2236_v35 = vpop.f32.mrf.mxu2 }
 0x257   :  { %v1762_v35 = vadd.f32 %v7255_v0, %v7253_v62 }
 0x258   :  { %1947 = vadd.xlane.f32.xlu1 %v1946_v36  ;;  %v2061_v36 = vsub.f32 %v7259_v30, %v2060_v23  ;;  %v1651_v30 = vadd.f32 %v7222_v44, %v7204_v55  ;;  %v1691_v23 = vadd.f32 %v7237_v52, %v7235_v51  ;;  %v2184_v44 = vsub.f32 %v7273_v17, %v2183_v53 }
 0x259   :  { %v2422_v51 = vsel %vm1814_vm1, %v7283_v41, -inf }
 0x25a   :  { %v2185_v45 = vmul.f32 1.442695, %v2184_v44 }
 0x25e   :  { %v7303_v37 = vpop.f32.mrf.mxu2 }
 0x25f   :  { %v2361_v39 = vsel %vm1814_vm1, %v7303_v37, -inf }
 0x260   :  { %2362 = vmax.xlane.f32.xlu2 %v2361_v39 }
 0x266   :  { %v2359_v12 = vpop.f32.mrf.mxu2 }
 0x26e   :  { %v7307_v14 = vpop.f32.mrf.mxu2 }
 0x26f   :  { %v2479_v15 = vsel %vm1814_vm1, %v7307_v14, -inf }
 0x270   :  { %2480 = vmax.xlane.f32.xlu2 %v2479_v15  ;;  %v1784_v15 = vpack.c.bf16 %v1762_v35, %v1724_v9 }
 0x272   :  { %v2194_v57 = vunpack.c.h.b16 %v1784_v15 }
 0x276   :  { %v2477_v60 = vpop.f32.mrf.mxu2 }
 0x277   :  { %v2062_v60 = vmul.f32 1.442695, %v2061_v36  ;;  %v2554_v36 = vunpack.c.l.b16 %v7264_v10 }
 0x27e   :  { %v7311_v26 = vpop.f32.mrf.mxu2 }
 0x27f   :  { %v2602_v46 = vsel %vm1814_vm1, %v7311_v26, -inf }
 0x286   :  { %v2600_v28 = vpop.f32.mrf.mxu2 }
 0x28e   :  { %v7313_v22 = vpop.f32.mrf.mxu2 }
 0x28f   :  { %v2720_v38 = vsel %vm1814_vm1, %v7313_v22, -inf }
 0x290   :  { %2721 = vmax.xlane.f32.xlu1 %v2720_v38  ;;  %v1653_v38 = vadd.f32 %v7233_v50, %v7207_v19 }
 0x293   :  { %v1880_v24 = vpop.xlane.xlu1 %1879 }
 0x294   :  { %v1881_v40 = vsub.f32 %v1874_v49, %v1880_v24  ;;  %v1785_v24 = vpack.c.bf16 %v1689_v29, %v1651_v30 }
 0x296   :  { %v1882_v13 = vmul.f32 1.442695, %v1881_v40  ;;  %v2718_v48 = vpop.f32.mrf.mxu2  ;;  %v1787_v40 = vpack.c.bf16 %v1691_v23, %v1653_v38  ;;  %v2434_v42 = vunpack.c.h.b16 %v1785_v24 }
 0x298   :  { %6581 = vpow2.f32 %v1882_v13  ;;  %v2435_v13 = vunpack.c.h.b16 %v1787_v40 }
 0x299   :  { %6583 = vpow2.f32 %v1819_v5 }
 0x29e   :  { %v7318_v54 = vpop.eup %6581 }
 0x29f   :  { %v1884_v18 = vsel %vm1814_vm1, %v7318_v54, 0.0  ;;  %v7322_v1 = vpop.eup %6583 }
 0x2a0   :  { %1885 = vadd.xlane.f32.xlu2 %v1884_v18  ;;  %v1821_v47 = vsel %vm1814_vm1, %v7322_v1, 0.0  ;;  %v7366_v18 = vpack.c.b16 %v2435_v13, %v2434_v42 }
 0x2a3   :  { %v1999_v63 = vpop.xlane.xlu2 %1998 }
 0x2a4   :  { %v2000_v3 = vsub.f32 %v1993_v2, %v1999_v63  ;;  %v1722_v2 = vadd.f32 %v7240_v56, %v7211_v27  ;;  %v2073_v27 = vunpack.c.l.b16 %v1784_v15 }
 0x2a6   :  { %v2001_v6 = vmul.f32 1.442695, %v2000_v3  ;;  %v1782_v12 = vpack.c.bf16 %v1760_v33, %v1722_v2  ;;  %v2313_v3 = vunpack.c.l.b16 %v1785_v24 }
 0x2a8   :  { %6585 = vpow2.f32 %v2001_v6  ;;  %1822 = vadd.xlane.f32.xlu2 %v1821_v47  ;;  %v2072_v28 = vunpack.c.l.b16 %v1782_v12  ;;  %v2193_v20 = vunpack.c.h.b16 %v1782_v12  ;;  %v2314_v6 = vunpack.c.l.b16 %v1787_v40 }
 0x2a9   :  { %v2663_v47 = vsel %vm1814_vm1, %v7289_v59, -inf }
 0x2aa   :  { %v7345_v58 = vpack.c.b16 %v2073_v27, %v2072_v28  ;;  %v7351_v62 = vpack.c.b16 %v2194_v57, %v2193_v20 }
 0x2ae   :  { %v7326_v49 = vpop.eup %6585 }
 0x2af   :  { %v2003_v25 = vsel %vm1814_vm1, %v7326_v49, 0.0 }
 0x2b0   :  { %2004 = vadd.xlane.f32.xlu0 %v2003_v25  ;;  %2300 = vmax.xlane.f32.xlu2 %v2299_v4  ;;  %v7388_v4 = vpack.c.b16 %v2314_v6, %v2313_v3 }
 0x2b3   :  { %v2122_v31 = vpop.xlane.xlu0 %2121 }
 0x2b4   :  { %v2123_v32 = vsub.f32 %v2116_v7, %v2122_v31 }
 0x2b6   :  { %v2124_v39 = vmul.f32 1.442695, %v2123_v32 }
 0x2b8   :  { %6587 = vpow2.f32 %v2124_v39  ;;  %v2555_v39 = vunpack.c.l.b16 %v7267_v11 }
 0x2b9   :  { %6589 = vpow2.f32 %v2062_v60 }
 0x2ba   :  { %v7398_v60 = vpack.c.b16 %v2555_v39, %v2554_v36 }
 0x2be   :  { %v7341_v7 = vpop.eup %6587 }
 0x2bf   :  { %v2126_v56 = vsel %vm1814_vm1, %v7341_v7, 0.0  ;;  %v7347_v61 = vpop.eup %6589 }
 0x2c0   :  { %2127 = vadd.xlane.f32.xlu1 %v2126_v56  ;;  %v2064_v0 = vsel %vm1814_vm1, %v7347_v61, 0.0 }
 0x2c3   :  { %v2240_v48 = vpop.xlane.xlu1 %2239 }
 0x2c4   :  { %2132 = vrot.lane.b32.xlu0 %v7345_v58, %s6944_s8  ;;  %v2241_v5 = vsub.f32 %v7295_v8, %v2240_v48 }
 0x2c6   :  { %v2242_v55 = vmul.f32 1.442695, %v2241_v5 }
 0x2c8   :  { %2065 = vadd.xlane.f32.xlu1 %v2064_v0  ;;  %2250 = vrot.lane.b32.xlu2 %v7351_v62, %s6944_s8  ;;  %6591 = vpow2.f32 %v2242_v55 }
 0x2c9   :  { %6593 = vpow2.f32 %v2185_v45 }
 0x2cb   :  { %v1948_v15 = vpop.xlane.xlu1 %1947 }
 0x2ce   :  { %v7371_v19 = vpop.eup %6591 }
 0x2cf   :  { %v2244_v50 = vsel %vm1814_vm1, %v7371_v19, 0.0  ;;  %v7380_v17 = vpop.eup %6593 }
 0x2d0   :  { %v2187_v63 = vsel %vm1814_vm1, %v7380_v17, 0.0 }
 0x2d3   :  { %v2363_v52 = vpop.xlane.xlu2 %2362 }
 0x2d4   :  { %v2364_v8 = vsub.f32 %v7303_v37, %v2363_v52 }
 0x2d6   :  { %v2365_v53 = vmul.f32 1.442695, %v2364_v8 }
 0x2d8   :  { %6595 = vpow2.f32 %v2365_v53 }
 0x2de   :  { %v7386_v25 = vpop.eup %6595 }
 0x2df   :  { %v2367_v37 = vsel %vm1814_vm1, %v7386_v25, 0.0 }
 0x2e1   :  { %2491 = vrot.lane.b32.xlu1 %v7366_v18, %s6944_s8 }
 0x2e3   :  { %v2481_v31 = vpop.xlane.xlu2 %2480 }
 0x2e4   :  { %v2482_v11 = vsub.f32 %v7307_v14, %v2481_v31 }
 0x2ee   :  { %2603 = vmax.xlane.f32.xlu0 %v2602_v46 }
 0x2f1   :  { %2245 = vadd.xlane.f32.xlu2 %v2244_v50 }
 0x2f6   :  { %2423 = vmax.xlane.f32.xlu0 %v2422_v51 }
 0x2fe   :  { %2188 = vadd.xlane.f32.xlu0 %v2187_v63 }
 0x303   :  { %v2722_v0 = vpop.xlane.xlu1 %2721 }
 0x304   :  { %v2723_v44 = vsub.f32 %v7313_v22, %v2722_v0 }
 0x306   :  { %2664 = vmax.xlane.f32.xlu0 %v2663_v47  ;;  %v2724_v45 = vmul.f32 1.442695, %v2723_v44 }
 0x309   :  { %2373 = vrot.lane.b32.xlu2 %v7388_v4, %s6944_s8 }
 0x30b   :  { %2368 = vadd.xlane.f32.xlu1 %v2367_v37 }
 0x313   :  { %v1886_v32 = vpop.xlane.xlu2 %1885 }
 0x314   :  { %6597 = vrcp.f32 %v1886_v32 }
 0x31a   :  { %v6598_v2 = vpop.eup %6597 }
 0x31b   :  { %v1888_v33 = vmul.f32 %v6598_v2, %v7318_v54  ;;  %v1823_v9 = vpop.xlane.xlu2 %1822 }
 0x31c   :  { %6599 = vrcp.f32 %v1823_v9 }
 0x31d   :  { %v1889_v35 = vpack.c.bf16 %v1888_v33, %v1888_v33 }
 0x31f   :  { %5362 = vmatmul.msk.bf16.vlgmr.msra.gmra.mxu3 %vm1814_vm1, %v1889_v35 }
 0x322   :  { %v6600_v12 = vpop.eup %6599 }
 0x323   :  { %v1825_v28 = vmul.f32 %v6600_v12, %v7322_v1  ;;  %v2005_v27 = vpop.xlane.xlu0 %2004  ;;  %v2301_v56 = vpop.xlane.xlu2 %2300  ;;  %v2483_v1 = vmul.f32 1.442695, %v2482_v11 }
 0x324   :  { %6601 = vrcp.f32 %v2005_v27  ;;  %v2302_v54 = vsub.f32 %v7279_v21, %v2301_v56  ;;  %2614 = vrot.lane.b32.xlu1 %v7398_v60, %s6944_s8 }
 0x325   :  { %v1826_v20 = vpack.c.bf16 %v1825_v28, %v1825_v28  ;;  %6603 = vrcp.f32 %v1948_v15 }
 0x326   :  { %v2303_v10 = vmul.f32 1.442695, %v2302_v54 }
 0x327   :  { %5360 = vmatmul.msk.bf16.vlgmr.msra.gmra.mxu1 %vm1814_vm1, %v1826_v20 }
 0x328   :  { %6605 = vpow2.f32 %v2303_v10  ;;  %2086 = vmatpush.bf16.msra.mxu1 %v7345_v58  ;;  %v2540_v58 = vsel %vm1814_vm1, %v7286_v43, -inf }
 0x329   :  { %6607 = vpow2.f32 %v2483_v1 }
 0x32a   :  { %v6602_v57 = vpop.eup %6601 }
 0x32b   :  { %v2007_v30 = vmul.f32 %v6602_v57, %v7326_v49  ;;  %v6604_v29 = vpop.eup %6603  ;;  %v2251_v13 = vpop.permute.xlu2 %2250 }
 0x32c   :  { %v1950_v23 = vmul.f32 %v6604_v29, %v7299_v34 }
 0x32d   :  { %v2008_v21 = vpack.c.bf16 %v2007_v30, %v2007_v30 }
 0x32e   :  { %v7408_v38 = vpop.eup %6605  ;;  %v1951_v40 = vpack.c.bf16 %v1950_v23, %v1950_v23 }
 0x32f   :  { %5366 = vmatmul.msk.bf16.vlgmr.msrb.gmra.mxu3 %vm1814_vm1, %v2008_v21  ;;  %v2305_v14 = vsel %vm1814_vm1, %v7408_v38, 0.0  ;;  %v7416_v49 = vpop.eup %6607 }
 0x330   :  { %2306 = vadd.xlane.f32.xlu0 %v2305_v14  ;;  %v2485_v34 = vsel %vm1814_vm1, %v7416_v49, 0.0 }
 0x332   :  { %2541 = vmax.xlane.f32.xlu2 %v2540_v58 }
 0x333   :  { %v2128_v24 = vpop.xlane.xlu1 %2127 }
 0x334   :  { %6609 = vrcp.f32 %v2128_v24 }
 0x336   :  { %v2133_v42 = vpop.permute.xlu0 %2132 }
 0x337   :  { %5364 = vmatmul.msk.bf16.vlgmr.msrb.gmra.mxu1 %vm1814_vm1, %v1951_v40  ;;  %2145 = vmatpush.bf16.msra.mxu3 %v2133_v42 }
 0x338   :  { %2207 = vmatpush.bf16.msrb.mxu1 %v7351_v62  ;;  %2486 = vadd.xlane.f32.xlu0 %v2485_v34 }
 0x33a   :  { %v6610_v48 = vpop.eup %6609 }
 0x33b   :  { %2263 = vmatpush.bf16.msrb.mxu3 %v2251_v13  ;;  %v2130_v5 = vmul.f32 %v6610_v48, %v7341_v7  ;;  %v2066_v55 = vpop.xlane.xlu1 %2065 }
 0x33c   :  { %6611 = vrcp.f32 %v2066_v55 }
 0x33d   :  { %v2131_v46 = vpack.c.bf16 %v2130_v5, %v2130_v5  ;;  %6613 = vpow2.f32 %v2724_v45 }
 0x33f   :  { %5370 = vmatmul.msk.bf16.vlgmr.msra.gmra.mxu3 %vm1814_vm1, %v2131_v46 }
 0x342   :  { %v6612_v50 = vpop.eup %6611 }
 0x343   :  { %v2068_v51 = vmul.f32 %v6612_v50, %v7347_v61  ;;  %v7428_v52 = vpop.eup %6613 }
 0x344   :  { %v2726_v7 = vsel %vm1814_vm1, %v7428_v52, 0.0 }
 0x345   :  { %v2069_v62 = vpack.c.bf16 %v2068_v51, %v2068_v51 }
 0x347   :  { %5368 = vmatmul.msk.bf16.vlgmr.msra.gmra.mxu1 %vm1814_vm1, %v2069_v62 }
 0x348   :  { %2327 = vmatpush.bf16.msra.mxu1 %v7388_v4 }
 0x34e   :  { %2727 = vadd.xlane.f32.xlu1 %v2726_v7 }
 0x361   :  { %v2604_v22 = vpop.xlane.xlu0 %2603 }
 0x362   :  { %v2605_v8 = vsub.f32 %v7311_v26, %v2604_v22  ;;  %v2492_v26 = vpop.permute.xlu1 %2491 }
 0x364   :  { %v2606_v53 = vmul.f32 1.442695, %v2605_v8  ;;  %v2246_v63 = vpop.xlane.xlu2 %2245 }
 0x365   :  { %6615 = vrcp.f32 %v2246_v63 }
 0x366   :  { %6617 = vpow2.f32 %v2606_v53 }
 0x369   :  { %v2424_v61 = vpop.xlane.xlu0 %2423 }
 0x36a   :  { %v2425_v3 = vsub.f32 %v7283_v41, %v2424_v61 }
 0x36b   :  { %v6616_v6 = vpop.eup %6615 }
 0x36c   :  { %v7434_v47 = vpop.eup %6617  ;;  %v2248_v4 = vmul.f32 %v6616_v6, %v7371_v19  ;;  %v2426_v37 = vmul.f32 1.442695, %v2425_v3  ;;  %v2374_v31 = vpop.permute.xlu2 %2373 }
 0x36d   :  { %2386 = vmatpush.bf16.msra.mxu3 %v2374_v31  ;;  %v2608_v32 = vsel %vm1814_vm1, %v7434_v47, 0.0 }
 0x36e   :  { %v2249_v2 = vpack.c.bf16 %v2248_v4, %v2248_v4  ;;  %6619 = vpow2.f32 %v2426_v37  ;;  %2609 = vadd.xlane.f32.xlu0 %v2608_v32 }
 0x370   :  { %5374 = vmatmul.msk.bf16.vlgmr.msrb.gmra.mxu3 %vm1814_vm1, %v2249_v2 }
 0x371   :  { %2504 = vmatpush.bf16.msrb.mxu3 %v2492_v26  ;;  %v2189_v33 = vpop.xlane.xlu0 %2188 }
 0x372   :  { %6621 = vrcp.f32 %v2189_v33 }
 0x374   :  { %v7440_v41 = vpop.eup %6619 }
 0x375   :  { %v2428_v19 = vsel %vm1814_vm1, %v7440_v41, 0.0 }
 0x376   :  { %2429 = vadd.xlane.f32.xlu2 %v2428_v19 }
 0x378   :  { %v6622_v9 = vpop.eup %6621 }
 0x379   :  { %v2191_v35 = vmul.f32 %v6622_v9, %v7380_v17  ;;  %v2665_v56 = vpop.xlane.xlu0 %2664 }
 0x37b   :  { %v2192_v36 = vpack.c.bf16 %v2191_v35, %v2191_v35 }
 0x37d   :  { %5372 = vmatmul.msk.bf16.vlgmr.msrb.gmra.mxu1 %vm1814_vm1, %v2192_v36 }
 0x37e   :  { %2448 = vmatpush.bf16.msrb.mxu1 %v7366_v18  ;;  %v2369_v39 = vpop.xlane.xlu1 %2368 }
 0x37f   :  { %6623 = vrcp.f32 %v2369_v39  ;;  %v5465_v39 = vld [vmem:[#allocation12 + $0x70] sm:$0xf] }
 0x382   :  { %2732 = vrot.lane.b32.xlu0 %v7271_v16, %s6944_s8 }
 0x385   :  { %v6624_v12 = vpop.eup %6623 }
 0x386   :  { %v2371_v15 = vmul.f32 %v6624_v12, %v7386_v25  ;;  %v2666_v25 = vsub.f32 %v7289_v59, %v2665_v56  ;;  %v5457_v12 = vld [vmem:[#allocation12 + $0x60] sm:$0xf] }
 0x388   :  { %v2372_v28 = vpack.c.bf16 %v2371_v15, %v2371_v15  ;;  %v2667_v21 = vmul.f32 1.442695, %v2666_v25 }
 0x38a   :  { %5378 = vmatmul.msk.bf16.vlgmr.msra.gmra.mxu3 %vm1814_vm1, %v2372_v28  ;;  %v6384_v28 = vld [vmem:[#allocation12 + $0x64] sm:$0xf0] }
 0x38b   :  { %v5458_v56 = vor.u32 %v6384_v28, %v5457_v12  ;;  %v5411_v12 = vld [vmem:[#allocation12 + $0x8] sm:$0xf0] }
 0x396   :  { %v2615_v27 = vpop.permute.xlu1 %2614 }
 0x397   :  { %2627 = vmatpush.bf16.msra.mxu3 %v2615_v27 }
 0x3a2   :  { %v1905_v17 = vpop.f32.mrf.mxu3 }
 0x3a3   :  { %v1909_v54 = vpack.c.bf16 %v1905_v17, %v1905_v17  ;;  %v2307_v20 = vpop.xlane.xlu0 %2306 }
 0x3a4   :  { %6625 = vrcp.f32 %v2307_v20  ;;  %v1845_v10 = vpop.f32.mrf.mxu1 }
 0x3a5   :  { %v1849_v18 = vpack.c.bf16 %v1845_v10, %v1845_v10  ;;  %v2542_v11 = vpop.xlane.xlu2 %2541  ;;  %1911 = vrot.lane.b32.xlu0 %v1909_v54, %s6944_s8 }
 0x3a6   :  { %v2543_v57 = vsub.f32 %v7286_v43, %v2542_v11 }
 0x3a7   :  { %1851 = vst.msk [vmem:[#allocation2] sm:$0xf] %vm1850_vm2, %v1849_v18 }
 0x3a8   :  { %v2544_v1 = vmul.f32 1.442695, %v2543_v57 }
 0x3aa   :  { %v6626_v0 = vpop.eup %6625  ;;  %6627 = vpow2.f32 %v2544_v1  ;;  %v1907_v30 = vpop.f32.mrf.mxu3 }
 0x3ab   :  { %v2309_v29 = vmul.f32 %v6626_v0, %v7408_v38  ;;  %v2487_v14 = vpop.xlane.xlu0 %2486 }
 0x3ac   :  { %v1847_v23 = vpop.f32.mrf.mxu1  ;;  %6629 = vrcp.f32 %v2487_v14  ;;  %v5449_v14 = vld [vmem:[#allocation12 + $0x50] sm:$0xf] }
 0x3ad   :  { %v2310_v58 = vpack.c.bf16 %v2309_v29, %v2309_v29  ;;  %6631 = vpow2.f32 %v2667_v21  ;;  %v6382_v23 = vld [vmem:[#allocation12 + $0x54] sm:$0xf0] }
 0x3af   :  { %5376 = vmatmul.msk.bf16.vlgmr.msra.gmra.mxu1 %vm1814_vm1, %v2310_v58  ;;  %v5450_v58 = vor.u32 %v6382_v23, %v5449_v14  ;;  %v5577_v23 = vld [vmem:[#allocation12 + $0x150] sm:$0xf] }
 0x3b0   :  { %v7457_v24 = vpop.eup %6627  ;;  %2568 = vmatpush.bf16.msra.mxu1 %v7398_v60 }
 0x3b1   :  { %v2546_v43 = vsel %vm1814_vm1, %v7457_v24, 0.0 }
 0x3b2   :  { %v7462_v59 = vpop.f32.mrf.mxu3  ;;  %2547 = vadd.xlane.f32.xlu2 %v2546_v43  ;;  %v6630_v40 = vpop.eup %6629  ;;  %v6380_v43 = vld [vmem:[#allocation12 + $0x44] sm:$0xf0] }
 0x3b3   :  { %v2489_v38 = vmul.f32 %v6630_v40, %v7416_v49  ;;  %v7465_v34 = vpop.eup %6631 }
 0x3b4   :  { %v1968_v42 = vpop.f32.mrf.mxu1  ;;  %v2669_v60 = vsel %vm1814_vm1, %v7465_v34, 0.0 }
 0x3b5   :  { %v1972_v13 = vpack.c.bf16 %v1968_v42, %v1968_v42  ;;  %v2490_v48 = vpack.c.bf16 %v2489_v38, %v2489_v38  ;;  %v5433_v38 = vld [vmem:[#allocation12 + $0x30] sm:$0xf]  ;;  %v6378_v42 = vld [vmem:[#allocation12 + $0x34] sm:$0xf0] }
 0x3b7   :  { %1973 = vst.msk [vmem:[#allocation2 + $0x4] sm:$0xf] %vm1850_vm2, %v1972_v13  ;;  %5382 = vmatmul.msk.bf16.vlgmr.msrb.gmra.mxu3 %vm1814_vm1, %v2490_v48  ;;  %v5434_v13 = vor.u32 %v6378_v42, %v5433_v38  ;;  %v5425_v48 = vld [vmem:[#allocation12 + $0x20] sm:$0xf]  ;;  %v5561_v38 = vld [vmem:[#allocation12 + $0x130] sm:$0xf] }
 0x3ba   :  { %v2026_v5 = vpop.f32.mrf.mxu3  ;;  %2670 = vadd.xlane.f32.xlu2 %v2669_v60 }
 0x3bb   :  { %v5417_v5 = vld [vmem:[#allocation12 + $0x10] sm:$0xf] }
 0x3bc   :  { %v1970_v55 = vpop.f32.mrf.mxu1 }
 0x3bd   :  { %v6374_v55 = vld [vmem:[#allocation12 + $0x14] sm:$0xf0] }
 0x3c1   :  { %v2728_v53 = vpop.xlane.xlu1 %2727 }
 0x3c2   :  { %v2147_v44 = vpop.f32.mrf.mxu3 }
 0x3c3   :  { %v2151_v46 = vpack.c.bf16 %v2147_v44, %v2147_v44  ;;  %v5418_v44 = vor.u32 %v6374_v55, %v5417_v5  ;;  %v5545_v5 = vld [vmem:[#allocation12 + $0x110] sm:$0xf]  ;;  %v6406_v55 = vld [vmem:[#allocation12 + $0x114] sm:$0xf0] }
 0x3c4   :  { %v2088_v45 = vpop.f32.mrf.mxu1 }
 0x3c5   :  { %v2092_v50 = vpack.c.bf16 %v2088_v45, %v2088_v45  ;;  %2153 = vrot.lane.b32.xlu0 %v2151_v46, %s6944_s8  ;;  %v5409_v46 = vld [vmem:[#allocation12] sm:$0xf]  ;;  %v6372_v45 = vld [vmem:[#allocation12 + $0x4] sm:$0xf0] }
 0x3c7   :  { %2093 = vst.msk [vmem:[#allocation2 + $0x8] sm:$0xf] %vm1850_vm2, %v2092_v50  ;;  %v6385_v50 = vld [vmem:[#allocation12 + $0x74] sm:$0xf] }
 0x3ca   :  { %v2149_v49 = vpop.f32.mrf.mxu3 }
 0x3cb   :  { %v5410_v49 = vor.u32 %v6372_v45, %v5409_v46  ;;  %v5537_v46 = vld [vmem:[#allocation12 + $0x100] sm:$0xf]  ;;  %v6404_v45 = vld [vmem:[#allocation12 + $0x104] sm:$0xf0] }
 0x3cc   :  { %v2090_v51 = vpop.f32.mrf.mxu1 }
 0x3cd   :  { %v5467_v51 = vld [vmem:[#allocation12 + $0x78] sm:$0xf0] }
 0x3e1   :  { %v2610_v62 = vpop.xlane.xlu0 %2609 }
 0x3e2   :  { %6633 = vrcp.f32 %v2610_v62  ;;  %v5470_v62 = vor.u32 %v6385_v50, %v5467_v51  ;;  %v6417_v50 = vld [vmem:[#allocation12 + $0x174] sm:$0xf]  ;;  %v5595_v51 = vld [vmem:[#allocation12 + $0x178] sm:$0xf0] }
 0x3e8   :  { %v6634_v7 = vpop.eup %6633 }
 0x3e9   :  { %v2612_v22 = vmul.f32 %v6634_v7, %v7434_v47  ;;  %v2430_v8 = vpop.xlane.xlu2 %2429  ;;  %v6383_v7 = vld [vmem:[#allocation12 + $0x64] sm:$0xf] }
 0x3ea   :  { %6635 = vrcp.f32 %v2430_v8 }
 0x3eb   :  { %v2613_v63 = vpack.c.bf16 %v2612_v22, %v2612_v22  ;;  %6637 = vrcp.f32 %v2728_v53  ;;  %v5459_v22 = vld [vmem:[#allocation12 + $0x68] sm:$0xf0]  ;;  %v6381_v53 = vld [vmem:[#allocation12 + $0x54] sm:$0xf] }
 0x3ec   :  { %v5462_v8 = vor.u32 %v6383_v7, %v5459_v22  ;;  %v5587_v7 = vld [vmem:[#allocation12 + $0x168] sm:$0xf0]  ;;  %v5598_v22 = vor.u32 %v6417_v50, %v5595_v51  ;;  %v5489_v51 = vld [vmem:[#allocation12 + $0xa0] sm:$0xf] }
 0x3ed   :  { %5386 = vmatmul.msk.bf16.vlgmr.msra.gmra.mxu3 %vm1814_vm1, %v2613_v63  ;;  %v5451_v63 = vld [vmem:[#allocation12 + $0x58] sm:$0xf0] }
 0x3f0   :  { %v6636_v61 = vpop.eup %6635 }
 0x3f1   :  { %v2432_v3 = vmul.f32 %v6636_v61, %v7440_v41  ;;  %v6638_v37 = vpop.eup %6637  ;;  %v5454_v61 = vor.u32 %v6381_v53, %v5451_v63  ;;  %v6413_v63 = vld [vmem:[#allocation12 + $0x154] sm:$0xf] }
 0x3f2   :  { %v2730_v47 = vmul.f32 %v6638_v37, %v7428_v52  ;;  %v6386_v52 = vld [vmem:[#allocation12 + $0x74] sm:$0xf0] }
 0x3f3   :  { %v2433_v6 = vpack.c.bf16 %v2432_v3, %v2432_v3  ;;  %v2265_v4 = vpop.f32.mrf.mxu3  ;;  %v5466_v15 = vor.u32 %v6386_v52, %v5465_v39  ;;  %v6371_v52 = vld [vmem:[#allocation12 + $0x4] sm:$0xf] }
 0x3f4   :  { %v2269_v31 = vpack.c.bf16 %v2265_v4, %v2265_v4  ;;  %v2733_v32 = vpop.permute.xlu0 %2732  ;;  %v2731_v26 = vpack.c.bf16 %v2730_v47, %v2730_v47  ;;  %v5443_v4 = vld [vmem:[#allocation12 + $0x48] sm:$0xf0] }
 0x3f5   :  { %5380 = vmatmul.msk.bf16.vlgmr.msrb.gmra.mxu1 %vm1814_vm1, %v2433_v6  ;;  %2745 = vmatpush.bf16.msrb.mxu3 %v2733_v32  ;;  %v6379_v6 = vld [vmem:[#allocation12 + $0x44] sm:$0xf]  ;;  %v5435_v32 = vld [vmem:[#allocation12 + $0x38] sm:$0xf0] }
 0x3f6   :  { %2689 = vmatpush.bf16.msrb.mxu1 %v7271_v16  ;;  %2271 = vrot.lane.b32.xlu0 %v2269_v31, %s6944_s8  ;;  %v5446_v37 = vor.u32 %v6379_v6, %v5443_v4  ;;  %v6377_v31 = vld [vmem:[#allocation12 + $0x34] sm:$0xf] }
 0x3f7   :  { %3169 = vmatpush.bf16.msra.mxu0 %v5466_v15  ;;  %v5438_v47 = vor.u32 %v6377_v31, %v5435_v32  ;;  %v5414_v15 = vor.u32 %v6371_v52, %v5411_v12  ;;  %v6411_v31 = vld [vmem:[#allocation12 + $0x144] sm:$0xf]  ;;  %v5571_v32 = vld [vmem:[#allocation12 + $0x148] sm:$0xf0]  ;;  %v5641_v52 = vld [vmem:[#allocation12 + $0x1d0] sm:$0xf] }
 0x3fa   :  { %v2209_v2 = vpop.f32.mrf.mxu1 }
 0x3fb   :  { %v2213_v33 = vpack.c.bf16 %v2209_v2, %v2209_v2  ;;  %v2267_v19 = vpop.f32.mrf.mxu3  ;;  %3170 = vmatpush.bf16.msra.mxu0 %v5458_v56  ;;  %v6375_v2 = vld [vmem:[#allocation12 + $0x24] sm:$0xf] }
 0x3fd   :  { %2214 = vst.msk [vmem:[#allocation2 + $0xc] sm:$0xf] %vm1850_vm2, %v2213_v33  ;;  %5390 = vmatmul.msk.bf16.vlgmr.msrb.gmra.mxu3 %vm1814_vm1, %v2731_v26  ;;  %v5427_v26 = vld [vmem:[#allocation12 + $0x28] sm:$0xf0] }
 0x3fe   :  { %v5430_v33 = vor.u32 %v6375_v2, %v5427_v26  ;;  %v5574_v2 = vor.u32 %v6411_v31, %v5571_v32 }
 0x3ff   :  { %3171 = vmatpush.bf16.msra.mxu0 %v5450_v58  ;;  %v6414_v58 = vld [vmem:[#allocation12 + $0x154] sm:$0xf0] }
 0x402   :  { %v2211_v41 = vpop.f32.mrf.mxu1 }
 0x403   :  { %v6373_v41 = vld [vmem:[#allocation12 + $0x14] sm:$0xf] }
 0x40d   :  { %v2388_v9 = vpop.f32.mrf.mxu3 }
 0x40e   :  { %v2392_v35 = vpack.c.bf16 %v2388_v9, %v2388_v9  ;;  %v5419_v9 = vld [vmem:[#allocation12 + $0x18] sm:$0xf0] }
 0x40f   :  { %v5422_v39 = vor.u32 %v6373_v41, %v5419_v9  ;;  %v6409_v9 = vld [vmem:[#allocation12 + $0x134] sm:$0xf] }
 0x410   :  { %2394 = vrot.lane.b32.xlu1 %v2392_v35, %s6944_s8 }
 0x415   :  { %v2390_v36 = vpop.f32.mrf.mxu3 }
 0x417   :  { %v1912_v16 = vpop.permute.xlu0 %1911 }
 0x418   :  { %1915 = vst.msk [vmem:[#allocation2] sm:$0xf] %vm1914_vm3, %v1912_v16 }
 0x425   :  { %v2548_v27 = vpop.xlane.xlu2 %2547 }
 0x426   :  { %6639 = vrcp.f32 %v2548_v27  ;;  %v2028_v27 = vpack.c.bf16 %v7462_v59, %v7462_v59  ;;  %v5393_v59 = vld [vmem:[#allocation2] sm:$0xf] }
 0x42c   :  { %v6640_v17 = vpop.eup %6639  ;;  %v2329_v54 = vpop.f32.mrf.mxu1 }
 0x42d   :  { %v2550_v20 = vmul.f32 %v6640_v17, %v7457_v24  ;;  %v2333_v10 = vpack.c.bf16 %v2329_v54, %v2329_v54  ;;  %v2671_v11 = vpop.xlane.xlu2 %2670  ;;  %v5441_v24 = vld [vmem:[#allocation12 + $0x40] sm:$0xf]  ;;  %v5593_v17 = vld [vmem:[#allocation12 + $0x170] sm:$0xf]  ;;  %v6418_v54 = vld [vmem:[#allocation12 + $0x174] sm:$0xf0] }
 0x42e   :  { %6641 = vrcp.f32 %v2671_v11  ;;  %v5442_v40 = vor.u32 %v6380_v43, %v5441_v24  ;;  %v5578_v24 = vor.u32 %v6414_v58, %v5577_v23  ;;  %v5569_v43 = vld [vmem:[#allocation12 + $0x140] sm:$0xf]  ;;  %v6426_v23 = vld [vmem:[#allocation12 + $0x1b4] sm:$0xf0] }
 0x42f   :  { %v2551_v18 = vpack.c.bf16 %v2550_v20, %v2550_v20  ;;  %2334 = vst.msk [vmem:[#allocation2 + $0x10] sm:$0xf] %vm1850_vm2, %v2333_v10  ;;  %v5594_v20 = vor.u32 %v6418_v54, %v5593_v17  ;;  %v5521_v54 = vld [vmem:[#allocation12 + $0xe0] sm:$0xf] }
 0x430   :  { %3172 = vmatpush.bf16.msra.mxu0 %v5442_v40  ;;  %v6412_v40 = vld [vmem:[#allocation12 + $0x144] sm:$0xf0] }
 0x431   :  { %5384 = vmatmul.msk.bf16.vlgmr.msra.gmra.mxu1 %vm1814_vm1, %v2551_v18  ;;  %3197 = vmatpush.bf16.msra.mxu2 %v5594_v20  ;;  %v5570_v42 = vor.u32 %v6412_v40, %v5569_v43  ;;  %v6400_v20 = vld [vmem:[#allocation12 + $0xe4] sm:$0xf0]  ;;  %v6403_v43 = vld [vmem:[#allocation12 + $0x104] sm:$0xf]  ;;  %v5539_v40 = vld [vmem:[#allocation12 + $0x108] sm:$0xf0] }
 0x434   :  { %v2331_v57 = vpop.f32.mrf.mxu1  ;;  %v6642_v1 = vpop.eup %6641  ;;  %3173 = vmatpush.bf16.msra.mxu0 %v5434_v13  ;;  %v6410_v13 = vld [vmem:[#allocation12 + $0x134] sm:$0xf0] }
 0x435   :  { %v2673_v0 = vmul.f32 %v6642_v1, %v7465_v34  ;;  %v6376_v34 = vld [vmem:[#allocation12 + $0x24] sm:$0xf0] }
 0x436   :  { %v5426_v60 = vor.u32 %v6376_v34, %v5425_v48  ;;  %v5553_v48 = vld [vmem:[#allocation12 + $0x120] sm:$0xf]  ;;  %v6408_v34 = vld [vmem:[#allocation12 + $0x124] sm:$0xf0] }
 0x437   :  { %v2154_v25 = vpop.permute.xlu0 %2153  ;;  %v2674_v29 = vpack.c.bf16 %v2673_v0, %v2673_v0 }
 0x438   :  { %2156 = vst.msk [vmem:[#allocation2 + $0x8] sm:$0xf] %vm1914_vm3, %v2154_v25  ;;  %3174 = vmatpush.bf16.msra.mxu0 %v5426_v60  ;;  %v5554_v60 = vor.u32 %v6408_v34, %v5553_v48  ;;  %v5617_v48 = vld [vmem:[#allocation12 + $0x1a0] sm:$0xf]  ;;  %v6424_v34 = vld [vmem:[#allocation12 + $0x1a4] sm:$0xf0] }
 0x43a   :  { %v7489_v30 = vpop.f32.mrf.mxu3 }
 0x43b   :  { %v2510_v25 = vpack.c.bf16 %v7489_v30, %v7489_v30  ;;  %v5562_v30 = vor.u32 %v6410_v13, %v5561_v38  ;;  %v5505_v38 = vld [vmem:[#allocation12 + $0xc0] sm:$0xf] }
 0x43c   :  { %3175 = vmatpush.bf16.msra.mxu0 %v5418_v44  ;;  %v5546_v44 = vor.u32 %v6406_v55, %v5545_v5  ;;  %v5618_v5 = vor.u32 %v6424_v34, %v5617_v48  ;;  %v6391_v48 = vld [vmem:[#allocation12 + $0xa4] sm:$0xf]  ;;  %v5491_v34 = vld [vmem:[#allocation12 + $0xa8] sm:$0xf0] }
 0x440   :  { %3176 = vmatpush.bf16.msra.mxu0 %v5410_v49  ;;  %v5538_v49 = vor.u32 %v6404_v45, %v5537_v46  ;;  %v6394_v46 = vld [vmem:[#allocation12 + $0xb4] sm:$0xf0]  ;;  %v5609_v45 = vld [vmem:[#allocation12 + $0x190] sm:$0xf] }
 0x441   :  { %5388 = vmatmul.msk.bf16.vlgmr.msrb.gmra.mxu1 %vm1814_vm1, %v2674_v29  ;;  %v5585_v29 = vld [vmem:[#allocation12 + $0x160] sm:$0xf] }
 0x442   :  { %v2508_v21 = vpop.f32.mrf.mxu3 }
 0x443   :  { %v6416_v21 = vld [vmem:[#allocation12 + $0x164] sm:$0xf0] }
 0x444   :  { %3225 = vmatpush.bf16.msrb.mxu0 %v5470_v62  ;;  %v5586_v14 = vor.u32 %v6416_v21, %v5585_v29  ;;  %v6415_v62 = vld [vmem:[#allocation12 + $0x164] sm:$0xf] }
 0x446   :  { %3198 = vmatpush.bf16.msra.mxu2 %v5586_v14  ;;  %v5625_v14 = vld [vmem:[#allocation12 + $0x1b0] sm:$0xf] }
 0x447   :  { %v5626_v13 = vor.u32 %v6426_v23, %v5625_v14  ;;  %v6423_v14 = vld [vmem:[#allocation12 + $0x1a4] sm:$0xf]  ;;  %v5619_v23 = vld [vmem:[#allocation12 + $0x1a8] sm:$0xf0] }
 0x448   :  { %3226 = vmatpush.bf16.msrb.mxu0 %v5462_v8  ;;  %v5590_v8 = vor.u32 %v6415_v62, %v5587_v7  ;;  %v6392_v62 = vld [vmem:[#allocation12 + $0xa4] sm:$0xf0] }
 0x44a   :  { %3199 = vmatpush.bf16.msra.mxu2 %v5578_v24 }
 0x44c   :  { %3227 = vmatpush.bf16.msrb.mxu0 %v5454_v61  ;;  %v5579_v61 = vld [vmem:[#allocation12 + $0x158] sm:$0xf0] }
 0x44d   :  { %v5582_v4 = vor.u32 %v6413_v63, %v5579_v61  ;;  %v6433_v63 = vld [vmem:[#allocation12 + $0x1f4] sm:$0xf]  ;;  %v5659_v61 = vld [vmem:[#allocation12 + $0x1f8] sm:$0xf0] }
 0x44e   :  { %3200 = vmatpush.bf16.msra.mxu2 %v5570_v42  ;;  %v6396_v42 = vld [vmem:[#allocation12 + $0xc4] sm:$0xf0]  ;;  %v5662_v31 = vor.u32 %v6433_v63, %v5659_v61 }
 0x450   :  { %3228 = vmatpush.bf16.msrb.mxu0 %v5446_v37  ;;  %v6434_v37 = vld [vmem:[#allocation12 + $0x1f4] sm:$0xf0] }
 0x452   :  { %3201 = vmatpush.bf16.msra.mxu2 %v5562_v30  ;;  %v5542_v30 = vor.u32 %v6403_v43, %v5539_v40  ;;  %v6393_v43 = vld [vmem:[#allocation12 + $0xb4] sm:$0xf]  ;;  %v5499_v40 = vld [vmem:[#allocation12 + $0xb8] sm:$0xf0] }
 0x454   :  { %3229 = vmatpush.bf16.msrb.mxu0 %v5438_v47 }
 0x456   :  { %3202 = vmatpush.bf16.msra.mxu2 %v5554_v60  ;;  %v5506_v60 = vor.u32 %v6396_v42, %v5505_v38  ;;  %v6421_v38 = vld [vmem:[#allocation12 + $0x194] sm:$0xf]  ;;  %v5502_v42 = vor.u32 %v6393_v43, %v5499_v40 }
 0x458   :  { %3230 = vmatpush.bf16.msrb.mxu0 %v5430_v33  ;;  %v5649_v33 = vld [vmem:[#allocation12 + $0x1e0] sm:$0xf] }
 0x45a   :  { %3203 = vmatpush.bf16.msra.mxu2 %v5546_v44  ;;  %v5497_v44 = vld [vmem:[#allocation12 + $0xb0] sm:$0xf] }
 0x45b   :  { %v5498_v50 = vor.u32 %v6394_v46, %v5497_v44  ;;  %v6389_v46 = vld [vmem:[#allocation12 + $0x94] sm:$0xf] }
 0x45c   :  { %3231 = vmatpush.bf16.msrb.mxu0 %v5422_v39  ;;  %v6402_v39 = vld [vmem:[#allocation12 + $0xf4] sm:$0xf0] }
 0x45e   :  { %3204 = vmatpush.bf16.msra.mxu2 %v5538_v49  ;;  %v6422_v49 = vld [vmem:[#allocation12 + $0x194] sm:$0xf0] }
 0x45f   :  { %v5610_v7 = vor.u32 %v6422_v49, %v5609_v45  ;;  %v5483_v45 = vld [vmem:[#allocation12 + $0x98] sm:$0xf0]  ;;  %v6387_v49 = vld [vmem:[#allocation12 + $0x84] sm:$0xf] }
 0x460   :  { %3232 = vmatpush.bf16.msrb.mxu0 %v5414_v15  ;;  %v6430_v15 = vld [vmem:[#allocation12 + $0x1d4] sm:$0xf0] }
 0x462   :  { %3253 = vmatpush.bf16.msrb.mxu2 %v5598_v22  ;;  %v5601_v22 = vld [vmem:[#allocation12 + $0x180] sm:$0xf] }
 0x466   :  { %3254 = vmatpush.bf16.msrb.mxu2 %v5590_v8  ;;  %v6420_v8 = vld [vmem:[#allocation12 + $0x184] sm:$0xf0] }
 0x468   :  { %v2272_v3 = vpop.permute.xlu0 %2271 }
 0x469   :  { %2274 = vst.msk [vmem:[#allocation2 + $0xc] sm:$0xf] %vm1914_vm3, %v2272_v3  ;;  %v5657_v3 = vld [vmem:[#allocation12 + $0x1f0] sm:$0xf] }
 0x46a   :  { %v5658_v47 = vor.u32 %v6434_v37, %v5657_v3  ;;  %3255 = vmatpush.bf16.msrb.mxu2 %v5582_v4  ;;  %v5481_v3 = vld [vmem:[#allocation12 + $0x90] sm:$0xf]  ;;  %v5602_v37 = vor.u32 %v6420_v8, %v5601_v22 }
 0x46c   :  { %3211 = vmatpush.bf16.msra.mxu3 %v5658_v47  ;;  %v6431_v47 = vld [vmem:[#allocation12 + $0x1e4] sm:$0xf] }
 0x46e   :  { %3256 = vmatpush.bf16.msrb.mxu2 %v5574_v2  ;;  %v5651_v2 = vld [vmem:[#allocation12 + $0x1e8] sm:$0xf0] }
 0x470   :  { %v2629_v19 = vpop.f32.mrf.mxu3  ;;  %v6368_v8 = vld [vmem:[#allocation2 + $0xc] sm:$0xf] }
 0x471   :  { %v2633_v35 = vpack.c.bf16 %v2629_v19, %v2629_v19  ;;  %v6432_v19 = vld [vmem:[#allocation12 + $0x1e4] sm:$0xf0] }
 0x472   :  { %v2450_v36 = vpop.f32.mrf.mxu1  ;;  %v5650_v41 = vor.u32 %v6432_v19, %v5649_v33  ;;  %v5401_v19 = vld [vmem:[#allocation2 + $0x8] sm:$0xf] }
 0x473   :  { %v2454_v16 = vpack.c.bf16 %v2450_v36, %v2450_v36  ;;  %2635 = vrot.lane.b32.xlu2 %v2633_v35, %s6944_s8  ;;  %v5563_v35 = vld [vmem:[#allocation12 + $0x138] sm:$0xf0] }
 0x474   :  { %v5566_v36 = vor.u32 %v6409_v9, %v5563_v35  ;;  %3212 = vmatpush.bf16.msra.mxu3 %v5650_v41  ;;  %v5473_v35 = vld [vmem:[#allocation12 + $0x80] sm:$0xf] }
 0x475   :  { %2455 = vst.msk [vmem:[#allocation2 + $0x14] sm:$0xf] %vm1850_vm2, %v2454_v16  ;;  %v5529_v16 = vld [vmem:[#allocation12 + $0xf0] sm:$0xf] }
 0x476   :  { %v5530_v12 = vor.u32 %v6402_v39, %v5529_v16  ;;  %3257 = vmatpush.bf16.msrb.mxu2 %v5566_v36  ;;  %v6388_v36 = vld [vmem:[#allocation12 + $0x84] sm:$0xf0]  ;;  %v6401_v39 = vld [vmem:[#allocation12 + $0xf4] sm:$0xf] }
 0x477   :  { %v5474_v16 = vor.u32 %v6388_v36, %v5473_v35 }
 0x478   :  { %v2631_v28 = vpop.f32.mrf.mxu3  ;;  %3183 = vmatpush.bf16.msra.mxu1 %v5530_v12  ;;  %v6429_v12 = vld [vmem:[#allocation12 + $0x1d4] sm:$0xf] }
 0x479   :  { %v6407_v28 = vld [vmem:[#allocation12 + $0x124] sm:$0xf] }
 0x47a   :  { %v2452_v56 = vpop.f32.mrf.mxu1 }
 0x47b   :  { %2030 = vrot.lane.b32.xlu2 %v2028_v27, %s6944_s8  ;;  %v5555_v27 = vld [vmem:[#allocation12 + $0x128] sm:$0xf0]  ;;  %v5642_v56 = vor.u32 %v6430_v15, %v5641_v52  ;;  %v5531_v52 = vld [vmem:[#allocation12 + $0xf8] sm:$0xf0] }
 0x47c   :  { %v5558_v17 = vor.u32 %v6407_v28, %v5555_v27  ;;  %v5534_v15 = vor.u32 %v6401_v39, %v5531_v52  ;;  %v5643_v28 = vld [vmem:[#allocation12 + $0x1d8] sm:$0xf0]  ;;  %v6399_v27 = vld [vmem:[#allocation12 + $0xe4] sm:$0xf] }
 0x47d   :  { %3213 = vmatpush.bf16.msra.mxu3 %v5642_v56  ;;  %v5523_v56 = vld [vmem:[#allocation12 + $0xe8] sm:$0xf0] }
 0x47e   :  { %3258 = vmatpush.bf16.msrb.mxu2 %v5558_v17  ;;  %v5646_v17 = vor.u32 %v6429_v12, %v5643_v28 }
 0x480   :  { %v2747_v10 = vpop.f32.mrf.mxu3 }
 0x481   :  { %v2751_v18 = vpack.c.bf16 %v2747_v10, %v2747_v10  ;;  %v5633_v10 = vld [vmem:[#allocation12 + $0x1c0] sm:$0xf] }
 0x482   :  { %v2395_v11 = vpop.permute.xlu1 %2394 }
 0x483   :  { %2397 = vst.msk [vmem:[#allocation2 + $0x10] sm:$0xf] %vm1914_vm3, %v2395_v11  ;;  %2753 = vrot.lane.b32.xlu0 %v2751_v18, %s6944_s8  ;;  %v5522_v18 = vor.u32 %v6400_v20, %v5521_v54  ;;  %v6428_v11 = vld [vmem:[#allocation12 + $0x1c4] sm:$0xf0]  ;;  %v6427_v54 = vld [vmem:[#allocation12 + $0x1c4] sm:$0xf] }
 0x484   :  { %v5635_v20 = vld [vmem:[#allocation12 + $0x1c8] sm:$0xf0] }
 0x485   :  { %3184 = vmatpush.bf16.msra.mxu1 %v5522_v18  ;;  %v5638_v18 = vor.u32 %v6427_v54, %v5635_v20 }
 0x488   :  { %v2749_v57 = vpop.f32.mrf.mxu3 }
 0x489   :  { %v6405_v57 = vld [vmem:[#allocation12 + $0x114] sm:$0xf] }
 0x48a   :  { %v6369_v1 = vld [vmem:[#allocation2 + $0xc] sm:$0xf0] }
 0x48b   :  { %2512 = vrot.lane.b32.xlu0 %v2510_v25, %s6944_s8  ;;  %v5394_v0 = vor.u32 %v6369_v1, %v5393_v59  ;;  %v5547_v25 = vld [vmem:[#allocation12 + $0x118] sm:$0xf0]  ;;  %v5513_v59 = vld [vmem:[#allocation12 + $0xd0] sm:$0xf]  ;;  %v6398_v1 = vld [vmem:[#allocation12 + $0xd4] sm:$0xf0] }
 0x48c   :  { %v5550_v21 = vor.u32 %v6405_v57, %v5547_v25  ;;  %v5514_v24 = vor.u32 %v6398_v1, %v5513_v59  ;;  %v5515_v57 = vld [vmem:[#allocation12 + $0xd8] sm:$0xf0]  ;;  %v6425_v25 = vld [vmem:[#allocation12 + $0x1b4] sm:$0xf] }
 0x48d   :  { %3177 = vmatmul.bf16.vlgmr.msra.gmra.mxu0 %v5394_v0  ;;  %v5627_v1 = vld [vmem:[#allocation12 + $0x1b8] sm:$0xf0] }
 0x48e   :  { %3259 = vmatpush.bf16.msrb.mxu2 %v5550_v21  ;;  %3185 = vmatpush.bf16.msra.mxu1 %v5514_v24  ;;  %v5630_v21 = vor.u32 %v6425_v25, %v5627_v1  ;;  %v5622_v24 = vor.u32 %v6423_v14, %v5619_v23 }
 0x492   :  { %3260 = vmatpush.bf16.msrb.mxu2 %v5542_v30  ;;  %3186 = vmatpush.bf16.msra.mxu1 %v5506_v60  ;;  %v6419_v60 = vld [vmem:[#allocation12 + $0x184] sm:$0xf] }
 0x496   :  { %3187 = vmatpush.bf16.msra.mxu1 %v5498_v50  ;;  %v5486_v50 = vor.u32 %v6389_v46, %v5483_v45 }
 0x49d   :  { %3233 = vmatmul.bf16.vlgmr.msrb.gmra.mxu0 %v5394_v0  ;;  %v5634_v0 = vor.u32 %v6428_v11, %v5633_v10  ;;  %v5526_v10 = vor.u32 %v6399_v27, %v5523_v56  ;;  %v6397_v11 = vld [vmem:[#allocation12 + $0xd4] sm:$0xf] }
 0x49e   :  { %v5518_v59 = vor.u32 %v6397_v11, %v5515_v57 }
 0x49f   :  { %3214 = vmatpush.bf16.msra.mxu3 %v5634_v0  ;;  %v6395_v0 = vld [vmem:[#allocation12 + $0xc4] sm:$0xf] }
 0x4a3   :  { %3215 = vmatpush.bf16.msra.mxu3 %v5626_v13  ;;  %v5611_v13 = vld [vmem:[#allocation12 + $0x198] sm:$0xf0] }
 0x4a4   :  { %v5614_v30 = vor.u32 %v6421_v38, %v5611_v13 }
 0x4a7   :  { %3216 = vmatpush.bf16.msra.mxu3 %v5618_v5  ;;  %v5494_v5 = vor.u32 %v6391_v48, %v5491_v34 }
 0x4ab   :  { %3217 = vmatpush.bf16.msra.mxu3 %v5610_v7 }
 0x4ae   :  { %v2570_v53 = vpop.f32.mrf.mxu1 }
 0x4af   :  { %v2574_v6 = vpack.c.bf16 %v2570_v53, %v2570_v53  ;;  %v5490_v53 = vor.u32 %v6392_v62, %v5489_v51  ;;  %3218 = vmatpush.bf16.msra.mxu3 %v5602_v37  ;;  %v5475_v51 = vld [vmem:[#allocation12 + $0x88] sm:$0xf0] }
 0x4b0   :  { %v5478_v62 = vor.u32 %v6387_v49, %v5475_v51 }
 0x4b1   :  { %2575 = vst.msk [vmem:[#allocation2 + $0x18] sm:$0xf] %vm1850_vm2, %v2574_v6  ;;  %v6390_v6 = vld [vmem:[#allocation12 + $0x94] sm:$0xf0]  ;;  %3188 = vmatpush.bf16.msra.mxu1 %v5490_v53 }
 0x4b2   :  { %v5482_v32 = vor.u32 %v6390_v6, %v5481_v3 }
 0x4b3   :  { %3267 = vmatpush.bf16.msrb.mxu3 %v5662_v31 }
 0x4b5   :  { %3189 = vmatpush.bf16.msra.mxu1 %v5482_v32 }
 0x4b6   :  { %v2572_v26 = vpop.f32.mrf.mxu1 }
 0x4b7   :  { %v5654_v26 = vor.u32 %v6431_v47, %v5651_v2  ;;  %v7509_v2 = vld [vmem:[#allocation17] sm:$0xff] }
 0x4b9   :  { %3268 = vmatpush.bf16.msrb.mxu3 %v5654_v26  ;;  %3190 = vmatpush.bf16.msra.mxu1 %v5474_v16  ;;  %v2827_v26 = vperm.slane %v7509_v2, 0 }
 0x4bd   :  { %3239 = vmatpush.bf16.msrb.mxu1 %v5534_v15  ;;  %3269 = vmatpush.bf16.msrb.mxu3 %v5646_v17 }
 0x4be   :  { %v2691_v29 = vpop.f32.mrf.mxu1 }
 0x4bf   :  { %v2695_v58 = vpack.c.bf16 %v2691_v29, %v2691_v29  ;;  %v5507_v29 = vld [vmem:[#allocation12 + $0xc8] sm:$0xf0] }
 0x4c1   :  { %2696 = vst.msk [vmem:[#allocation2 + $0x1c] sm:$0xf] %vm1850_vm2, %v2695_v58  ;;  %3240 = vmatpush.bf16.msrb.mxu1 %v5526_v10  ;;  %3270 = vmatpush.bf16.msrb.mxu3 %v5638_v18  ;;  %v5510_v58 = vor.u32 %v6395_v0, %v5507_v29  ;;  %v6674_v0 = vld [vmem:[#allocation3 + $0x8] sm:$0xff] }
 0x4c5   :  { %3241 = vmatpush.bf16.msrb.mxu1 %v5518_v59  ;;  %3271 = vmatpush.bf16.msrb.mxu3 %v5630_v21  ;;  %v6673_v59 = vld [vmem:[#allocation3] sm:$0xff] }
 0x4c6   :  { %v2693_v55 = vpop.f32.mrf.mxu1 }
 0x4c7   :  { %v5603_v55 = vld [vmem:[#allocation12 + $0x188] sm:$0xf0] }
 0x4c8   :  { %v5606_v44 = vor.u32 %v6419_v60, %v5603_v55  ;;  %v6945_v60 = vmov 256.0  }
 0x4c9   :  { %3242 = vmatpush.bf16.msrb.mxu1 %v5510_v58  ;;  %3272 = vmatpush.bf16.msrb.mxu3 %v5622_v24  ;;  %6643 = vrcp.f32 %v6945_v60 }
 0x4cd   :  { %v2636_v4 = vpop.permute.xlu2 %2635  ;;  %3243 = vmatpush.bf16.msrb.mxu1 %v5502_v42  ;;  %3273 = vmatpush.bf16.msrb.mxu3 %v5614_v30  ;;  %v6675_v42 = vld [vmem:[#allocation3 + $0x10] sm:$0xff]  ;;  %v6676_v30 = vld [vmem:[#allocation3 + $0x18] sm:$0xff] }
 0x4ce   :  { %2638 = vst.msk [vmem:[#allocation2 + $0x18] sm:$0xf] %vm1914_vm3, %v2636_v4 }
 0x4d1   :  { %3244 = vmatpush.bf16.msrb.mxu1 %v5494_v5  ;;  %3274 = vmatpush.bf16.msrb.mxu3 %v5606_v44  ;;  %v6644_v5 = vpop.eup %6643 }
 0x4d2   :  { %v3292_v55 = vmul.f32 256.0, %v6644_v5  ;;  %vm3296_vm4 = vweird.f32 %v6644_v5 }
 0x4d4   :  { %v3293_v44 = vsub.f32 1.0, %v3292_v55  ;;  %v6463_v55 = vld [vmem:[#allocation14 + $0xe4] sm:$0xf] }
 0x4d5   :  { %v2031_v33 = vpop.permute.xlu2 %2030  ;;  %v6370_v41 = vld [vmem:[#allocation2 + $0x14] sm:$0xf0]  ;;  %3245 = vmatpush.bf16.msrb.mxu1 %v5486_v50 }
 0x4d6   :  { %2033 = vst.msk [vmem:[#allocation2 + $0x4] sm:$0xf] %vm1914_vm3, %v2031_v33  ;;  %v5402_v9 = vor.u32 %v6370_v41, %v5401_v19  ;;  %v7512_v19 = vld [vmem:[#allocation17 + $0x8] sm:$0xff]  ;;  %v3294_v46 = vmul.f32 %v6644_v5, %v3293_v44  ;;  %v5779_v44 = vld [vmem:[#allocation14 + $0xf0] sm:$0xf0] }
 0x4d7   :  { %v2828_v16 = vperm.slane %v7512_v19, 0 }
 0x4d8   :  { %3205 = vmatmul.bf16.vlgmr.msra.gmra.mxu2 %v5402_v9  ;;  %v3295_v45 = vadd.f32 %v6644_v5, %v3294_v46 }
 0x4d9   :  { %3246 = vmatpush.bf16.msrb.mxu1 %v5478_v62 }
 0x4da   :  { %v7515_v50 = vsel %vm3296_vm4, %v6644_v5, %v3295_v45  ;;  %v6497_v5 = vld [vmem:[#allocation14 + $0x1ec] sm:$0xf0]  ;;  %v5782_v45 = vor.u32 %v6463_v55, %v5779_v44  ;;  %v5713_v55 = vld [vmem:[#allocation14 + $0x60] sm:$0xf] }
 0x4db   :  { %v6449_v44 = vld [vmem:[#allocation14 + $0x6c] sm:$0xf0] }
 0x4dc   :  { %3840 = vmatpush.bf16.msra.mxu2 %v5782_v45  ;;  %v5714_v45 = vor.u32 %v6449_v44, %v5713_v55  ;;  %v6464_v44 = vld [vmem:[#allocation14 + $0xec] sm:$0xf] }
 0x4dd   :  { %v6367_v61 = vld [vmem:[#allocation2 + $0x4] sm:$0xf] }
 0x4e8   :  { %3261 = vmatmul.bf16.vlgmr.msrb.gmra.mxu2 %v5402_v9 }
 0x4f5   :  { %v2754_v7 = vpop.permute.xlu0 %2753 }
 0x4f6   :  { %2756 = vst.msk [vmem:[#allocation2 + $0x1c] sm:$0xf] %vm1914_vm3, %v2754_v7 }
 0x4fd   :  { %v2513_v22 = vpop.permute.xlu0 %2512  ;;  %v5403_v53 = vld [vmem:[#allocation2 + $0x18] sm:$0xf0] }
 0x4fe   :  { %2515 = vst.msk [vmem:[#allocation2 + $0x14] sm:$0xf] %vm1914_vm3, %v2513_v22  ;;  %v5406_v63 = vor.u32 %v6368_v8, %v5403_v53 }
 0x500   :  { %3219 = vmatmul.bf16.vlgmr.msra.gmra.mxu3 %v5406_v63 }
 0x505   :  { %v5395_v3 = vld [vmem:[#allocation2 + $0x10] sm:$0xf0] }
 0x506   :  { %v5398_v6 = vor.u32 %v6367_v61, %v5395_v3 }
 0x508   :  { %3191 = vmatmul.bf16.vlgmr.msra.gmra.mxu1 %v5398_v6 }
 0x50a   :  { %v3178_v4 = vpop.f32.mrf.mxu0 }
 0x50b   :  { %v3179_v35 = vadd.f32 %v3178_v4, %v2827_v26 }
 0x510   :  { %3275 = vmatmul.bf16.vlgmr.msrb.gmra.mxu3 %v5406_v63 }
 0x512   :  { %v3180_v32 = vpop.f32.mrf.mxu0 }
 0x513   :  { %v3181_v27 = vadd.f32 %v3180_v32, %v2827_v26 }
 0x518   :  { %3247 = vmatmul.bf16.vlgmr.msrb.gmra.mxu1 %v5398_v6 }
 0x51a   :  { %v3234_v36 = vpop.f32.mrf.mxu0 }
 0x51b   :  { %v3235_v52 = vadd.f32 %v3234_v36, %v2828_v16 }
 0x522   :  { %v3236_v18 = vpop.f32.mrf.mxu0 }
 0x523   :  { %v3237_v57 = vadd.f32 %v3236_v18, %v2828_v16  ;;  %v3348_v18 = vperm.slane %v7509_v2, 2 }
 0x55b   :  { %v3206_v37 = vpop.f32.mrf.mxu2 }
 0x563   :  { %v3208_v33 = vpop.f32.mrf.mxu2 }
 0x56b   :  { %v3262_v15 = vpop.f32.mrf.mxu2 }
 0x573   :  { %v3264_v58 = vpop.f32.mrf.mxu2 }
 0x583   :  { %v3220_v31 = vpop.f32.mrf.mxu3 }
 0x585   :  { %v3192_v47 = vpop.f32.mrf.mxu1 }
 0x586   :  { %v3193_v39 = vadd.f32 %v3192_v47, %v3179_v35 }
 0x588   :  { %v3207_v12 = vadd.f32 %v3206_v37, %v3193_v39 }
 0x58a   :  { %v3221_v54 = vadd.f32 %v3220_v31, %v3207_v12 }
 0x58b   :  { %v3222_v41 = vpop.f32.mrf.mxu3 }
 0x58c   :  { %v3281_v1 = vadd.f32 %v6673_v59, %v3221_v54 }
 0x58d   :  { %v3194_v9 = vpop.f32.mrf.mxu1 }
 0x58e   :  { %v3195_v20 = vadd.f32 %v3194_v9, %v3181_v27  ;;  %v3342_v27 = vperm.slane %v7509_v2, 1 }
 0x590   :  { %v3209_v25 = vadd.f32 %v3208_v33, %v3195_v20 }
 0x592   :  { %v3223_v24 = vadd.f32 %v3222_v41, %v3209_v25 }
 0x593   :  { %v3276_v17 = vpop.f32.mrf.mxu3 }
 0x594   :  { %v3283_v13 = vadd.f32 %v6675_v42, %v3223_v24 }
 0x595   :  { %v3248_v28 = vpop.f32.mrf.mxu1 }
 0x596   :  { %v3249_v56 = vadd.f32 %v3248_v28, %v3235_v52 }
 0x598   :  { %v3263_v10 = vadd.f32 %v3262_v15, %v3249_v56  ;;  %v3343_v56 = vperm.slane %v7512_v19, 1 }
 0x59a   :  { %v3277_v11 = vadd.f32 %v3276_v17, %v3263_v10 }
 0x59b   :  { %v3278_v40 = vpop.f32.mrf.mxu3 }
 0x59c   :  { %v3282_v29 = vadd.f32 %v6674_v0, %v3277_v11  ;;  %v3349_v11 = vperm.slane %v7512_v19, 2 }
 0x59d   :  { %v3250_v21 = vpop.f32.mrf.mxu1 }
 0x59e   :  { %v3251_v14 = vadd.f32 %v3250_v21, %v3237_v57  ;;  %v3285_v23 = vadd.f32 %v3282_v29, %v3281_v1 }
 0x5a0   :  { %v3265_v43 = vadd.f32 %v3264_v58, %v3251_v14  ;;  %3286 = vadd.xlane.f32.xlu2 %v3285_v23 }
 0x5a2   :  { %v3279_v38 = vadd.f32 %v3278_v40, %v3265_v43 }
 0x5a4   :  { %v3284_v48 = vadd.f32 %v6676_v30, %v3279_v38  ;;  %v5777_v30 = vld [vmem:[#allocation14 + $0xe0] sm:$0xf] }
 0x5a6   :  { %v3288_v34 = vadd.f32 %v3284_v48, %v3283_v13 }
 0x5a8   :  { %3289 = vadd.xlane.f32.xlu0 %v3288_v34  ;;  %v5905_v34 = vld [vmem:[#allocation14 + $0x1e0] sm:$0xf] }
 0x5a9   :  { %v5906_v46 = vor.u32 %v6497_v5, %v5905_v34  ;;  %v6483_v34 = vld [vmem:[#allocation14 + $0x184] sm:$0xf] }
 0x5ab   :  { %3826 = vmatpush.bf16.msra.mxu1 %v5906_v46  ;;  %v5841_v46 = vld [vmem:[#allocation14 + $0x160] sm:$0xf] }
 0x613   :  { %v3287_v49 = vpop.xlane.xlu2 %3286 }
 0x614   :  { %v3298_v51 = vmul.f32 %v7515_v50, %v3287_v49  ;;  %v6495_v49 = vld [vmem:[#allocation14 + $0x1e4] sm:$0xf] }
 0x616   :  { %v3300_v62 = vsub.f32 %v3281_v1, %v3298_v51  ;;  %v3301_v7 = vsub.f32 %v3282_v29, %v3298_v51  ;;  %v5907_v51 = vld [vmem:[#allocation14 + $0x1f0] sm:$0xf0] }
 0x618   :  { %v3304_v22 = vmul.f32 %v3300_v62, %v3300_v62  ;;  %v3305_v8 = vmul.f32 %v3301_v7, %v3301_v7 }
 0x61a   :  { %v3308_v53 = vadd.f32 %v3305_v8, %v3304_v22  ;;  %v6461_v22 = vld [vmem:[#allocation14 + $0xcc] sm:$0xf0]  ;;  %v5889_v8 = vld [vmem:[#allocation14 + $0x1c0] sm:$0xf] }
 0x61b   :  { %v3290_v63 = vpop.xlane.xlu0 %3289 }
 0x61c   :  { %v3299_v61 = vmul.f32 %v7515_v50, %v3290_v63  ;;  %3309 = vadd.xlane.f32.xlu1 %v3308_v53  ;;  %v6493_v53 = vld [vmem:[#allocation14 + $0x1cc] sm:$0xf0] }
 0x61e   :  { %v3302_v3 = vsub.f32 %v3283_v13, %v3299_v61  ;;  %v3303_v6 = vsub.f32 %v3284_v48, %v3299_v61  ;;  %v6465_v48 = vld [vmem:[#allocation14 + $0xec] sm:$0xf0]  ;;  %v5890_v61 = vor.u32 %v6493_v53, %v5889_v8  ;;  %v6479_v8 = vld [vmem:[#allocation14 + $0x164] sm:$0xf]  ;;  %v5843_v53 = vld [vmem:[#allocation14 + $0x170] sm:$0xf0] }
 0x61f   :  { %v5778_v60 = vor.u32 %v6465_v48, %v5777_v30 }
 0x620   :  { %v3306_v4 = vmul.f32 %v3302_v3, %v3302_v3  ;;  %v3307_v37 = vmul.f32 %v3303_v6, %v3303_v6  ;;  %3827 = vmatpush.bf16.msra.mxu1 %v5890_v61  ;;  %v5697_v61 = vld [vmem:[#allocation14 + $0x40] sm:$0xf] }
 0x621   :  { %3812 = vmatpush.bf16.msra.mxu0 %v5778_v60  ;;  %v5859_v60 = vld [vmem:[#allocation14 + $0x190] sm:$0xf0] }
 0x622   :  { %v3311_v31 = vadd.f32 %v3307_v37, %v3306_v4  ;;  %v6491_v4 = vld [vmem:[#allocation14 + $0x1c4] sm:$0xf]  ;;  %v5862_v5 = vor.u32 %v6483_v34, %v5859_v60  ;;  %v5913_v34 = vld [vmem:[#allocation14 + $0x1e8] sm:$0xf]  ;;  %v6498_v60 = vld [vmem:[#allocation14 + $0x1f4] sm:$0xf0] }
 0x623   :  { %v5914_v55 = vor.u32 %v6498_v60, %v5913_v34  ;;  %v6482_v34 = vld [vmem:[#allocation14 + $0x174] sm:$0xf0]  ;;  %v6448_v60 = vld [vmem:[#allocation14 + $0x6c] sm:$0xf] }
 0x624   :  { %3312 = vadd.xlane.f32.xlu2 %v3311_v31  ;;  %v5891_v31 = vld [vmem:[#allocation14 + $0x1d0] sm:$0xf0] }
 0x68f   :  { %v3310_v32 = vpop.xlane.xlu1 %3309 }
 0x690   :  { %v3314_v47 = vmul.f32 %v3310_v32, %v7515_v50  ;;  %v5894_v32 = vor.u32 %v6491_v4, %v5891_v31  ;;  %v6443_v31 = vld [vmem:[#allocation14 + $0x44] sm:$0xf] }
 0x692   :  { %v3316_v26 = vadd.f32 1e-05, %v3314_v47 }
 0x694   :  { %6645 = vrsqrt.f32 %v3316_v26  ;;  %vm3324_vm6 = vweird.f32 %v3316_v26 }
 0x697   :  { %v3313_v33 = vpop.xlane.xlu2 %3312 }
 0x698   :  { %v3315_v41 = vmul.f32 %v3313_v33, %v7515_v50 }
 0x69a   :  { %v6646_v9 = vpop.eup %6645  ;;  %v3317_v35 = vadd.f32 1e-05, %v3315_v41 }
 0x69b   :  { %v3319_v36 = vmul.f32 %v6646_v9, %v3316_v26  ;;  %vm3325_vm5 = vweird.f32 %v6646_v9 }
 0x69c   :  { %6647 = vrsqrt.f32 %v3317_v35  ;;  %vm3326_vm7 = vmor %vm3324_vm6, %vm3325_vm5  ;;  %vm3334_vm9 = vweird.f32 %v3317_v35 }
 0x69d   :  { %v3320_v16 = vmul.f32 %v6646_v9, %v3319_v36 }
 0x69f   :  { %v3321_v39 = vmul.f32 0.5, %v3320_v16 }
 0x6a1   :  { %v3322_v52 = vsub.f32 1.5, %v3321_v39 }
 0x6a2   :  { %v6648_v12 = vpop.eup %6647 }
 0x6a3   :  { %v3323_v15 = vmul.f32 %v6646_v9, %v3322_v52  ;;  %v3329_v28 = vmul.f32 %v6648_v12, %v3317_v35  ;;  %vm3335_vm8 = vweird.f32 %v6648_v12 }
 0x6a4   :  { %vm3336_vm10 = vmor %vm3334_vm9, %vm3335_vm8 }
 0x6a5   :  { %v3327_v17 = vsel %vm3326_vm7, %v6646_v9, %v3323_v15  ;;  %v3330_v54 = vmul.f32 %v6648_v12, %v3329_v28 }
 0x6a6   :  { %v3338_v20 = vmul.f32 %v3327_v17, %v3300_v62  ;;  %v3339_v10 = vmul.f32 %v3327_v17, %v3301_v7  ;;  %v5761_v62 = vld [vmem:[#allocation14 + $0xc0] sm:$0xf]  ;;  %v5910_v7 = vor.u32 %v6495_v49, %v5907_v51  ;;  %v6457_v17 = vld [vmem:[#allocation14 + $0xac] sm:$0xf0]  ;;  %v6447_v51 = vld [vmem:[#allocation14 + $0x64] sm:$0xf] }
 0x6a7   :  { %v3331_v57 = vmul.f32 0.5, %v3330_v54  ;;  %v5762_v63 = vor.u32 %v6461_v22, %v5761_v62  ;;  %v5873_v54 = vld [vmem:[#allocation14 + $0x1a0] sm:$0xf]  ;;  %v6481_v49 = vld [vmem:[#allocation14 + $0x16c] sm:$0xf0] }
 0x6a8   :  { %v3344_v25 = vmul.f32 %v3342_v27, %v3338_v20  ;;  %v3345_v59 = vmul.f32 %v3343_v56, %v3339_v10  ;;  %3854 = vmatpush.bf16.msra.mxu3 %v5910_v7  ;;  %v6489_v10 = vld [vmem:[#allocation14 + $0x1ac] sm:$0xf0]  ;;  %v5715_v62 = vld [vmem:[#allocation14 + $0x70] sm:$0xf0]  ;;  %v5842_v7 = vor.u32 %v6481_v49, %v5841_v46  ;;  %v5787_v46 = vld [vmem:[#allocation14 + $0xf8] sm:$0xf0] }
 0x6a9   :  { %v3332_v1 = vsub.f32 1.5, %v3331_v57  ;;  %3813 = vmatpush.bf16.msra.mxu0 %v5762_v63  ;;  %v5874_v57 = vor.u32 %v6489_v10, %v5873_v54  ;;  %v5718_v22 = vor.u32 %v6447_v51, %v5715_v62  ;;  %v5846_v63 = vor.u32 %v6479_v8, %v5843_v53  ;;  %v6471_v10 = vld [vmem:[#allocation14 + $0x124] sm:$0xf]  ;;  %v5915_v51 = vld [vmem:[#allocation14 + $0x1f8] sm:$0xf0] }
 0x6aa   :  { %v7525_v0 = vadd.f32 %v3348_v18, %v3344_v25  ;;  %v7527_v29 = vadd.f32 %v3349_v11, %v3345_v59  ;;  %v6487_v59 = vld [vmem:[#allocation14 + $0x1a4] sm:$0xf]  ;;  %v5790_v49 = vor.u32 %v6464_v44, %v5787_v46  ;;  %v5769_v62 = vld [vmem:[#allocation14 + $0xc8] sm:$0xf] }
 0x6ab   :  { %v3333_v21 = vmul.f32 %v6648_v12, %v3332_v1  ;;  %v5875_v1 = vld [vmem:[#allocation14 + $0x1b0] sm:$0xf0]  ;;  %3828 = vmatpush.bf16.msra.mxu1 %v5874_v57  ;;  %v5665_v57 = vld [vmem:[#allocation14] sm:$0xf]  ;;  %v5897_v53 = vld [vmem:[#allocation14 + $0x1c8] sm:$0xf] }
 0x6ac   :  { %v3354_v14 = vadd.f32 %v7527_v29, %v7525_v0  ;;  %3855 = vmatpush.bf16.msra.mxu3 %v5894_v32  ;;  %v5699_v32 = vld [vmem:[#allocation14 + $0x50] sm:$0xf0] }
 0x6ad   :  { %v3337_v23 = vsel %vm3336_vm10, %v6648_v12, %v3333_v21  ;;  %v5878_v21 = vor.u32 %v6487_v59, %v5875_v1  ;;  %v5793_v59 = vld [vmem:[#allocation14 + $0x100] sm:$0xf] }
 0x6ae   :  { %v3340_v58 = vmul.f32 %v3337_v23, %v3302_v3  ;;  %v3341_v24 = vmul.f32 %v3337_v23, %v3303_v6  ;;  %3355 = vadd.xlane.f32.xlu0 %v3354_v14  ;;  %v6459_v3 = vld [vmem:[#allocation14 + $0xc4] sm:$0xf]  ;;  %v5763_v6 = vld [vmem:[#allocation14 + $0xd0] sm:$0xf0]  ;;  %v5729_v14 = vld [vmem:[#allocation14 + $0x80] sm:$0xf] }
 0x6af   :  { %v5766_v37 = vor.u32 %v6459_v3, %v5763_v6  ;;  %v6453_v23 = vld [vmem:[#allocation14 + $0x8c] sm:$0xf0]  ;;  %v5825_v6 = vld [vmem:[#allocation14 + $0x140] sm:$0xf] }
 0x6b0   :  { %v3346_v43 = vmul.f32 %v3342_v27, %v3340_v58  ;;  %v3347_v40 = vmul.f32 %v3343_v56, %v3341_v24  ;;  %v5745_v56 = vld [vmem:[#allocation14 + $0xa0] sm:$0xf]  ;;  %3856 = vmatpush.bf16.msra.mxu3 %v5878_v21  ;;  %v5730_v24 = vor.u32 %v6453_v23, %v5729_v14  ;;  %v6445_v3 = vld [vmem:[#allocation14 + $0x4c] sm:$0xf0]  ;;  %v6435_v14 = vld [vmem:[#allocation14 + $0x4] sm:$0xf] }
 0x6b1   :  { %3841 = vmatpush.bf16.msra.mxu2 %v5766_v37  ;;  %v5746_v20 = vor.u32 %v6457_v17, %v5745_v56  ;;  %v5857_v58 = vld [vmem:[#allocation14 + $0x180] sm:$0xf]  ;;  %v5698_v4 = vor.u32 %v6445_v3, %v5697_v61  ;;  %v6477_v37 = vld [vmem:[#allocation14 + $0x14c] sm:$0xf0]  ;;  %v6439_v56 = vld [vmem:[#allocation14 + $0x24] sm:$0xf] }
 0x6b2   :  { %v7531_v38 = vadd.f32 %v3348_v18, %v3346_v43  ;;  %v7533_v42 = vadd.f32 %v3349_v11, %v3347_v40  ;;  %v6455_v18 = vld [vmem:[#allocation14 + $0xa4] sm:$0xf]  ;;  %v5747_v11 = vld [vmem:[#allocation14 + $0xb0] sm:$0xf0]  ;;  %v6485_v43 = vld [vmem:[#allocation14 + $0x18c] sm:$0xf0] }
 0x6b3   :  { %v5750_v25 = vor.u32 %v6455_v18, %v5747_v11  ;;  %3814 = vmatpush.bf16.msra.mxu0 %v5746_v20  ;;  %v6451_v40 = vld [vmem:[#allocation14 + $0x84] sm:$0xf]  ;;  %v5858_v30 = vor.u32 %v6485_v43, %v5857_v58  ;;  %v5683_v17 = vld [vmem:[#allocation14 + $0x30] sm:$0xf0]  ;;  %v6469_v21 = vld [vmem:[#allocation14 + $0x10c] sm:$0xf0] }
 0x6b4   :  { %v3357_v13 = vadd.f32 %v7533_v42, %v7531_v38  ;;  %3857 = vmatpush.bf16.msra.mxu3 %v5862_v5  ;;  %v5686_v20 = vor.u32 %v6439_v56, %v5683_v17  ;;  %v5811_v18 = vld [vmem:[#allocation14 + $0x130] sm:$0xf0]  ;;  %v5794_v58 = vor.u32 %v6469_v21, %v5793_v59  ;;  %v6467_v43 = vld [vmem:[#allocation14 + $0x104] sm:$0xf]  ;;  %v6460_v61 = vld [vmem:[#allocation14 + $0xcc] sm:$0xf] }
 0x6b5   :  { %3842 = vmatpush.bf16.msra.mxu2 %v5750_v25  ;;  %3829 = vmatpush.bf16.msra.mxu1 %v5858_v30  ;;  %v5814_v11 = vor.u32 %v6471_v10, %v5811_v18  ;;  %v6437_v25 = vld [vmem:[#allocation14 + $0xc] sm:$0xf0]  ;;  %v5667_v23 = vld [vmem:[#allocation14 + $0x10] sm:$0xf0]  ;;  %v6488_v56 = vld [vmem:[#allocation14 + $0x1ac] sm:$0xf] }
 0x6b6   :  { %3358 = vadd.xlane.f32.xlu1 %v3357_v13  ;;  %v5731_v13 = vld [vmem:[#allocation14 + $0x90] sm:$0xf0]  ;;  %v5666_v1 = vor.u32 %v6437_v25, %v5665_v57  ;;  %v5883_v17 = vld [vmem:[#allocation14 + $0x1b8] sm:$0xf0]  ;;  %v5737_v10 = vld [vmem:[#allocation14 + $0x88] sm:$0xf] }
 0x6b7   :  { %v5734_v48 = vor.u32 %v6451_v40, %v5731_v13  ;;  %3815 = vmatpush.bf16.msra.mxu0 %v5730_v24  ;;  %v5670_v24 = vor.u32 %v6435_v14, %v5667_v23  ;;  %v5795_v40 = vld [vmem:[#allocation14 + $0x110] sm:$0xf0]  ;;  %v5785_v13 = vld [vmem:[#allocation14 + $0xe8] sm:$0xf]  ;;  %v6454_v18 = vld [vmem:[#allocation14 + $0x94] sm:$0xf0] }
 0x6b8   :  { %3858 = vmatpush.bf16.msra.mxu3 %v5846_v63  ;;  %v5798_v30 = vor.u32 %v6467_v43, %v5795_v40  ;;  %v6494_v63 = vld [vmem:[#allocation14 + $0x1d4] sm:$0xf0]  ;;  %v5738_v25 = vor.u32 %v6454_v18, %v5737_v10  ;;  %v5739_v14 = vld [vmem:[#allocation14 + $0x98] sm:$0xf0]  ;;  %v6484_v23 = vld [vmem:[#allocation14 + $0x18c] sm:$0xf] }
 0x6b9   :  { %3843 = vmatpush.bf16.msra.mxu2 %v5734_v48  ;;  %3830 = vmatpush.bf16.msra.mxu1 %v5842_v7  ;;  %v6466_v48 = vld [vmem:[#allocation14 + $0xf4] sm:$0xf0]  ;;  %v5898_v3 = vor.u32 %v6494_v63, %v5897_v53  ;;  %v5721_v40 = vld [vmem:[#allocation14 + $0x68] sm:$0xf]  ;;  %v6444_v63 = vld [vmem:[#allocation14 + $0x4c] sm:$0xf] }
 0x6ba   :  { %v5786_v5 = vor.u32 %v6466_v48, %v5785_v13  ;;  %v6462_v7 = vld [vmem:[#allocation14 + $0xd4] sm:$0xf0]  ;;  %v5673_v10 = vld [vmem:[#allocation14 + $0x8] sm:$0xf] }
 0x6bb   :  { %3816 = vmatpush.bf16.msra.mxu0 %v5714_v45  ;;  %v6496_v45 = vld [vmem:[#allocation14 + $0x1ec] sm:$0xf]  ;;  %v5770_v8 = vor.u32 %v6462_v7, %v5769_v62  ;;  %v6486_v59 = vld [vmem:[#allocation14 + $0x194] sm:$0xf0] }
 0x6bc   :  { %v6450_v13 = vld [vmem:[#allocation14 + $0x74] sm:$0xf0] }
 0x6bd   :  { %3844 = vmatpush.bf16.msra.mxu2 %v5718_v22  ;;  %v5918_v22 = vor.u32 %v6496_v45, %v5915_v51  ;;  %v5722_v48 = vor.u32 %v6450_v13, %v5721_v40  ;;  %v6480_v45 = vld [vmem:[#allocation14 + $0x16c] sm:$0xf]  ;;  %v5705_v51 = vld [vmem:[#allocation14 + $0x48] sm:$0xf]  ;;  %v6478_v53 = vld [vmem:[#allocation14 + $0x154] sm:$0xf0] }
 0x6be   :  { %v6438_v18 = vld [vmem:[#allocation14 + $0x14] sm:$0xf0] }
 0x6bf   :  { %3817 = vmatpush.bf16.msra.mxu0 %v5698_v4  ;;  %v6492_v4 = vld [vmem:[#allocation14 + $0x1cc] sm:$0xf]  ;;  %v5674_v13 = vor.u32 %v6438_v18, %v5673_v10  ;;  %v6508_v10 = vld [vmem:[#allocation15 + $0x44] sm:$0xf0] }
 0x721   :  { %v3356_v47 = vpop.xlane.xlu0 %3355 }
 0x722   :  { %v3360_v26 = vmul.f32 %v3356_v47, %v7515_v50  ;;  %v5826_v47 = vor.u32 %v6477_v37, %v5825_v6  ;;  %v5771_v6 = vld [vmem:[#allocation14 + $0xd8] sm:$0xf0] }
 0x723   :  { %v5899_v37 = vld [vmem:[#allocation14 + $0x1d8] sm:$0xf0] }
 0x724   :  { %v7539_v33 = vsub.f32 %v7525_v0, %v3360_v26  ;;  %v7542_v41 = vsub.f32 %v7527_v29, %v3360_v26  ;;  %v5702_v26 = vor.u32 %v6443_v31, %v5699_v32  ;;  %3831 = vmatpush.bf16.msra.mxu1 %v5826_v47  ;;  %v5774_v31 = vor.u32 %v6460_v61, %v5771_v6  ;;  %v5753_v47 = vld [vmem:[#allocation14 + $0xa8] sm:$0xf]  ;;  %v5707_v61 = vld [vmem:[#allocation14 + $0x58] sm:$0xf0] }
 0x725   :  { %v5902_v32 = vor.u32 %v6492_v4, %v5899_v37 }
 0x726   :  { %v3366_v9 = vmul.f32 %v7539_v33, %v7539_v33  ;;  %v3367_v35 = vmul.f32 %v7542_v41, %v7542_v41  ;;  %3845 = vmatpush.bf16.msra.mxu2 %v5702_v26  ;;  %v6458_v26 = vld [vmem:[#allocation14 + $0xb4] sm:$0xf0] }
 0x728   :  { %v3370_v36 = vadd.f32 %v3367_v35, %v3366_v9  ;;  %v6475_v9 = vld [vmem:[#allocation14 + $0x144] sm:$0xf]  ;;  %v5827_v35 = vld [vmem:[#allocation14 + $0x150] sm:$0xf0] }
 0x729   :  { %v3359_v16 = vpop.xlane.xlu1 %3358 }
 0x72a   :  { %v3361_v39 = vmul.f32 %v3359_v16, %v7515_v50  ;;  %3371 = vadd.xlane.f32.xlu2 %v3370_v36  ;;  %v5830_v36 = vor.u32 %v6475_v9, %v5827_v35  ;;  %v5681_v16 = vld [vmem:[#allocation14 + $0x20] sm:$0xf]  ;;  %3846 = vmatpush.bf16.msra.mxu2 %v5686_v20  ;;  %v5881_v9 = vld [vmem:[#allocation14 + $0x1a8] sm:$0xf]  ;;  %v5754_v35 = vor.u32 %v6458_v26, %v5753_v47 }
 0x72b   :  { %v5886_v20 = vor.u32 %v6488_v56, %v5883_v17  ;;  %v5689_v47 = vld [vmem:[#allocation14 + $0x28] sm:$0xf]  ;;  %v6472_v56 = vld [vmem:[#allocation14 + $0x12c] sm:$0xf]  ;;  %v5819_v17 = vld [vmem:[#allocation14 + $0x138] sm:$0xf0] }
 0x72c   :  { %v7550_v52 = vsub.f32 %v7531_v38, %v3361_v39  ;;  %v7553_v12 = vsub.f32 %v7533_v42, %v3361_v39  ;;  %v6441_v39 = vld [vmem:[#allocation14 + $0x2c] sm:$0xf0]  ;;  %3859 = vmatpush.bf16.msra.mxu3 %v5830_v36  ;;  %v6490_v36 = vld [vmem:[#allocation14 + $0x1b4] sm:$0xf0] }
 0x72e   :  { %v3368_v15 = vmul.f32 %v7550_v52, %v7550_v52  ;;  %v3369_v28 = vmul.f32 %v7553_v12, %v7553_v12  ;;  %3847 = vmatpush.bf16.msra.mxu2 %v5670_v24 }
 0x730   :  { %v3373_v27 = vadd.f32 %v3369_v28, %v3368_v15  ;;  %v5809_v15 = vld [vmem:[#allocation14 + $0x120] sm:$0xf]  ;;  %v5682_v28 = vor.u32 %v6441_v39, %v5681_v16  ;;  %3860 = vmatpush.bf16.msra.mxu3 %v5814_v11  ;;  %v6456_v16 = vld [vmem:[#allocation14 + $0xac] sm:$0xf]  ;;  %v5755_v39 = vld [vmem:[#allocation14 + $0xb8] sm:$0xf0] }
 0x731   :  { %v5865_v11 = vld [vmem:[#allocation14 + $0x188] sm:$0xf] }
 0x732   :  { %3374 = vadd.xlane.f32.xlu0 %v3373_v27  ;;  %v6473_v27 = vld [vmem:[#allocation14 + $0x12c] sm:$0xf0]  ;;  %3818 = vmatpush.bf16.msra.mxu0 %v5682_v28  ;;  %v5882_v28 = vor.u32 %v6490_v36, %v5881_v9  ;;  %v5866_v21 = vor.u32 %v6486_v59, %v5865_v11  ;;  %v5710_v9 = vor.u32 %v6444_v63, %v5707_v61  ;;  %v5817_v36 = vld [vmem:[#allocation14 + $0x128] sm:$0xf] }
 0x733   :  { %v5810_v54 = vor.u32 %v6473_v27, %v5809_v15  ;;  %3896 = vmatpush.bf16.msrb.mxu2 %v5790_v49  ;;  %v5758_v27 = vor.u32 %v6456_v16, %v5755_v39  ;;  %v5851_v49 = vld [vmem:[#allocation14 + $0x178] sm:$0xf0]  ;;  %v6474_v16 = vld [vmem:[#allocation14 + $0x134] sm:$0xf0]  ;;  %v5801_v59 = vld [vmem:[#allocation14 + $0x108] sm:$0xf] }
 0x734   :  { %3861 = vmatpush.bf16.msra.mxu3 %v5798_v30  ;;  %v5849_v30 = vld [vmem:[#allocation14 + $0x168] sm:$0xf]  ;;  %v5854_v7 = vor.u32 %v6480_v45, %v5851_v49  ;;  %v3404_v49 = vperm.slane %v7509_v2, 3 }
 0x735   :  { %3832 = vmatpush.bf16.msra.mxu1 %v5810_v54  ;;  %v5850_v44 = vor.u32 %v6482_v34, %v5849_v30 }
 0x736   :  { %3819 = vmatpush.bf16.msra.mxu0 %v5666_v1  ;;  %v6452_v1 = vld [vmem:[#allocation14 + $0x8c] sm:$0xf] }
 0x737   :  { %3897 = vmatpush.bf16.msrb.mxu2 %v5774_v31  ;;  %v5742_v24 = vor.u32 %v6452_v1, %v5739_v14  ;;  %v6470_v1 = vld [vmem:[#allocation14 + $0x114] sm:$0xf0]  ;;  %v6436_v14 = vld [vmem:[#allocation14 + $0xc] sm:$0xf] }
 0x738   :  { %3910 = vmatpush.bf16.msrb.mxu3 %v5918_v22  ;;  %v6446_v22 = vld [vmem:[#allocation14 + $0x54] sm:$0xf0]  ;;  %v5802_v30 = vor.u32 %v6470_v1, %v5801_v59  ;;  %v5945_v1 = vld [vmem:[#allocation15 + $0x30] sm:$0xf] }
 0x739   :  { %3833 = vmatpush.bf16.msra.mxu1 %v5794_v58  ;;  %v5867_v58 = vld [vmem:[#allocation14 + $0x198] sm:$0xf0]  ;;  %v5706_v37 = vor.u32 %v6446_v22, %v5705_v51  ;;  %v3405_v51 = vperm.slane %v7512_v19, 3 }
 0x73a   :  { %3868 = vmatpush.bf16.msrb.mxu0 %v5786_v5  ;;  %v5870_v43 = vor.u32 %v6484_v23, %v5867_v58  ;;  %v5723_v5 = vld [vmem:[#allocation14 + $0x78] sm:$0xf0] }
 0x73b   :  { %3898 = vmatpush.bf16.msrb.mxu2 %v5758_v27  ;;  %v5726_v46 = vor.u32 %v6448_v60, %v5723_v5  ;;  %v5675_v23 = vld [vmem:[#allocation14 + $0x18] sm:$0xf0] }
 0x73c   :  { %3911 = vmatpush.bf16.msrb.mxu3 %v5902_v32  ;;  %v5835_v32 = vld [vmem:[#allocation14 + $0x158] sm:$0xf0]  ;;  %v5678_v60 = vor.u32 %v6436_v14, %v5675_v23  ;;  %v6105_v23 = vld [vmem:[#allocation15 + $0x170] sm:$0xf] }
 0x73d   :  { %3882 = vmatpush.bf16.msrb.mxu1 %v5914_v55 }
 0x73e   :  { %3869 = vmatpush.bf16.msrb.mxu0 %v5770_v8  ;;  %v5833_v8 = vld [vmem:[#allocation14 + $0x148] sm:$0xf] }
 0x73f   :  { %3899 = vmatpush.bf16.msrb.mxu2 %v5742_v24  ;;  %v5834_v31 = vor.u32 %v6478_v53, %v5833_v8  ;;  %v6468_v24 = vld [vmem:[#allocation14 + $0x10c] sm:$0xf]  ;;  %v3411_v8 = vperm.slane %v7512_v19, 4 }
 0x740   :  { %3912 = vmatpush.bf16.msrb.mxu3 %v5886_v20  ;;  %v5818_v20 = vor.u32 %v6474_v16, %v5817_v36 }
 0x741   :  { %3883 = vmatpush.bf16.msrb.mxu1 %v5898_v3  ;;  %v6476_v3 = vld [vmem:[#allocation14 + $0x14c] sm:$0xf] }
 0x742   :  { %3870 = vmatpush.bf16.msrb.mxu0 %v5754_v35  ;;  %v6442_v35 = vld [vmem:[#allocation14 + $0x34] sm:$0xf0]  ;;  %v5838_v39 = vor.u32 %v6476_v3, %v5835_v32 }
 0x743   :  { %3900 = vmatpush.bf16.msrb.mxu2 %v5726_v46  ;;  %v6514_v32 = vld [vmem:[#allocation15 + $0x74] sm:$0xf0] }
 0x744   :  { %3913 = vmatpush.bf16.msrb.mxu3 %v5870_v43  ;;  %v5803_v43 = vld [vmem:[#allocation14 + $0x118] sm:$0xf0] }
 0x745   :  { %3884 = vmatpush.bf16.msrb.mxu1 %v5882_v28  ;;  %v5691_v28 = vld [vmem:[#allocation14 + $0x38] sm:$0xf0]  ;;  %v5806_v5 = vor.u32 %v6468_v24, %v5803_v43  ;;  %v6017_v43 = vld [vmem:[#allocation15 + $0xc0] sm:$0xf] }
 0x746   :  { %3871 = vmatpush.bf16.msrb.mxu0 %v5738_v25 }
 0x747   :  { %3901 = vmatpush.bf16.msrb.mxu2 %v5710_v9 }
 0x748   :  { %3914 = vmatpush.bf16.msrb.mxu3 %v5854_v7 }
 0x749   :  { %3885 = vmatpush.bf16.msrb.mxu1 %v5866_v21  ;;  %v5822_v21 = vor.u32 %v6472_v56, %v5819_v17  ;;  %v6033_v56 = vld [vmem:[#allocation15 + $0xe0] sm:$0xf]  ;;  %v6528_v17 = vld [vmem:[#allocation15 + $0xe4] sm:$0xf0] }
 0x74a   :  { %3872 = vmatpush.bf16.msrb.mxu0 %v5722_v48 }
 0x74c   :  { %3915 = vmatpush.bf16.msrb.mxu3 %v5838_v39  ;;  %v5969_v39 = vld [vmem:[#allocation15 + $0x60] sm:$0xf] }
 0x74d   :  { %3886 = vmatpush.bf16.msrb.mxu1 %v5850_v44 }
 0x74e   :  { %3873 = vmatpush.bf16.msrb.mxu0 %v5706_v37 }
 0x750   :  { %3916 = vmatpush.bf16.msrb.mxu3 %v5822_v21  ;;  %v6506_v21 = vld [vmem:[#allocation15 + $0x34] sm:$0xf0] }
 0x751   :  { %3887 = vmatpush.bf16.msrb.mxu1 %v5834_v31  ;;  %v5946_v14 = vor.u32 %v6506_v21, %v5945_v1  ;;  %v6529_v1 = vld [vmem:[#allocation15 + $0xf4] sm:$0xf]  ;;  %v6043_v21 = vld [vmem:[#allocation15 + $0xf8] sm:$0xf0] }
 0x754   :  { %3917 = vmatpush.bf16.msrb.mxu3 %v5806_v5  ;;  %v6544_v5 = vld [vmem:[#allocation15 + $0x164] sm:$0xf0] }
 0x755   :  { %3888 = vmatpush.bf16.msrb.mxu1 %v5818_v20  ;;  %v5953_v20 = vld [vmem:[#allocation15 + $0x40] sm:$0xf] }
 0x756   :  { %v5954_v18 = vor.u32 %v6508_v10, %v5953_v20  ;;  %v5985_v10 = vld [vmem:[#allocation15 + $0x80] sm:$0xf] }
 0x759   :  { %3889 = vmatpush.bf16.msrb.mxu1 %v5802_v30  ;;  %v5937_v30 = vld [vmem:[#allocation15 + $0x20] sm:$0xf] }
 0x79d   :  { %v3372_v15 = vpop.xlane.xlu2 %3371 }
 0x79e   :  { %v3376_v54 = vmul.f32 %v3372_v15, %v7515_v50  ;;  %v6440_v15 = vld [vmem:[#allocation14 + $0x2c] sm:$0xf] }
 0x79f   :  { %v5694_v25 = vor.u32 %v6440_v15, %v5691_v28  ;;  %v6512_v15 = vld [vmem:[#allocation15 + $0x64] sm:$0xf0]  ;;  %v6510_v28 = vld [vmem:[#allocation15 + $0x54] sm:$0xf0] }
 0x7a0   :  { %v7560_v57 = vadd.f32 1e-05, %v3376_v54  ;;  %v5690_v54 = vor.u32 %v6442_v35, %v5689_v47  ;;  %v6530_v47 = vld [vmem:[#allocation15 + $0xf4] sm:$0xf0] }
 0x7a1   :  { %3902 = vmatpush.bf16.msrb.mxu2 %v5694_v25  ;;  %v6526_v25 = vld [vmem:[#allocation15 + $0xd4] sm:$0xf0] }
 0x7a2   :  { %6649 = vrsqrt.f32 %v7560_v57  ;;  %3874 = vmatpush.bf16.msrb.mxu0 %v5690_v54  ;;  %vm3386_vm12 = vweird.f32 %v7560_v57  ;;  %v6034_v54 = vor.u32 %v6528_v17, %v6033_v56  ;;  %v6511_v17 = vld [vmem:[#allocation15 + $0x64] sm:$0xf] }
 0x7a5   :  { %v3375_v55 = vpop.xlane.xlu0 %3374  ;;  %3903 = vmatpush.bf16.msrb.mxu2 %v5678_v60 }
 0x7a6   :  { %v3377_v62 = vmul.f32 %v3375_v55, %v7515_v50  ;;  %3875 = vmatpush.bf16.msrb.mxu0 %v5674_v13 }
 0x7a8   :  { %v6650_v6 = vpop.eup %6649  ;;  %v7564_v4 = vadd.f32 1e-05, %v3377_v62 }
 0x7a9   :  { %v3381_v26 = vmul.f32 %v6650_v6, %v7560_v57  ;;  %vm3387_vm11 = vweird.f32 %v6650_v6  ;;  %v3410_v57 = vperm.slane %v7509_v2, 4 }
 0x7aa   :  { %6651 = vrsqrt.f32 %v7564_v4  ;;  %vm3388_vm13 = vmor %vm3386_vm12, %vm3387_vm11  ;;  %vm3396_vm15 = vweird.f32 %v7564_v4 }
 0x7ab   :  { %v3382_v27 = vmul.f32 %v6650_v6, %v3381_v26 }
 0x7ad   :  { %v3383_v11 = vmul.f32 0.5, %v3382_v27 }
 0x7af   :  { %v3384_v58 = vsub.f32 1.5, %v3383_v11  ;;  %v6025_v11 = vld [vmem:[#allocation15 + $0xd0] sm:$0xf] }
 0x7b0   :  { %v6652_v40 = vpop.eup %6651  ;;  %v6026_v59 = vor.u32 %v6526_v25, %v6025_v11  ;;  %v6145_v11 = vld [vmem:[#allocation15 + $0x1c0] sm:$0xf] }
 0x7b1   :  { %v3385_v48 = vmul.f32 %v6650_v6, %v3384_v58  ;;  %v3391_v34 = vmul.f32 %v6652_v40, %v7564_v4  ;;  %vm3397_vm14 = vweird.f32 %v6652_v40  ;;  %v6546_v58 = vld [vmem:[#allocation15 + $0x174] sm:$0xf0] }
 0x7b2   :  { %vm3398_vm0 = vmor %vm3396_vm15, %vm3397_vm14  ;;  %v6106_v24 = vor.u32 %v6546_v58, %v6105_v23  ;;  %v6046_v58 = vor.u32 %v6529_v1, %v6043_v21 }
 0x7b3   :  { %v3392_v55 = vmul.f32 %v6652_v40, %v3391_v34  ;;  %v3389_v44 = vsel %vm3388_vm13, %v6650_v6, %v3385_v48  ;;  %v6504_v48 = vld [vmem:[#allocation15 + $0x24] sm:$0xf0]  ;;  %v6097_v34 = vld [vmem:[#allocation15 + $0x160] sm:$0xf] }
 0x7b4   :  { %v3400_v62 = vmul.f32 %v3389_v44, %v7539_v33  ;;  %v3401_v7 = vmul.f32 %v3389_v44, %v7542_v41  ;;  %v5977_v33 = vld [vmem:[#allocation15 + $0x70] sm:$0xf]  ;;  %v5938_v60 = vor.u32 %v6504_v48, %v5937_v30  ;;  %v5963_v30 = vld [vmem:[#allocation15 + $0x58] sm:$0xf0] }
 0x7b5   :  { %v3393_v46 = vmul.f32 0.5, %v3392_v55  ;;  %v6041_v41 = vld [vmem:[#allocation15 + $0xf0] sm:$0xf]  ;;  %v5978_v19 = vor.u32 %v6514_v32, %v5977_v33  ;;  %v6098_v55 = vor.u32 %v6544_v5, %v6097_v34  ;;  %v5921_v32 = vld [vmem:[#allocation15] sm:$0xf] }
 0x7b6   :  { %v3406_v63 = vmul.f32 %v3404_v49, %v3400_v62  ;;  %v3407_v61 = vmul.f32 %v3405_v51, %v3401_v7  ;;  %v6042_v16 = vor.u32 %v6530_v47, %v6041_v41  ;;  %v6009_v44 = vld [vmem:[#allocation15 + $0xb0] sm:$0xf]  ;;  %v6500_v41 = vld [vmem:[#allocation15 + $0x4] sm:$0xf0]  ;;  %v6081_v47 = vld [vmem:[#allocation15 + $0x140] sm:$0xf] }
 0x7b7   :  { %v3394_v45 = vsub.f32 1.5, %v3393_v46  ;;  %v6522_v46 = vld [vmem:[#allocation15 + $0xb4] sm:$0xf0]  ;;  %v5929_v7 = vld [vmem:[#allocation15 + $0x10] sm:$0xf] }
 0x7b8   :  { %v3412_v26 = vadd.f32 %v3410_v57, %v3406_v63  ;;  %v3413_v4 = vadd.f32 %v3411_v8, %v3407_v61  ;;  %v6001_v61 = vld [vmem:[#allocation15 + $0xa0] sm:$0xf]  ;;  %v6137_v34 = vld [vmem:[#allocation15 + $0x1b0] sm:$0xf] }
 0x7b9   :  { %v3395_v22 = vmul.f32 %v6652_v40, %v3394_v45  ;;  %v6169_v45 = vld [vmem:[#allocation15 + $0x1f0] sm:$0xf] }
 0x7bb   :  { %v3399_v53 = vsel %vm3398_vm0, %v6652_v40, %v3395_v22  ;;  %v6524_v40 = vld [vmem:[#allocation15 + $0xc4] sm:$0xf0]  ;;  %v6502_v22 = vld [vmem:[#allocation15 + $0x14] sm:$0xf0] }
 0x7bc   :  { %v3402_v3 = vmul.f32 %v3399_v53, %v7550_v52  ;;  %v3403_v6 = vmul.f32 %v3399_v53, %v7553_v12  ;;  %v5970_v52 = vor.u32 %v6512_v15, %v5969_v39  ;;  %v5961_v12 = vld [vmem:[#allocation15 + $0x50] sm:$0xf]  ;;  %v6018_v13 = vor.u32 %v6524_v40, %v6017_v43  ;;  %v6542_v53 = vld [vmem:[#allocation15 + $0x154] sm:$0xf0]  ;;  %v6536_v43 = vld [vmem:[#allocation15 + $0x124] sm:$0xf0] }
 0x7bd   :  { %v5962_v27 = vor.u32 %v6510_v28, %v5961_v12  ;;  %v6153_v39 = vld [vmem:[#allocation15 + $0x1d0] sm:$0xf] }
 0x7be   :  { %v3408_v37 = vmul.f32 %v3404_v49, %v3402_v3  ;;  %v3409_v31 = vmul.f32 %v3405_v51, %v3403_v6  ;;  %v6010_v49 = vor.u32 %v6522_v46, %v6009_v44  ;;  %v6562_v51 = vld [vmem:[#allocation15 + $0x1f4] sm:$0xf0]  ;;  %v6520_v3 = vld [vmem:[#allocation15 + $0xa4] sm:$0xf0]  ;;  %v6073_v28 = vld [vmem:[#allocation15 + $0x130] sm:$0xf] }
 0x7bf   :  { %v6170_v62 = vor.u32 %v6562_v51, %v6169_v45  ;;  %v6002_v6 = vor.u32 %v6520_v3, %v6001_v61  ;;  %v6527_v44 = vld [vmem:[#allocation15 + $0xe4] sm:$0xf]  ;;  %v6035_v46 = vld [vmem:[#allocation15 + $0xe8] sm:$0xf0]  ;;  %v6534_v51 = vld [vmem:[#allocation15 + $0x114] sm:$0xf0] }
 0x7c0   :  { %v3414_v9 = vadd.f32 %v3410_v57, %v3408_v37  ;;  %v3415_v35 = vadd.f32 %v3411_v8, %v3409_v31  ;;  %v6089_v57 = vld [vmem:[#allocation15 + $0x150] sm:$0xf]  ;;  %v5930_v8 = vor.u32 %v6502_v22, %v5929_v7  ;;  %v6161_v37 = vld [vmem:[#allocation15 + $0x1e0] sm:$0xf]  ;;  %v6560_v31 = vld [vmem:[#allocation15 + $0x1e4] sm:$0xf0]  ;;  %v6038_v45 = vor.u32 %v6527_v44, %v6035_v46 }
 0x7c1   :  { %v6090_v63 = vor.u32 %v6542_v53, %v6089_v57  ;;  %v6162_v33 = vor.u32 %v6560_v31, %v6161_v37  ;;  %v6507_v7 = vld [vmem:[#allocation15 + $0x44] sm:$0xf]  ;;  %v5955_v22 = vld [vmem:[#allocation15 + $0x48] sm:$0xf0]  ;;  %v6552_v61 = vld [vmem:[#allocation15 + $0x1a4] sm:$0xf0] }
 0x7c2   :  { %v3416_v2 = vpack.c.bf16 %v3414_v9, %v3412_v26  ;;  %v3417_v36 = vpack.c.bf16 %v3415_v35, %v3413_v4  ;;  %v5922_v26 = vor.u32 %v6500_v41, %v5921_v32  ;;  %v6540_v4 = vld [vmem:[#allocation15 + $0x144] sm:$0xf0]  ;;  %v6513_v9 = vld [vmem:[#allocation15 + $0x74] sm:$0xf]  ;;  %v5979_v35 = vld [vmem:[#allocation15 + $0x78] sm:$0xf0]  ;;  %v5958_v53 = vor.u32 %v6507_v7, %v5955_v22 }
 0x7c3   :  { %v6525_v37 = vld [vmem:[#allocation15 + $0xd4] sm:$0xf]  ;;  %v6027_v31 = vld [vmem:[#allocation15 + $0xd8] sm:$0xf0]  ;;  %v6049_v41 = vld [vmem:[#allocation15 + $0x100] sm:$0xf] }
 0x7c4   :  { %3820 = vmatmul.bf16.vlgmr.msra.gmra.mxu0 %v3416_v2  ;;  %3834 = vmatmul.bf16.vlgmr.msra.gmra.mxu1 %v3417_v36  ;;  %v6030_v32 = vor.u32 %v6525_v37, %v6027_v31  ;;  %v6171_v46 = vld [vmem:[#allocation15 + $0x1f8] sm:$0xf0]  ;;  %v6519_v37 = vld [vmem:[#allocation15 + $0xa4] sm:$0xf]  ;;  %v6003_v31 = vld [vmem:[#allocation15 + $0xa8] sm:$0xf0] }
 0x7c5   :  { %3848 = vmatmul.bf16.vlgmr.msra.gmra.mxu2 %v3416_v2  ;;  %3862 = vmatmul.bf16.vlgmr.msra.gmra.mxu3 %v3417_v36  ;;  %v5931_v7 = vld [vmem:[#allocation15 + $0x18] sm:$0xf0] }
 0x7c6   :  { %4386 = vmatpush.bf16.msra.mxu0 %v5978_v19  ;;  %4400 = vmatpush.bf16.msra.mxu1 %v6042_v16  ;;  %v5993_v19 = vld [vmem:[#allocation15 + $0x90] sm:$0xf]  ;;  %v6518_v16 = vld [vmem:[#allocation15 + $0x94] sm:$0xf0] }
 0x7c7   :  { %4414 = vmatpush.bf16.msra.mxu2 %v6106_v24  ;;  %4428 = vmatpush.bf16.msra.mxu3 %v6170_v62  ;;  %v5994_v15 = vor.u32 %v6518_v16, %v5993_v19  ;;  %v6065_v24 = vld [vmem:[#allocation15 + $0x120] sm:$0xf]  ;;  %v6107_v19 = vld [vmem:[#allocation15 + $0x178] sm:$0xf0]  ;;  %v6121_v16 = vld [vmem:[#allocation15 + $0x190] sm:$0xf] }
 0x7c8   :  { %v6066_v40 = vor.u32 %v6536_v43, %v6065_v24  ;;  %v6548_v24 = vld [vmem:[#allocation15 + $0x184] sm:$0xf0] }
 0x7ca   :  { %4387 = vmatpush.bf16.msra.mxu0 %v5970_v52  ;;  %4401 = vmatpush.bf16.msra.mxu1 %v6034_v54  ;;  %v6558_v52 = vld [vmem:[#allocation15 + $0x1d4] sm:$0xf0]  ;;  %v5971_v54 = vld [vmem:[#allocation15 + $0x68] sm:$0xf0] }
 0x7cb   :  { %4415 = vmatpush.bf16.msra.mxu2 %v6098_v55  ;;  %4429 = vmatpush.bf16.msra.mxu3 %v6162_v33  ;;  %v6154_v12 = vor.u32 %v6558_v52, %v6153_v39  ;;  %v5974_v20 = vor.u32 %v6511_v17, %v5971_v54  ;;  %v6550_v39 = vld [vmem:[#allocation15 + $0x194] sm:$0xf0] }
 0x7ce   :  { %4388 = vmatpush.bf16.msra.mxu0 %v5962_v27  ;;  %4402 = vmatpush.bf16.msra.mxu1 %v6026_v59  ;;  %v6538_v27 = vld [vmem:[#allocation15 + $0x134] sm:$0xf0]  ;;  %v6556_v59 = vld [vmem:[#allocation15 + $0x1c4] sm:$0xf0] }
 0x7cf   :  { %4416 = vmatpush.bf16.msra.mxu2 %v6090_v63  ;;  %v6074_v56 = vor.u32 %v6538_v27, %v6073_v28  ;;  %4430 = vmatpush.bf16.msra.mxu3 %v6154_v12  ;;  %v6146_v23 = vor.u32 %v6556_v59, %v6145_v11  ;;  %v6129_v63 = vld [vmem:[#allocation15 + $0x1a0] sm:$0xf]  ;;  %v6122_v12 = vor.u32 %v6550_v39, %v6121_v16  ;;  %v6523_v28 = vld [vmem:[#allocation15 + $0xc4] sm:$0xf]  ;;  %v6019_v27 = vld [vmem:[#allocation15 + $0xc8] sm:$0xf0] }
 0x7d0   :  { %v6543_v11 = vld [vmem:[#allocation15 + $0x164] sm:$0xf] }
 0x7d2   :  { %4389 = vmatpush.bf16.msra.mxu0 %v5954_v18  ;;  %4403 = vmatpush.bf16.msra.mxu1 %v6018_v13  ;;  %v6516_v18 = vld [vmem:[#allocation15 + $0x84] sm:$0xf0]  ;;  %v6509_v13 = vld [vmem:[#allocation15 + $0x54] sm:$0xf] }
 0x7d3   :  { %v5986_v25 = vor.u32 %v6516_v18, %v5985_v10  ;;  %4431 = vmatpush.bf16.msra.mxu3 %v6146_v23  ;;  %v5966_v48 = vor.u32 %v6509_v13, %v5963_v30  ;;  %v6503_v10 = vld [vmem:[#allocation15 + $0x24] sm:$0xf]  ;;  %v5939_v18 = vld [vmem:[#allocation15 + $0x28] sm:$0xf0] }
 0x7d4   :  { %3876 = vmatmul.bf16.vlgmr.msrb.gmra.mxu0 %v3416_v2  ;;  %3890 = vmatmul.bf16.vlgmr.msrb.gmra.mxu1 %v3417_v36  ;;  %v5942_v21 = vor.u32 %v6503_v10, %v5939_v18  ;;  %v6099_v23 = vld [vmem:[#allocation15 + $0x168] sm:$0xf0]  ;;  %v5995_v10 = vld [vmem:[#allocation15 + $0x98] sm:$0xf0]  ;;  %v6557_v18 = vld [vmem:[#allocation15 + $0x1d4] sm:$0xf] }
 0x7d5   :  { %3904 = vmatmul.bf16.vlgmr.msrb.gmra.mxu2 %v3416_v2  ;;  %3918 = vmatmul.bf16.vlgmr.msrb.gmra.mxu3 %v3417_v36  ;;  %v6082_v2 = vor.u32 %v6540_v4, %v6081_v47  ;;  %v5982_v36 = vor.u32 %v6513_v9, %v5979_v35  ;;  %v6532_v47 = vld [vmem:[#allocation15 + $0x104] sm:$0xf0]  ;;  %v6505_v9 = vld [vmem:[#allocation15 + $0x34] sm:$0xf]  ;;  %v5947_v35 = vld [vmem:[#allocation15 + $0x38] sm:$0xf0]  ;;  %v6102_v13 = vor.u32 %v6543_v11, %v6099_v23 }
 0x7d6   :  { %4390 = vmatpush.bf16.msra.mxu0 %v5946_v14  ;;  %4404 = vmatpush.bf16.msra.mxu1 %v6010_v49  ;;  %v7582_v14 = vld [vmem:[%s7686_s9] sm:$0xf]  ;;  %v6057_v49 = vld [vmem:[#allocation15 + $0x110] sm:$0xf]  ;;  %v6050_v4 = vor.u32 %v6532_v47, %v6049_v41  ;;  %s6946_s9 = smov [#allocation18]  }
 0x7d7   :  { %4417 = vmatpush.bf16.msra.mxu2 %v6082_v2  ;;  %v3484_v5 = vperm.slane %v7582_v14, 0  ;;  %v6058_v62 = vor.u32 %v6534_v51, %v6057_v49  ;;  %v3485_v33 = vperm.slane %v7582_v14, 1  ;;  %v6545_v2 = vld [vmem:[#allocation15 + $0x174] sm:$0xf]  ;;  %s4572_s15 = sshll.u32 %s6946_s9, 4  ;;  %s4573_s15 = int_to_ptr.vmem [resolvable:$true] %s4572_s15 }
 0x7d8   :  { %v6110_v52 = vor.u32 %v6545_v2, %v6107_v19  ;;  %v6499_v2 = vld [vmem:[#allocation15 + $0x4] sm:$0xf] }
 0x7da   :  { %4391 = vmatpush.bf16.msra.mxu0 %v5938_v60  ;;  %4405 = vmatpush.bf16.msra.mxu1 %v6002_v6  ;;  %v6554_v60 = vld [vmem:[#allocation15 + $0x1b4] sm:$0xf0]  ;;  %v6130_v6 = vor.u32 %v6552_v61, %v6129_v63  ;;  %v3486_v61 = vperm.slane %v7582_v14, 2 }
 0x7db   :  { %4418 = vmatpush.bf16.msra.mxu2 %v6074_v56  ;;  %v6138_v55 = vor.u32 %v6554_v60, %v6137_v34  ;;  %v6011_v34 = vld [vmem:[#allocation15 + $0xb8] sm:$0xf0]  ;;  %v6561_v60 = vld [vmem:[#allocation15 + $0x1f4] sm:$0xf] }
 0x7dc   :  { %v6174_v51 = vor.u32 %v6561_v60, %v6171_v46  ;;  %v5987_v46 = vld [vmem:[#allocation15 + $0x88] sm:$0xf0] }
 0x7dd   :  { %4432 = vmatpush.bf16.msra.mxu3 %v6138_v55 }
 0x7de   :  { %4392 = vmatpush.bf16.msra.mxu0 %v5930_v8  ;;  %4406 = vmatpush.bf16.msra.mxu1 %v5994_v15 }
 0x7df   :  { %4419 = vmatpush.bf16.msra.mxu2 %v6066_v40 }
 0x7e1   :  { %4433 = vmatpush.bf16.msra.mxu3 %v6130_v6 }
 0x7e2   :  { %4393 = vmatpush.bf16.msra.mxu0 %v5922_v26  ;;  %4407 = vmatpush.bf16.msra.mxu1 %v5986_v25 }
 0x7e3   :  { %4420 = vmatpush.bf16.msra.mxu2 %v6058_v62  ;;  %v6501_v62 = vld [vmem:[#allocation15 + $0x14] sm:$0xf] }
 0x7e5   :  { %4434 = vmatpush.bf16.msra.mxu3 %v6122_v12 }
 0x7e6   :  { %4442 = vmatpush.bf16.msrb.mxu0 %v5982_v36  ;;  %4456 = vmatpush.bf16.msrb.mxu1 %v6046_v58  ;;  %v5950_v36 = vor.u32 %v6505_v9, %v5947_v35  ;;  %v6113_v58 = vld [vmem:[#allocation15 + $0x180] sm:$0xf]  ;;  %v6006_v9 = vor.u32 %v6519_v37, %v6003_v31  ;;  %v6163_v35 = vld [vmem:[#allocation15 + $0x1e8] sm:$0xf0] }
 0x7e7   :  { %4421 = vmatpush.bf16.msra.mxu2 %v6050_v4  ;;  %v6114_v30 = vor.u32 %v6548_v24, %v6113_v58  ;;  %v6537_v58 = vld [vmem:[#allocation15 + $0x134] sm:$0xf]  ;;  %v6075_v24 = vld [vmem:[#allocation15 + $0x138] sm:$0xf0]  ;;  %v6067_v37 = vld [vmem:[#allocation15 + $0x128] sm:$0xf0] }
 0x7e9   :  { %4435 = vmatpush.bf16.msra.mxu3 %v6114_v30 }
 0x7ea   :  { %4443 = vmatpush.bf16.msrb.mxu0 %v5974_v20  ;;  %4457 = vmatpush.bf16.msrb.mxu1 %v6038_v45  ;;  %v6022_v20 = vor.u32 %v6523_v28, %v6019_v27  ;;  %v6539_v28 = vld [vmem:[#allocation15 + $0x144] sm:$0xf]  ;;  %v6083_v27 = vld [vmem:[#allocation15 + $0x148] sm:$0xf0] }
 0x7eb   :  { %4470 = vmatpush.bf16.msrb.mxu2 %v6110_v52 }
 0x7ed   :  { %4484 = vmatpush.bf16.msrb.mxu3 %v6174_v51 }
 0x7ee   :  { %4444 = vmatpush.bf16.msrb.mxu0 %v5966_v48  ;;  %4458 = vmatpush.bf16.msrb.mxu1 %v6030_v32  ;;  %v6521_v48 = vld [vmem:[#allocation15 + $0xb4] sm:$0xf]  ;;  %v6559_v32 = vld [vmem:[#allocation15 + $0x1e4] sm:$0xf] }
 0x7ef   :  { %v6014_v44 = vor.u32 %v6521_v48, %v6011_v34  ;;  %4471 = vmatpush.bf16.msrb.mxu2 %v6102_v13  ;;  %v6166_v52 = vor.u32 %v6559_v32, %v6163_v35  ;;  %v6078_v13 = vor.u32 %v6537_v58, %v6075_v24 }
 0x7f1   :  { %4485 = vmatpush.bf16.msrb.mxu3 %v6166_v52 }
 0x7f2   :  { %4445 = vmatpush.bf16.msrb.mxu0 %v5958_v53  ;;  %4459 = vmatpush.bf16.msrb.mxu1 %v6022_v20  ;;  %v6517_v20 = vld [vmem:[#allocation15 + $0x94] sm:$0xf] }
 0x7f6   :  { %4446 = vmatpush.bf16.msrb.mxu0 %v5950_v36  ;;  %4460 = vmatpush.bf16.msrb.mxu1 %v6014_v44  ;;  %v5923_v36 = vld [vmem:[#allocation15 + $0x8] sm:$0xf0]  ;;  %v6515_v44 = vld [vmem:[#allocation15 + $0x84] sm:$0xf] }
 0x7f7   :  { %v5926_v12 = vor.u32 %v6499_v2, %v5923_v36 }
 0x7fa   :  { %4447 = vmatpush.bf16.msrb.mxu0 %v5942_v21  ;;  %4461 = vmatpush.bf16.msrb.mxu1 %v6006_v9 }
 0x841   :  { %v3821_v57 = vpop.f32.mrf.mxu0  ;;  %v3835_v8 = vpop.f32.mrf.mxu1 }
 0x842   :  { %v3822_v3 = vadd.f32 %v3821_v57, %v3484_v5  ;;  %v5934_v57 = vor.u32 %v6501_v62, %v5931_v7  ;;  %v5990_v7 = vor.u32 %v6515_v44, %v5987_v46 }
 0x844   :  { %v7588_v26 = vadd.f32 %v3835_v8, %v3822_v3  ;;  %v6091_v8 = vld [vmem:[#allocation15 + $0x158] sm:$0xf0]  ;;  %4448 = vmatpush.bf16.msrb.mxu0 %v5934_v57  ;;  %v6535_v57 = vld [vmem:[#allocation15 + $0x124] sm:$0xf] }
 0x846   :  { %v3932_v15 = vmul.f32 0.044715, %v7588_v26 }
 0x848   :  { %v3940_v56 = vmul.f32 %v3932_v15, %v7588_v26  ;;  %v3849_v17 = vpop.f32.mrf.mxu2  ;;  %v3863_v54 = vpop.f32.mrf.mxu3  ;;  %4449 = vmatpush.bf16.msrb.mxu0 %v5926_v12 }
 0x849   :  { %v3850_v25 = vadd.f32 %v3849_v17, %v3485_v33  ;;  %v3823_v59 = vpop.f32.mrf.mxu0  ;;  %v3837_v1 = vpop.f32.mrf.mxu1 }
 0x84a   :  { %v3948_v43 = vmul.f32 %v3940_v56, %v7588_v26  ;;  %v3824_v40 = vadd.f32 %v3823_v59, %v3484_v5  ;;  %v6541_v5 = vld [vmem:[#allocation15 + $0x154] sm:$0xf]  ;;  %v6155_v59 = vld [vmem:[#allocation15 + $0x1d8] sm:$0xf0] }
 0x84b   :  { %v7597_v55 = vadd.f32 %v3863_v54, %v3850_v25  ;;  %v6094_v3 = vor.u32 %v6541_v5, %v6091_v8  ;;  %v6086_v54 = vor.u32 %v6539_v28, %v6083_v27  ;;  %v5998_v25 = vor.u32 %v6517_v20, %v5995_v10  ;;  %v6555_v5 = vld [vmem:[#allocation15 + $0x1c4] sm:$0xf] }
 0x84c   :  { %v3956_v45 = vadd.f32 %v3948_v43, %v7588_v26  ;;  %v7600_v49 = vadd.f32 %v3837_v1, %v3824_v40  ;;  %v6158_v23 = vor.u32 %v6557_v18, %v6155_v59  ;;  %v3487_v40 = vperm.slane %v7582_v14, 3  ;;  %v6551_v27 = vld [vmem:[#allocation15 + $0x1a4] sm:$0xf] }
 0x84d   :  { %v3933_v22 = vmul.f32 0.044715, %v7597_v55  ;;  %4472 = vmatpush.bf16.msrb.mxu2 %v6094_v3  ;;  %4462 = vmatpush.bf16.msrb.mxu1 %v5998_v25  ;;  %v6131_v25 = vld [vmem:[#allocation15 + $0x1a8] sm:$0xf0]  ;;  %v6531_v59 = vld [vmem:[#allocation15 + $0x104] sm:$0xf] }
 0x84e   :  { %v3964_v53 = vmul.f32 0.7978846, %v3956_v45  ;;  %v3936_v63 = vmul.f32 0.044715, %v7600_v49  ;;  %4486 = vmatpush.bf16.msrb.mxu3 %v6158_v23  ;;  %v3928_v10 = vmul.f32 0.5, %v7600_v49  ;;  %v6134_v24 = vor.u32 %v6551_v27, %v6131_v25 }
 0x84f   :  { %v3941_v6 = vmul.f32 %v3933_v22, %v7597_v55  ;;  %v6147_v22 = vld [vmem:[#allocation15 + $0x1c8] sm:$0xf0]  ;;  %v3925_v14 = vmul.f32 0.5, %v7597_v55 }
 0x850   :  { %v3944_v41 = vmul.f32 %v3936_v63, %v7600_v49  ;;  %v3851_v47 = vpop.f32.mrf.mxu2  ;;  %v3865_v4 = vpop.f32.mrf.mxu3  ;;  %6653 = vtanh.f32 %v3964_v53 }
 0x851   :  { %v3949_v19 = vmul.f32 %v3941_v6, %v7597_v55  ;;  %v3852_v16 = vadd.f32 %v3851_v47, %v3485_v33  ;;  %v3877_v39 = vpop.f32.mrf.mxu0  ;;  %v3891_v15 = vpop.f32.mrf.mxu1  ;;  %4473 = vmatpush.bf16.msrb.mxu2 %v6086_v54  ;;  %v6150_v6 = vor.u32 %v6555_v5, %v6147_v22  ;;  %4463 = vmatpush.bf16.msrb.mxu1 %v5990_v7  ;;  %v6553_v47 = vld [vmem:[#allocation15 + $0x1b4] sm:$0xf] }
 0x852   :  { %v3952_v56 = vmul.f32 %v3944_v41, %v7600_v49  ;;  %v3878_v17 = vadd.f32 %v3877_v39, %v3486_v61  ;;  %v6070_v41 = vor.u32 %v6535_v57, %v6067_v37 }
 0x853   :  { %v3957_v11 = vadd.f32 %v3949_v19, %v7597_v55  ;;  %v7614_v33 = vadd.f32 %v3865_v4, %v3852_v16  ;;  %v6139_v4 = vld [vmem:[#allocation15 + $0x1b8] sm:$0xf0]  ;;  %4487 = vmatpush.bf16.msrb.mxu3 %v6150_v6 }
 0x854   :  { %v3960_v1 = vadd.f32 %v3952_v56, %v7600_v49  ;;  %v7617_v21 = vadd.f32 %v3891_v15, %v3878_v17  ;;  %v6142_v36 = vor.u32 %v6553_v47, %v6139_v4  ;;  %v6533_v15 = vld [vmem:[#allocation15 + $0x114] sm:$0xf]  ;;  %v3924_v17 = vmul.f32 0.5, %v7588_v26 }
 0x855   :  { %v3937_v43 = vmul.f32 0.044715, %v7614_v33  ;;  %v3965_v34 = vmul.f32 0.7978846, %v3957_v11  ;;  %4474 = vmatpush.bf16.msrb.mxu2 %v6078_v13  ;;  %v6549_v26 = vld [vmem:[#allocation15 + $0x194] sm:$0xf] }
 0x856   :  { %v3968_v30 = vmul.f32 0.7978846, %v3960_v1  ;;  %v3934_v48 = vmul.f32 0.044715, %v7617_v21  ;;  %v6654_v8 = vpop.eup %6653  ;;  %v6123_v13 = vld [vmem:[#allocation15 + $0x198] sm:$0xf0] }
 0x857   :  { %v3945_v60 = vmul.f32 %v3937_v43, %v7614_v33  ;;  %v3980_v19 = vadd.f32 1.0, %v6654_v8  ;;  %4488 = vmatpush.bf16.msrb.mxu3 %v6142_v36  ;;  %v6051_v43 = vld [vmem:[#allocation15 + $0x108] sm:$0xf0]  ;;  %v6126_v7 = vor.u32 %v6549_v26, %v6123_v13  ;;  %v3929_v8 = vmul.f32 0.5, %v7614_v33 }
 0x858   :  { %6655 = vtanh.f32 %v3968_v30  ;;  %v3942_v45 = vmul.f32 %v3934_v48, %v7617_v21  ;;  %v3905_v51 = vpop.f32.mrf.mxu2  ;;  %v3919_v62 = vpop.f32.mrf.mxu3  ;;  %v7656_v13 = vld [vmem:[#allocation17 + $0x8] sm:$0xff] }
 0x859   :  { %v3953_v53 = vmul.f32 %v3945_v60, %v7614_v33  ;;  %v3906_v63 = vadd.f32 %v3905_v51, %v3487_v40  ;;  %v3879_v3 = vpop.f32.mrf.mxu0  ;;  %6657 = vtanh.f32 %v3965_v34  ;;  %v3893_v2 = vpop.f32.mrf.mxu1  ;;  %4475 = vmatpush.bf16.msrb.mxu2 %v6070_v41  ;;  %v3988_v58 = vmul.f32 %v3980_v19, %v3924_v17 }
 0x85a   :  { %v3950_v31 = vmul.f32 %v3942_v45, %v7617_v21  ;;  %v3880_v32 = vadd.f32 %v3879_v3, %v3486_v61  ;;  %v6059_v61 = vld [vmem:[#allocation15 + $0x118] sm:$0xf0]  ;;  %v6054_v60 = vor.u32 %v6531_v59, %v6051_v43  ;;  %v6547_v3 = vld [vmem:[#allocation15 + $0x184] sm:$0xf] }
 0x85b   :  { %v3961_v9 = vadd.f32 %v3953_v53, %v7614_v33  ;;  %v7631_v35 = vadd.f32 %v3919_v62, %v3906_v63  ;;  %v6062_v28 = vor.u32 %v6533_v15, %v6059_v61  ;;  %4489 = vmatpush.bf16.msrb.mxu3 %v6134_v24  ;;  %v7653_v43 = vld [vmem:[#allocation17] sm:$0xff] }
 0x85c   :  { %v3958_v16 = vadd.f32 %v3950_v31, %v7617_v21  ;;  %v7634_v39 = vadd.f32 %v3893_v2, %v3880_v32  ;;  %v6115_v31 = vld [vmem:[#allocation15 + $0x188] sm:$0xf0] }
 0x85d   :  { %v3969_v52 = vmul.f32 0.7978846, %v3961_v9  ;;  %v3935_v12 = vmul.f32 0.044715, %v7631_v35  ;;  %4476 = vmatpush.bf16.msrb.mxu2 %v6062_v28  ;;  %v6118_v47 = vor.u32 %v6547_v3, %v6115_v31 }
 0x85e   :  { %v6656_v56 = vpop.eup %6655  ;;  %v3966_v54 = vmul.f32 0.7978846, %v3958_v16  ;;  %v3938_v20 = vmul.f32 0.044715, %v7634_v39  ;;  %v3926_v16 = vmul.f32 0.5, %v7617_v21  ;;  %v3930_v15 = vmul.f32 0.5, %v7634_v39 }
 0x85f   :  { %v3984_v18 = vadd.f32 1.0, %v6656_v56  ;;  %6659 = vtanh.f32 %v3969_v52  ;;  %v3943_v11 = vmul.f32 %v3935_v12, %v7631_v35  ;;  %v6658_v30 = vpop.eup %6657  ;;  %4490 = vmatpush.bf16.msrb.mxu3 %v6126_v7 }
 0x860   :  { %v3946_v1 = vmul.f32 %v3938_v20, %v7634_v39  ;;  %v3907_v23 = vpop.f32.mrf.mxu2  ;;  %v3921_v46 = vpop.f32.mrf.mxu3  ;;  %v3981_v5 = vadd.f32 1.0, %v6658_v30  ;;  %6661 = vtanh.f32 %v3966_v54  ;;  %v3927_v54 = vmul.f32 0.5, %v7631_v35 }
 0x861   :  { %v3951_v48 = vmul.f32 %v3943_v11, %v7631_v35  ;;  %v3908_v49 = vadd.f32 %v3907_v23, %v3487_v40  ;;  %v3992_v34 = vmul.f32 %v3984_v18, %v3928_v10  ;;  %4477 = vmatpush.bf16.msrb.mxu2 %v6054_v60  ;;  %v4065_v30 = vperm.slane %v7656_v13, 5 }
 0x862   :  { %v3954_v44 = vmul.f32 %v3946_v1, %v7634_v39  ;;  %v3989_v32 = vmul.f32 %v3981_v5, %v3925_v14 }
 0x863   :  { %v3959_v45 = vadd.f32 %v3951_v48, %v7631_v35  ;;  %v3922_v51 = vadd.f32 %v3921_v46, %v3908_v49  ;;  %v3996_v62 = vpack.c.bf16 %v3992_v34, %v3988_v58  ;;  %4491 = vmatpush.bf16.msrb.mxu3 %v6118_v47  ;;  %v4064_v35 = vperm.slane %v7653_v43, 5 }
 0x864   :  { %v3962_v22 = vadd.f32 %v3954_v44, %v7634_v39 }
 0x865   :  { %v6660_v57 = vpop.eup %6659  ;;  %v3939_v40 = vmul.f32 0.044715, %v3922_v51  ;;  %4394 = vmatmul.bf16.vlgmr.msra.gmra.mxu0 %v3996_v62  ;;  %v3967_v6 = vmul.f32 0.7978846, %v3959_v45  ;;  %v3931_v20 = vmul.f32 0.5, %v3922_v51 }
 0x866   :  { %v3985_v53 = vadd.f32 1.0, %v6660_v57  ;;  %v3970_v63 = vmul.f32 0.7978846, %v3962_v22  ;;  %v6662_v9 = vpop.eup %6661 }
 0x867   :  { %v3947_v37 = vmul.f32 %v3939_v40, %v3922_v51  ;;  %v3982_v36 = vadd.f32 1.0, %v6662_v9 }
 0x868   :  { %6663 = vtanh.f32 %v3970_v63  ;;  %v3993_v41 = vmul.f32 %v3985_v53, %v3929_v8 }
 0x869   :  { %v3955_v4 = vmul.f32 %v3947_v37, %v3922_v51  ;;  %6665 = vtanh.f32 %v3967_v6  ;;  %v3990_v12 = vmul.f32 %v3982_v36, %v3926_v16 }
 0x86a   :  { %v3997_v2 = vpack.c.bf16 %v3993_v41, %v3989_v32 }
 0x86b   :  { %v3963_v55 = vadd.f32 %v3955_v4, %v3922_v51 }
 0x86c   :  { %4408 = vmatmul.bf16.vlgmr.msra.gmra.mxu1 %v3997_v2 }
 0x86d   :  { %v3971_v33 = vmul.f32 0.7978846, %v3963_v55 }
 0x86e   :  { %v6664_v19 = vpop.eup %6663 }
 0x86f   :  { %v3986_v61 = vadd.f32 1.0, %v6664_v19  ;;  %6667 = vtanh.f32 %v3971_v33  ;;  %v6666_v52 = vpop.eup %6665 }
 0x870   :  { %v3983_v56 = vadd.f32 1.0, %v6666_v52 }
 0x871   :  { %v3994_v28 = vmul.f32 %v3986_v61, %v3930_v15 }
 0x872   :  { %v3991_v18 = vmul.f32 %v3983_v56, %v3927_v54 }
 0x873   :  { %v3998_v27 = vpack.c.bf16 %v3994_v28, %v3990_v12 }
 0x875   :  { %v6668_v17 = vpop.eup %6667  ;;  %4422 = vmatmul.bf16.vlgmr.msra.gmra.mxu2 %v3998_v27  ;;  %4450 = vmatmul.bf16.vlgmr.msrb.gmra.mxu0 %v3996_v62 }
 0x876   :  { %v3987_v10 = vadd.f32 1.0, %v6668_v17 }
 0x878   :  { %v3995_v11 = vmul.f32 %v3987_v10, %v3931_v20 }
 0x87a   :  { %v3999_v25 = vpack.c.bf16 %v3995_v11, %v3991_v18 }
 0x87c   :  { %4436 = vmatmul.bf16.vlgmr.msra.gmra.mxu3 %v3999_v25  ;;  %4464 = vmatmul.bf16.vlgmr.msrb.gmra.mxu1 %v3997_v2 }
 0x885   :  { %4478 = vmatmul.bf16.vlgmr.msrb.gmra.mxu2 %v3998_v27 }
 0x88c   :  { %4492 = vmatmul.bf16.vlgmr.msrb.gmra.mxu3 %v3999_v25 }
 0x8e2   :  { %v4395_v21 = vpop.f32.mrf.mxu0 }
 0x8e3   :  { %v4396_v34 = vadd.f32 %v4395_v21, %v4064_v35 }
 0x8e9   :  { %v4409_v39 = vpop.f32.mrf.mxu1 }
 0x8ea   :  { %v4397_v1 = vpop.f32.mrf.mxu0  ;;  %v4410_v44 = vadd.f32 %v4409_v39, %v4396_v34  ;;  %v4558_v34 = vperm.slane %v7653_v43, 7 }
 0x8eb   :  { %v4398_v57 = vadd.f32 %v4397_v1, %v4064_v35  ;;  %v4552_v35 = vperm.slane %v7653_v43, 6 }
 0x8f1   :  { %v4411_v23 = vpop.f32.mrf.mxu1 }
 0x8f2   :  { %v4451_v26 = vpop.f32.mrf.mxu0  ;;  %v4412_v8 = vadd.f32 %v4411_v23, %v4398_v57 }
 0x8f3   :  { %v4452_v46 = vadd.f32 %v4451_v26, %v4065_v30  ;;  %v4553_v26 = vperm.slane %v7656_v13, 6 }
 0x8f8   :  { %v4423_v59 = vpop.f32.mrf.mxu2 }
 0x8f9   :  { %v4465_v48 = vpop.f32.mrf.mxu1  ;;  %v4424_v45 = vadd.f32 %v4423_v59, %v4410_v44 }
 0x8fa   :  { %v4466_v51 = vadd.f32 %v4465_v48, %v4452_v46  ;;  %v4453_v5 = vpop.f32.mrf.mxu0 }
 0x8fb   :  { %v4454_v53 = vadd.f32 %v4453_v5, %v4065_v30 }
 0x8ff   :  { %v4437_v58 = vpop.f32.mrf.mxu3 }
 0x900   :  { %v4425_v24 = vpop.f32.mrf.mxu2  ;;  %v4438_v62 = vadd.f32 %v4437_v58, %v4424_v45 }
 0x901   :  { %v4467_v40 = vpop.f32.mrf.mxu1  ;;  %v4426_v37 = vadd.f32 %v4425_v24, %v4412_v8 }
 0x902   :  { %v4498_v63 = vadd.f32 %v4438_v62, %v7525_v0  ;;  %v4468_v31 = vadd.f32 %v4467_v40, %v4454_v53 }
 0x907   :  { %v4439_v49 = vpop.f32.mrf.mxu3 }
 0x908   :  { %v4479_v60 = vpop.f32.mrf.mxu2  ;;  %v4440_v41 = vadd.f32 %v4439_v49, %v4426_v37 }
 0x909   :  { %v4480_v7 = vadd.f32 %v4479_v60, %v4466_v51  ;;  %v4559_v60 = vperm.slane %v7656_v13, 7 }
 0x90a   :  { %v4500_v2 = vadd.f32 %v4440_v41, %v7531_v38 }
 0x90f   :  { %v4493_v22 = vpop.f32.mrf.mxu3 }
 0x910   :  { %v4494_v14 = vadd.f32 %v4493_v22, %v4480_v7  ;;  %v4481_v6 = vpop.f32.mrf.mxu2 }
 0x911   :  { %v4482_v47 = vadd.f32 %v4481_v6, %v4468_v31 }
 0x912   :  { %v4499_v3 = vadd.f32 %v4494_v14, %v7527_v29 }
 0x914   :  { %v4502_v32 = vadd.f32 %v4499_v3, %v4498_v63 }
 0x916   :  { %4503 = vadd.xlane.f32.xlu1 %v4502_v32 }
 0x917   :  { %v4495_v4 = vpop.f32.mrf.mxu3 }
 0x918   :  { %v4496_v9 = vadd.f32 %v4495_v4, %v4482_v47 }
 0x91a   :  { %v4501_v55 = vadd.f32 %v4496_v9, %v7533_v42 }
 0x91c   :  { %v4505_v36 = vadd.f32 %v4501_v55, %v4500_v2 }
 0x91e   :  { %4506 = vadd.xlane.f32.xlu2 %v4505_v36 }
 0x989   :  { %v4504_v33 = vpop.xlane.xlu1 %4503 }
 0x98a   :  { %v4508_v0 = vmul.f32 %v4504_v33, %v7515_v50 }
 0x98c   :  { %v4510_v19 = vsub.f32 %v4498_v63, %v4508_v0  ;;  %v4511_v29 = vsub.f32 %v4499_v3, %v4508_v0 }
 0x98e   :  { %v4514_v16 = vmul.f32 %v4510_v19, %v4510_v19  ;;  %v4515_v15 = vmul.f32 %v4511_v29, %v4511_v29 }
 0x990   :  { %v4518_v61 = vadd.f32 %v4515_v15, %v4514_v16 }
 0x991   :  { %v4507_v52 = vpop.xlane.xlu2 %4506 }
 0x992   :  { %v4509_v12 = vmul.f32 %v4507_v52, %v7515_v50  ;;  %4519 = vadd.xlane.f32.xlu0 %v4518_v61 }
 0x994   :  { %v4512_v28 = vsub.f32 %v4500_v2, %v4509_v12  ;;  %v4513_v27 = vsub.f32 %v4501_v55, %v4509_v12 }
 0x996   :  { %v4516_v56 = vmul.f32 %v4512_v28, %v4512_v28  ;;  %v4517_v38 = vmul.f32 %v4513_v27, %v4513_v27 }
 0x998   :  { %v4521_v17 = vadd.f32 %v4517_v38, %v4516_v56 }
 0x99a   :  { %4522 = vadd.xlane.f32.xlu1 %v4521_v17 }
 0xa05   :  { %v4520_v42 = vpop.xlane.xlu0 %4519 }
 0xa06   :  { %v4524_v54 = vmul.f32 %v4520_v42, %v7515_v50 }
 0xa08   :  { %v4526_v20 = vadd.f32 1e-05, %v4524_v54 }
 0xa0a   :  { %6669 = vrsqrt.f32 %v4526_v20  ;;  %vm4534_vm2 = vweird.f32 %v4526_v20 }
 0xa0d   :  { %v4523_v10 = vpop.xlane.xlu1 %4522 }
 0xa0e   :  { %v4525_v18 = vmul.f32 %v4523_v10, %v7515_v50 }
 0xa10   :  { %v6670_v11 = vpop.eup %6669  ;;  %v4527_v25 = vadd.f32 1e-05, %v4525_v18 }
 0xa11   :  { %v4529_v21 = vmul.f32 %v6670_v11, %v4526_v20  ;;  %vm4535_vm1 = vweird.f32 %v6670_v11 }
 0xa12   :  { %6671 = vrsqrt.f32 %v4527_v25  ;;  %vm4536_vm3 = vmor %vm4534_vm2, %vm4535_vm1  ;;  %vm4544_vm5 = vweird.f32 %v4527_v25 }
 0xa13   :  { %v4530_v39 = vmul.f32 %v6670_v11, %v4529_v21 }
 0xa15   :  { %v4531_v59 = vmul.f32 0.5, %v4530_v39 }
 0xa17   :  { %v4532_v1 = vsub.f32 1.5, %v4531_v59 }
 0xa18   :  { %v6672_v23 = vpop.eup %6671 }
 0xa19   :  { %v4533_v58 = vmul.f32 %v6670_v11, %v4532_v1  ;;  %v4539_v24 = vmul.f32 %v6672_v23, %v4527_v25  ;;  %vm4545_vm4 = vweird.f32 %v6672_v23 }
 0xa1a   :  { %vm4546_vm6 = vmor %vm4544_vm5, %vm4545_vm4 }
 0xa1b   :  { %v4537_v30 = vsel %vm4536_vm3, %v6670_v11, %v4533_v58  ;;  %v4540_v48 = vmul.f32 %v6672_v23, %v4539_v24 }
 0xa1c   :  { %v4548_v50 = vmul.f32 %v4537_v30, %v4510_v19  ;;  %v4549_v49 = vmul.f32 %v4537_v30, %v4511_v29 }
 0xa1d   :  { %v4541_v44 = vmul.f32 0.5, %v4540_v48 }
 0xa1e   :  { %v4554_v46 = vmul.f32 %v4552_v35, %v4548_v50  ;;  %v4555_v45 = vmul.f32 %v4553_v26, %v4549_v49 }
 0xa1f   :  { %v4542_v51 = vsub.f32 1.5, %v4541_v44 }
 0xa20   :  { %v4560_v62 = vadd.f32 %v4558_v34, %v4554_v46  ;;  %v4561_v7 = vadd.f32 %v4559_v60, %v4555_v45 }
 0xa21   :  { %v4543_v5 = vmul.f32 %v6672_v23, %v4542_v51 }
 0xa22   :  { %4564 = vst [vmem:[#allocation18] sm:$0xff] %v4560_v62 }
 0xa23   :  { %v4547_v22 = vsel %vm4546_vm6, %v6672_v23, %v4543_v5  ;;  %4565 = vst [vmem:[#allocation18 + $0x8] sm:$0xff] %v4561_v7 }
 0xa24   :  { %v4550_v57 = vmul.f32 %v4547_v22, %v4512_v28  ;;  %v4551_v14 = vmul.f32 %v4547_v22, %v4513_v27 }
 0xa26   :  { %v4556_v40 = vmul.f32 %v4552_v35, %v4550_v57  ;;  %v4557_v8 = vmul.f32 %v4553_v26, %v4551_v14 }
 0xa28   :  { %v4562_v43 = vadd.f32 %v4558_v34, %v4556_v40  ;;  %v4563_v13 = vadd.f32 %v4559_v60, %v4557_v8 }
 0xa2a   :  { %4566 = vst [vmem:[#allocation18 + $0x10] sm:$0xff] %v4562_v43 }
 0xa2b   :  { %4567 = vst [vmem:[#allocation18 + $0x18] sm:$0xff] %v4563_v13 }
 0xa2c   :  { %4580 = dma.vmem_to_hbm [thread:$0]  %s4573_s15, 512, %s4575_s18, [#allocation5], %s6932_s21, %s6932_s21, %s6933_s22  }
 0xa2d   :  { %6929 = dma.done.wait [#allocation5], 512  }
 0xa2e   :  { %6930 = vsyncadd [#allocation5], 4294966784 }
 0xa2f   :  { %4585 = vsyncpa [#allocation4], 1 }
 0xa30   :  { %4586 = vsyncpa [#allocation7], 1 }
 0xa31   :  { %4587 = vsyncpa [#allocation10], 1 }
 0xa32   :  { %4588 = vsyncpa [#allocation13], 1 }
 0xa33   :  { %4589 = vsyncpa [#allocation16], 1 }
 0xa34   :  { %4590 = vsyncpa [#allocation5], 1 }

</bundles_post_ra>
